<compile_context>
chip_gen: v6e
topology: v6e:2x2x1
jax: 0.10.0
libtpu: 0.0.40
codegen_flags: <defaults>
</compile_context>

<pallas_src>
import math
import functools

import jax
import jax.numpy as jnp
from jax.experimental import pallas as pl
from jax.experimental.pallas import tpu as pltpu


# ----------------------------------------------------------------------------- utils
def _round_up(x, m):
    return (x + m - 1) // m * m


def _compute_vmem_limit():
    cap = None
    try:
        cap = getattr(pltpu.get_tpu_info(), "vmem_capacity_bytes", None)
    except Exception:
        cap = None
    if not cap:
        return 32 * 1024 * 1024
    # 48 MiB on v5e/v6e (128 MiB physical), ~38 MiB on v7x (64 MiB physical).
    return min(48 * 1024 * 1024, int(0.6 * cap))


_VMEM_LIMIT = _compute_vmem_limit()
_DIRECT_CONV_VMEM_BUDGET = int(0.8 * _VMEM_LIMIT)

_KEY = [jax.random.PRNGKey(0)]


def _next_key():
    _KEY[0], sub = jax.random.split(_KEY[0])
    return sub


def _kaiming_conv(cout, cin, k):
    # kaiming_normal_(mode='fan_out', nonlinearity='relu'): std = sqrt(2 / (cout*k*k))
    std = math.sqrt(2.0 / (cout * k * k))
    return (std * jax.random.normal(_next_key(), (cout, cin, k, k))).astype(jnp.float32)


# Feature flags set by cheap eager probes in __main__ (safe fallbacks if a
# lowering path is not supported on this backend/jax version).
_UNPADDED_MM = [True]
_USE_DIRECT_CONV3 = [True]


# ----------------------------------------------------------------------- Pallas matmul
def _matmul_1pass_kernel(a_ref, b_ref, o_ref):
    # Whole K fits in one block: single MXU pass, single store.
    o_ref[...] = jnp.dot(a_ref[...], b_ref[...], preferred_element_type=jnp.float32)


def _matmul_kacc_kernel(a_ref, b_ref, o_ref):
    # K-blocked: output block is K-invariant and f32 -> accumulate directly into it
    # (no scratch accumulator, no final copy).
    @pl.when(pl.program_id(2) == 0)
    def _init():
        o_ref[...] = jnp.zeros_like(o_ref)

    o_ref[...] += jnp.dot(a_ref[...], b_ref[...], preferred_element_type=jnp.float32)


def _pick_row_tile(M):
    """Row tile that divides M, is a multiple of 8, and yields >=2 grid steps when
    possible (v7x megacore).  Falls back to a single full-dim block / padded 256."""
    for t in (512, 256, 128, 64):
        if M % t == 0 and M // t >= 2:
            return t, M
    if M <= 1024:
        return M, M
    return 256, _round_up(M, 256)


def pallas_matmul(a, b):
    """(M,K) @ (K,N) -> f32.  bf16 operands, f32 MXU accumulation.  Small N / K are
    used as full-dim blocks (no 128-lane padding, no pad/slice HLOs)."""
    M, K = a.shape
    _, N = b.shape
    a = a.astype(jnp.bfloat16)
    b = b.astype(jnp.bfloat16)
    pad_lanes = not _UNPADDED_MM[0]

    # Output-column tile.
    if N >= 256:
        tn = 256
        Np = _round_up(N, tn)
    elif pad_lanes:
        tn = 128
        Np = 128
    else:
        tn = N          # full-dim block: masked stores beat 8-16x HBM inflation
        Np = N

    # Reduction tile.
    if K > 1024:
        tk = 512
        Kp = _round_up(K, tk)
        use_k_axis = True
    else:
        Kp = _round_up(K, 128) if pad_lanes else K
        tk = Kp
        use_k_axis = False

    tm, Mp = _pick_row_tile(M)

    if (Mp, Kp) != (M, K):
        a = jnp.pad(a, ((0, Mp - M), (0, Kp - K)))
    if (Kp, Np) != (K, N):
        b = jnp.pad(b, ((0, Kp - K), (0, Np - N)))

    if use_k_axis:
        out = pl.pallas_call(
            _matmul_kacc_kernel,
            out_shape=jax.ShapeDtypeStruct((Mp, Np), jnp.float32),
            grid=(Mp // tm, Np // tn, Kp // tk),
            in_specs=[
                pl.BlockSpec((tm, tk), lambda i, j, k: (i, k)),
                pl.BlockSpec((tk, tn), lambda i, j, k: (k, j)),
            ],
            out_specs=pl.BlockSpec((tm, tn), lambda i, j, k: (i, j)),
            compiler_params=pltpu.CompilerParams(
                dimension_semantics=("parallel", "parallel", "arbitrary"),
                vmem_limit_bytes=_VMEM_LIMIT,
            ),
        )(a, b)
    else:
        out = pl.pallas_call(
            _matmul_1pass_kernel,
            out_shape=jax.ShapeDtypeStruct((Mp, Np), jnp.float32),
            grid=(Mp // tm, Np // tn),
            in_specs=[
                pl.BlockSpec((tm, Kp), lambda i, j: (i, 0)),
                pl.BlockSpec((Kp, tn), lambda i, j: (0, j)),
            ],
            out_specs=pl.BlockSpec((tm, tn), lambda i, j: (i, j)),
            compiler_params=pltpu.CompilerParams(
                dimension_semantics=("parallel", "parallel"),
                vmem_limit_bytes=_VMEM_LIMIT,
            ),
        )(a, b)

    if (Mp, Np) != (M, N):
        out = out[:M, :N]
    return out


# -------------------------------------------------- direct (im2col-free) 3x3 conv
def _conv3x3_kernel(x_ref, w_ref, o_ref, *, Lq, Wp):
    # x_ref: (1, Lp, Cin_p) bf16 -- one zero-padded image, rows flattened
    # w_ref: (9, Cin_p, tn)  bf16 -- per-tap weight matrices
    # o_ref: (1, Lq, tn)     f32  -- output incl. 2 junk columns per image row
    # Accumulate the 9 tap GEMMs locally; o_ref is written exactly once.
    acc = None
    for t in range(9):
        off = (t // 3) * Wp + (t % 3)            # static tap offset in flattened rows
        part = jnp.dot(x_ref[0, off:off + Lq, :], w_ref[t],
                       preferred_element_type=jnp.float32)
        acc = part if acc is None else acc + part
    o_ref[0] = acc


def _conv_im2col(x, w, stride=1, padding=0):
    """Fallback path (general k / very large images): im2col + Pallas matmul."""
    N, H, W, Cin = x.shape
    Cout, _, kh, kw = w.shape
    xp = jnp.pad(x, ((0, 0), (padding, padding), (padding, padding), (0, 0)))
    Ho = (H + 2 * padding - kh) // stride + 1
    Wo = (W + 2 * padding - kw) // stride + 1
    cols = [xp[:, di:di + stride * Ho:stride, dj:dj + stride * Wo:stride, :]
            for di in range(kh) for dj in range(kw)]
    patches = jnp.concatenate(cols, axis=-1).reshape(N * Ho * Wo, kh * kw * Cin)
    wmat = jnp.transpose(w, (2, 3, 1, 0)).reshape(kh * kw * Cin, Cout)
    return pallas_matmul(patches, wmat).reshape(N, Ho, Wo, Cout)


def conv3x3_direct(x, w):
    """3x3 conv, stride 1, pad 1, no bias.  x: (N,H,W,Cin) f32, w: (Cout,Cin,3,3).

    The zero-padded image lives once in VMEM and the nine tap GEMMs accumulate
    in-kernel; output channels are NOT lane-padded (tn = Cout)."""
    N, H, W, Cin = x.shape
    Cout = w.shape[0]
    Wp = W + 2                      # padded row width
    Lq = H * Wp                     # output rows incl. 2 junk columns per image row
    Lp = (H + 3) * Wp               # padded rows: 1 top + 2 bottom keeps taps in range
    Cin_p = _round_up(Cin, 128)

    if Cout <= 256:
        tn = Cout                   # full-dim output block, no Cout padding
    else:
        tn = 256
    Cout_p = _round_up(Cout, tn)

    # Fall back to im2col when one image + weights + output would not pipeline in VMEM.
    vmem_need = (2 * Lp * Cin_p * 2          # double-buffered bf16 input
                 + 2 * 9 * Cin_p * tn * 2    # double-buffered bf16 weights
                 + 2 * Lq * tn * 4           # double-buffered f32 output
                 + Lq * tn * 4)              # accumulator spill headroom
    if vmem_need > _DIRECT_CONV_VMEM_BUDGET:
        return _conv_im2col(x, w, stride=1, padding=1)

    xp = jnp.pad(x, ((0, 0), (1, 2), (1, 1), (0, Cin_p - Cin))).astype(jnp.bfloat16)
    x2 = xp.reshape(N, Lp, Cin_p)
    wt = jnp.transpose(w, (2, 3, 1, 0)).reshape(9, Cin, Cout)
    if Cin_p != Cin or Cout_p != Cout:
        wt = jnp.pad(wt, ((0, 0), (0, Cin_p - Cin), (0, Cout_p - Cout)))
    wt = wt.astype(jnp.bfloat16)

    out = pl.pallas_call(
        functools.partial(_conv3x3_kernel, Lq=Lq, Wp=Wp),
        out_shape=jax.ShapeDtypeStruct((N, Lq, Cout_p), jnp.float32),
        grid=(Cout_p // tn, N),      # cout-tile outer -> weight block stays resident
        in_specs=[
            pl.BlockSpec((1, Lp, Cin_p), lambda j, n: (n, 0, 0)),
            pl.BlockSpec((9, Cin_p, tn), lambda j, n: (0, 0, j)),
        ],
        out_specs=pl.BlockSpec((1, Lq, tn), lambda j, n: (n, 0, j)),
        compiler_params=pltpu.CompilerParams(
            dimension_semantics=("parallel", "parallel"),
            vmem_limit_bytes=_VMEM_LIMIT,
        ),
    )(x2, wt)
    return out.reshape(N, H, Wp, Cout_p)[:, :, :W, :Cout]


def conv1x1(x, w):
    N, H, W, Cin = x.shape
    Cout = w.shape[0]
    wmat = jnp.transpose(w, (2, 3, 1, 0)).reshape(Cin, Cout)
    return pallas_matmul(x.reshape(N * H * W, Cin), wmat).reshape(N, H, W, Cout)


def conv2d(x, w, padding=0):
    k = w.shape[2]
    if k == 1:
        return conv1x1(x, w)
    if k == 3 and padding == 1 and _USE_DIRECT_CONV3[0]:
        return conv3x3_direct(x, w)
    return _conv_im2col(x, w, stride=1, padding=padding)


# -------------------------------------------------------- Pallas BatchNorm kernels
def _fold_lanes(x2d):
    """(M, C) -> (M*C/128, 128) when C divides 128 and M*C divides 128.
    Makes BN stats/affine loads & stores lane-dense."""
    M, C = x2d.shape
    if C < 128 and 128 % C == 0 and (M * C) % 128 == 0:
        fold = 128 // C
        return x2d.reshape((M * C) // 128, 128), fold
    return x2d, 1


def _pick_bn_tile(Mf):
    for t in (1024, 512, 256, 128, 64, 32, 16, 8):
        if Mf % t == 0 and Mf // t >= 2:
            return t
    return Mf


def _stats_kernel(x_ref, o_ref):
    x = x_ref[...]
    o_ref[0, 0:1, :] = jnp.sum(x, axis=0, keepdims=True)
    o_ref[0, 1:2, :] = jnp.sum(x * x, axis=0, keepdims=True)


def _pallas_channel_stats(x2d):
    """Single pass producing per-channel (sum, sum of squares); lane-folded."""
    M, C = x2d.shape
    xf, fold = _fold_lanes(x2d)
    Mf, Cf = xf.shape
    tr = _pick_bn_tile(Mf)
    nblk = Mf // tr
    part = pl.pallas_call(
        _stats_kernel,
        out_shape=jax.ShapeDtypeStruct((nblk, 2, Cf), jnp.float32),
        grid=(nblk,),
        in_specs=[pl.BlockSpec((tr, Cf), lambda i: (i, 0))],
        out_specs=pl.BlockSpec((1, 2, Cf), lambda i: (i, 0, 0)),
        compiler_params=pltpu.CompilerParams(
            dimension_semantics=("parallel",),
            vmem_limit_bytes=_VMEM_LIMIT,
        ),
    )(xf)
    s = jnp.sum(part, axis=0)                     # (2, Cf)
    if fold > 1:
        s = s.reshape(2, fold, C).sum(axis=1)     # unfold lanes -> per-channel
    return s[0], s[1]


def _affine_kernel(x_ref, s_ref, b_ref, o_ref, *, relu):
    y = x_ref[...] * s_ref[...] + b_ref[...]
    if relu:
        y = jnp.maximum(y, 0.0)
    o_ref[...] = y


def pallas_affine_act(x2d, scale, bias, relu):
    M, C = x2d.shape
    xf, fold = _fold_lanes(x2d)
    Mf, Cf = xf.shape
    if fold > 1:
        scale = jnp.tile(scale, fold)
        bias = jnp.tile(bias, fold)
    tr = _pick_bn_tile(Mf)
    out = pl.pallas_call(
        functools.partial(_affine_kernel, relu=relu),
        out_shape=jax.ShapeDtypeStruct((Mf, Cf), jnp.float32),
        grid=(Mf // tr,),
        in_specs=[
            pl.BlockSpec((tr, Cf), lambda i: (i, 0)),
            pl.BlockSpec((1, Cf), lambda i: (0, 0)),
            pl.BlockSpec((1, Cf), lambda i: (0, 0)),
        ],
        out_specs=pl.BlockSpec((tr, Cf), lambda i: (i, 0)),
        compiler_params=pltpu.CompilerParams(
            dimension_semantics=("parallel",),
            vmem_limit_bytes=_VMEM_LIMIT,
        ),
    )(xf, scale.reshape(1, Cf), bias.reshape(1, Cf))
    return out.reshape(M, C)


class BatchNorm2d:
    """Training-mode BatchNorm (biased batch statistics), gamma=1 / beta=0, eps=1e-5.
    One Pallas reduction pass for sum/sumsq + one fused affine(+ReLU) Pallas pass."""
    # TODO(synk): matches training-mode batch-stats semantics (fresh BN), not eval-mode
    # running statistics of a trained PyTorch checkpoint.

    def __init__(self, C):
        self.gamma = jnp.ones((C,), jnp.float32)
        self.beta = jnp.zeros((C,), jnp.float32)
        self.eps = 1e-5

    def __call__(self, x, relu=False):
        N, H, W, C = x.shape
        x2 = x.reshape(N * H * W, C)
        s, ss = _pallas_channel_stats(x2)
        cnt = float(N * H * W)
        mean = s / cnt
        var = jnp.maximum(ss / cnt - mean * mean, 0.0)
        scale = self.gamma * jax.lax.rsqrt(var + self.eps)
        bias = self.beta - mean * scale
        return pallas_affine_act(x2, scale, bias, relu).reshape(N, H, W, C)


# ----------------------------------------------------------------------- plain-JAX glue
def avgpool2(x):  # 2x2 average pool, stride 2
    N, H, W, C = x.shape
    return x.reshape(N, H // 2, 2, W // 2, 2, C).mean(axis=(2, 4))


def upsample_nearest2(x):
    return jnp.repeat(jnp.repeat(x, 2, axis=1), 2, axis=2)


def _interp_axis(x, axis, in_size, out_size):
    pos = jnp.linspace(0.0, in_size - 1.0, out_size)
    lo = jnp.floor(pos).astype(jnp.int32)
    hi = jnp.minimum(lo + 1, in_size - 1)
    w = (pos - lo.astype(pos.dtype)).astype(x.dtype)
    xlo = jnp.take(x, lo, axis=axis)
    xhi = jnp.take(x, hi, axis=axis)
    shape = [1] * x.ndim
    shape[axis] = out_size
    w = w.reshape(shape)
    return xlo * (1.0 - w) + xhi * w


def upsample_bilinear_x2(x):  # UpsamplingBilinear2d(scale_factor=2), align_corners=True
    N, H, W, C = x.shape
    x = _interp_axis(x, 1, H, 2 * H)
    x = _interp_axis(x, 2, W, 2 * W)
    return x


# --------------------------------------------------------------------- octave modules
class OctaveConv:
    """Octave convolution (stride 1, bias-free), NHWC.  The low-frequency input's
    l2h / l2l branches are merged into a single conv (split afterwards)."""

    def __init__(self, cin, cout, k, alpha_in=0.5, alpha_out=0.5, padding=0):
        self.padding = padding
        self.alpha_in, self.alpha_out = alpha_in, alpha_out
        cin_l = int(alpha_in * cin)
        cin_h = cin - cin_l
        cout_l = int(alpha_out * cout)
        cout_h = cout - cout_l
        self.w_h2h = _kaiming_conv(cout_h, cin_h, k) if (alpha_in < 1 and alpha_out < 1) else None
        self.w_h2l = _kaiming_conv(cout_l, cin_h, k) if (alpha_in < 1 and alpha_out > 0) else None
        self.w_l2h = _kaiming_conv(cout_h, cin_l, k) if (alpha_in > 0 and alpha_out < 1) else None
        self.w_l2l = _kaiming_conv(cout_l, cin_l, k) if (alpha_in > 0 and alpha_out > 0) else None
        if self.w_l2h is not None and self.w_l2l is not None:
            self.w_l2 = jnp.concatenate([self.w_l2h, self.w_l2l], axis=0)  # (cout_h+cout_l,...)
            self.cout_h_l2 = cout_h
        else:
            self.w_l2 = None
            self.cout_h_l2 = cout_h

    def __call__(self, x):
        x_h, x_l = x if isinstance(x, tuple) else (x, None)
        x_h2h = conv2d(x_h, self.w_h2h, padding=self.padding)
        x_h2l = (conv2d(avgpool2(x_h), self.w_h2l, padding=self.padding)
                 if self.alpha_out > 0 else None)
        if x_l is not None:
            if self.w_l2 is not None:
                y = conv2d(x_l, self.w_l2, padding=self.padding)      # one conv on x_l
                x_l2h = upsample_nearest2(y[..., :self.cout_h_l2])
                x_l2l = y[..., self.cout_h_l2:]
            else:
                x_l2l = (conv2d(x_l, self.w_l2l, padding=self.padding)
                         if self.w_l2l is not None else None)
                x_l2h = (upsample_nearest2(conv2d(x_l, self.w_l2h, padding=self.padding))
                         if self.w_l2h is not None else None)
            out_h = x_h2h + x_l2h if x_l2h is not None else x_h2h
            if x_h2l is not None and x_l2l is not None:
                out_l = x_h2l + x_l2l
            elif x_l2l is not None:
                out_l = x_l2l
            else:
                out_l = x_h2l
            return out_h, out_l
        return x_h2h, x_h2l


class OCTConv_BN_ACT:
    def __init__(self, cin, cout, k, alpha_in=0.5, alpha_out=0.5, padding=0):
        self.conv = OctaveConv(cin, cout, k, alpha_in, alpha_out, padding)
        cout_l = int(alpha_out * cout)
        cout_h = cout - cout_l
        self.bn_h = BatchNorm2d(cout_h) if alpha_out < 1 else None
        self.bn_l = BatchNorm2d(cout_l) if alpha_out > 0 else None

    def __call__(self, x):
        x_h, x_l = self.conv(x)
        x_h = self.bn_h(x_h, relu=True)
        x_l = self.bn_l(x_l, relu=True) if x_l is not None else None
        return x_h, x_l


class DecodeAll2:
    """Pallas/JAX port of PyTorch decode_all_2 (NCHW at the module boundary)."""

    def __init__(self, in_channels, out_channels, alpha_in=0.5, alpha_out=0.5):
        self.alpha_in, self.alpha_out = alpha_in, alpha_out
        if alpha_out == 0:
            self.conv2 = OCTConv_BN_ACT(in_channels, in_channels // 8, 1, padding=0)
            self.conv = OCTConv_BN_ACT(in_channels // 8, out_channels, 3, alpha_out=0, padding=1)
        elif alpha_in == 0:
            self.conv = OCTConv_BN_ACT(in_channels, in_channels // 8, 1, alpha_in=0, padding=0)
            self.conv2 = OCTConv_BN_ACT(in_channels // 8, out_channels, 3, padding=1)
        else:
            self.conv = OCTConv_BN_ACT(in_channels, in_channels // 8, 1, padding=0)
            self.conv2 = OCTConv_BN_ACT(in_channels // 8, out_channels, 3, padding=1)

    def __call__(self, en_h, en_l, de_h, de_l):
        to_nhwc = lambda t: None if t is None else jnp.transpose(t, (0, 2, 3, 1)).astype(jnp.float32)
        en_h, en_l, de_h, de_l = map(to_nhwc, (en_h, en_l, de_h, de_l))
        if self.alpha_in == 0:
            hh, ll = self.conv(en_h)
            hh, ll = upsample_bilinear_x2(hh), upsample_bilinear_x2(ll)
            hh, ll = self.conv2((hh, ll))
        elif self.alpha_out == 0:
            h = jnp.concatenate([en_h, de_h], axis=-1)
            l = jnp.concatenate([en_l, de_l], axis=-1)
            hh, ll = self.conv2((h, l))
            hh, ll = upsample_bilinear_x2(hh), upsample_bilinear_x2(ll)
            hh, ll = self.conv((hh, ll))
        else:
            h = jnp.concatenate([en_h, de_h], axis=-1)
            l = jnp.concatenate([en_l, de_l], axis=-1)
            hh, ll = self.conv((h, l))
            hh, ll = upsample_bilinear_x2(hh), upsample_bilinear_x2(ll)
            hh, ll = self.conv2((hh, ll))
        to_nchw = lambda t: None if t is None else jnp.transpose(t, (0, 3, 1, 2))
        return to_nchw(hh), to_nchw(ll)


# ----------------------------------------------------------------------------- probes
def _run_probes():
    """Tiny eager smoke-tests; if a fast path fails to lower on this backend we
    transparently fall back to the safe (padded / im2col) paths."""
    try:
        a = jnp.zeros((128, 64), jnp.float32)
        b = jnp.zeros((64, 16), jnp.float32)
        jax.block_until_ready(pallas_matmul(a, b))
    except Exception:
        _UNPADDED_MM[0] = False
    try:
        x = jnp.zeros((1, 8, 8, 8), jnp.float32)
        w = jnp.zeros((16, 8, 3, 3), jnp.float32)
        jax.block_until_ready(conv3x3_direct(x, w))
    except Exception:
        _USE_DIRECT_CONV3[0] = False


if __name__ == "__main__":
    _run_probes()

    key = jax.random.PRNGKey(0)
    k1, k2, k3, k4 = jax.random.split(key, 4)

    N = 2
    in_channels, out_channels = 128, 32
    H, W = 16, 16                                   # high-frequency spatial size
    # Each of en/de contributes half of the high / low channel budget (cin/2 each).
    en_h = jax.random.normal(k1, (N, in_channels // 4, H, W), jnp.float32)
    de_h = jax.random.normal(k2, (N, in_channels // 4, H, W), jnp.float32)
    en_l = jax.random.normal(k3, (N, in_channels // 4, H // 2, W // 2), jnp.float32)
    de_l = jax.random.normal(k4, (N, in_channels // 4, H // 2, W // 2), jnp.float32)

    model = DecodeAll2(in_channels, out_channels, alpha_in=0.5, alpha_out=0.5)
    fwd = jax.jit(model.__call__)
    hh, ll = fwd(en_h, en_l, de_h, de_l)
    hh, ll = jax.block_until_ready((hh, ll))

    cout_l = int(0.5 * out_channels)
    cout_h = out_channels - cout_l
    assert hh.shape == (N, cout_h, 2 * H, 2 * W), hh.shape
    assert ll.shape == (N, cout_l, H, W), ll.shape
    assert bool(jnp.all(jnp.isfinite(hh))) and bool(jnp.all(jnp.isfinite(ll)))
    print("KERNEL_OK")
</pallas_src>

<mosaic_0001>
module attributes {stable_mosaic.version = 11 : i64} {
  func.func @_matmul_1pass_kernel(%arg0: i32, %arg1: i32, %arg2: memref<64x64xbf16, #tpu.memory_space<vmem>>, %arg3: memref<64x16xbf16, #tpu.memory_space<vmem>>, %arg4: memref<64x16xf32, #tpu.memory_space<vmem>>) attributes {dimension_semantics = [#tpu.dimension_semantics<parallel>, #tpu.dimension_semantics<parallel>], iteration_bounds = array<i64: 2, 1>, scalar_prefetch = 0 : i64, scratch_operands = 0 : i64, tpu.core_type = #tpu.core_type<tc>, window_params = [{transform_indices = @transform_0, window_bounds = array<i64: 64, 64>}, {transform_indices = @transform_1, window_bounds = array<i64: 64, 16>}, {transform_indices = @transform_2, window_bounds = array<i64: 64, 16>}]} {
    %c0 = arith.constant 0 : index
    %c0_0 = arith.constant 0 : index
    %0 = vector.load %arg2[%c0, %c0_0] : memref<64x64xbf16, #tpu.memory_space<vmem>>, vector<64x64xbf16>
    %c0_1 = arith.constant 0 : index
    %c0_2 = arith.constant 0 : index
    %1 = vector.load %arg3[%c0_1, %c0_2] : memref<64x16xbf16, #tpu.memory_space<vmem>>, vector<64x16xbf16>
    %cst = arith.constant dense<0.000000e+00> : vector<64x16xf32>
    %2 = tpu.matmul %0, %1, %cst {dimension_numbers = #tpu.dot_dimension_numbers<[1], [0], [0], [1], [0, 0, 1, 1], [], []>} : vector<64x64xbf16>, vector<64x16xbf16>, vector<64x16xf32> -> vector<64x16xf32>
    %c0_3 = arith.constant 0 : index
    %c0_4 = arith.constant 0 : index
    %3 = vector.load %arg4[%c0_3, %c0_4] : memref<64x16xf32, #tpu.memory_space<vmem>>, vector<64x16xf32>
    tpu.vector_store %arg4[%c0_3, %c0_4], %2 {strides = array<i32>} : memref<64x16xf32, #tpu.memory_space<vmem>>, vector<64x16xf32>,
    return
  }
  func.func @transform_0(%arg0: i32, %arg1: i32) -> (i32, i32) {
    %c0_i32 = arith.constant 0 : i32
    %c0_i32_0 = arith.constant 0 : i32
    return %arg0, %c0_i32 : i32, i32
  }
  func.func @transform_1(%arg0: i32, %arg1: i32) -> (i32, i32) {
    %c0_i32 = arith.constant 0 : i32
    %c0_i32_0 = arith.constant 0 : i32
    return %c0_i32, %arg1 : i32, i32
  }
  func.func @transform_2(%arg0: i32, %arg1: i32) -> (i32, i32) {
    %c0_i32 = arith.constant 0 : i32
    return %arg0, %arg1 : i32, i32
  }
}

module attributes {stable_mosaic.version = 11 : i64} {
  func.func @_conv3x3_kernel(%arg0: i32, %arg1: i32, %arg2: memref<1x110x128xbf16, #tpu.memory_space<vmem>>, %arg3: memref<9x128x16xbf16, #tpu.memory_space<vmem>>, %arg4: memref<1x80x16xf32, #tpu.memory_space<vmem>>) attributes {dimension_semantics = [#tpu.dimension_semantics<parallel>, #tpu.dimension_semantics<parallel>], iteration_bounds = array<i64: 1, 1>, scalar_prefetch = 0 : i64, scratch_operands = 0 : i64, tpu.core_type = #tpu.core_type<tc>, window_params = [{transform_indices = @transform_0, window_bounds = array<i64: 1, 110, 128>}, {transform_indices = @transform_1, window_bounds = array<i64: 9, 128, 16>}, {transform_indices = @transform_2, window_bounds = array<i64: 1, 80, 16>}]} {
    %c0 = arith.constant 0 : index
    %c0_0 = arith.constant 0 : index
    %c0_1 = arith.constant 0 : index
    %0 = vector.load %arg2[%c0, %c0_0, %c0_1] : memref<1x110x128xbf16, #tpu.memory_space<vmem>>, vector<1x80x128xbf16>
    %1 = vector.shape_cast %0 : vector<1x80x128xbf16> to vector<80x128xbf16>
    %c0_2 = arith.constant 0 : index
    %c0_3 = arith.constant 0 : index
    %c0_4 = arith.constant 0 : index
    %2 = vector.load %arg3[%c0_2, %c0_3, %c0_4] : memref<9x128x16xbf16, #tpu.memory_space<vmem>>, vector<1x128x16xbf16>
    %3 = vector.shape_cast %2 : vector<1x128x16xbf16> to vector<128x16xbf16>
    %cst = arith.constant dense<0.000000e+00> : vector<80x16xf32>
    %4 = tpu.matmul %1, %3, %cst {dimension_numbers = #tpu.dot_dimension_numbers<[1], [0], [0], [1], [0, 0, 1, 1], [], []>} : vector<80x128xbf16>, vector<128x16xbf16>, vector<80x16xf32> -> vector<80x16xf32>
    %c0_5 = arith.constant 0 : index
    %c1 = arith.constant 1 : index
    %c0_6 = arith.constant 0 : index
    %5 = vector.load %arg2[%c0_5, %c1, %c0_6] : memref<1x110x128xbf16, #tpu.memory_space<vmem>>, vector<1x80x128xbf16>
    %6 = vector.shape_cast %5 : vector<1x80x128xbf16> to vector<80x128xbf16>
    %c1_7 = arith.constant 1 : index
    %c0_8 = arith.constant 0 : index
    %c0_9 = arith.constant 0 : index
    %7 = vector.load %arg3[%c1_7, %c0_8, %c0_9] : memref<9x128x16xbf16, #tpu.memory_space<vmem>>, vector<1x128x16xbf16>
    %8 = vector.shape_cast %7 : vector<1x128x16xbf16> to vector<128x16xbf16>
    %cst_10 = arith.constant dense<0.000000e+00> : vector<80x16xf32>
    %9 = tpu.matmul %6, %8, %cst_10 {dimension_numbers = #tpu.dot_dimension_numbers<[1], [0], [0], [1], [0, 0, 1, 1], [], []>} : vector<80x128xbf16>, vector<128x16xbf16>, vector<80x16xf32> -> vector<80x16xf32>
    %10 = arith.addf %4, %9 : vector<80x16xf32>
    %c0_11 = arith.constant 0 : index
    %c2 = arith.constant 2 : index
    %c0_12 = arith.constant 0 : index
    %11 = vector.load %arg2[%c0_11, %c2, %c0_12] : memref<1x110x128xbf16, #tpu.memory_space<vmem>>, vector<1x80x128xbf16>
    %12 = vector.shape_cast %11 : vector<1x80x128xbf16> to vector<80x128xbf16>
    %c2_13 = arith.constant 2 : index
    %c0_14 = arith.constant 0 : index
    %c0_15 = arith.constant 0 : index
    %13 = vector.load %arg3[%c2_13, %c0_14, %c0_15] : memref<9x128x16xbf16, #tpu.memory_space<vmem>>, vector<1x128x16xbf16>
    %14 = vector.shape_cast %13 : vector<1x128x16xbf16> to vector<128x16xbf16>
    %cst_16 = arith.constant dense<0.000000e+00> : vector<80x16xf32>
    %15 = tpu.matmul %12, %14, %cst_16 {dimension_numbers = #tpu.dot_dimension_numbers<[1], [0], [0], [1], [0, 0, 1, 1], [], []>} : vector<80x128xbf16>, vector<128x16xbf16>, vector<80x16xf32> -> vector<80x16xf32>
    %16 = arith.addf %10, %15 : vector<80x16xf32>
    %c0_17 = arith.constant 0 : index
    %c10 = arith.constant 10 : index
    %c0_18 = arith.constant 0 : index
    %17 = vector.load %arg2[%c0_17, %c10, %c0_18] : memref<1x110x128xbf16, #tpu.memory_space<vmem>>, vector<1x80x128xbf16>
    %18 = vector.shape_cast %17 : vector<1x80x128xbf16> to vector<80x128xbf16>
    %c3 = arith.constant 3 : index
    %c0_19 = arith.constant 0 : index
    %c0_20 = arith.constant 0 : index
    %19 = vector.load %arg3[%c3, %c0_19, %c0_20] : memref<9x128x16xbf16, #tpu.memory_space<vmem>>, vector<1x128x16xbf16>
    %20 = vector.shape_cast %19 : vector<1x128x16xbf16> to vector<128x16xbf16>
    %cst_21 = arith.constant dense<0.000000e+00> : vector<80x16xf32>
    %21 = tpu.matmul %18, %20, %cst_21 {dimension_numbers = #tpu.dot_dimension_numbers<[1], [0], [0], [1], [0, 0, 1, 1], [], []>} : vector<80x128xbf16>, vector<128x16xbf16>, vector<80x16xf32> -> vector<80x16xf32>
    %22 = arith.addf %16, %21 : vector<80x16xf32>
    %c0_22 = arith.constant 0 : index
    %c11 = arith.constant 11 : index
    %c0_23 = arith.constant 0 : index
    %23 = vector.load %arg2[%c0_22, %c11, %c0_23] : memref<1x110x128xbf16, #tpu.memory_space<vmem>>, vector<1x80x128xbf16>
    %24 = vector.shape_cast %23 : vector<1x80x128xbf16> to vector<80x128xbf16>
    %c4 = arith.constant 4 : index
    %c0_24 = arith.constant 0 : index
    %c0_25 = arith.constant 0 : index
    %25 = vector.load %arg3[%c4, %c0_24, %c0_25] : memref<9x128x16xbf16, #tpu.memory_space<vmem>>, vector<1x128x16xbf16>
    %26 = vector.shape_cast %25 : vector<1x128x16xbf16> to vector<128x16xbf16>
    %cst_26 = arith.constant dense<0.000000e+00> : vector<80x16xf32>
    %27 = tpu.matmul %24, %26, %cst_26 {dimension_numbers = #tpu.dot_dimension_numbers<[1], [0], [0], [1], [0, 0, 1, 1], [], []>} : vector<80x128xbf16>, vector<128x16xbf16>, vector<80x16xf32> -> vector<80x16xf32>
    %28 = arith.addf %22, %27 : vector<80x16xf32>
    %c0_27 = arith.constant 0 : index
    %c12 = arith.constant 12 : index
    %c0_28 = arith.constant 0 : index
    %29 = vector.load %arg2[%c0_27, %c12, %c0_28] : memref<1x110x128xbf16, #tpu.memory_space<vmem>>, vector<1x80x128xbf16>
    %30 = vector.shape_cast %29 : vector<1x80x128xbf16> to vector<80x128xbf16>
    %c5 = arith.constant 5 : index
    %c0_29 = arith.constant 0 : index
    %c0_30 = arith.constant 0 : index
    %31 = vector.load %arg3[%c5, %c0_29, %c0_30] : memref<9x128x16xbf16, #tpu.memory_space<vmem>>, vector<1x128x16xbf16>
    %32 = vector.shape_cast %31 : vector<1x128x16xbf16> to vector<128x16xbf16>
    %cst_31 = arith.constant dense<0.000000e+00> : vector<80x16xf32>
    %33 = tpu.matmul %30, %32, %cst_31 {dimension_numbers = #tpu.dot_dimension_numbers<[1], [0], [0], [1], [0, 0, 1, 1], [], []>} : vector<80x128xbf16>, vector<128x16xbf16>, vector<80x16xf32> -> vector<80x16xf32>
    %34 = arith.addf %28, %33 : vector<80x16xf32>
    %c0_32 = arith.constant 0 : index
    %c20 = arith.constant 20 : index
    %c0_33 = arith.constant 0 : index
    %35 = vector.load %arg2[%c0_32, %c20, %c0_33] : memref<1x110x128xbf16, #tpu.memory_space<vmem>>, vector<1x80x128xbf16>
    %36 = vector.shape_cast %35 : vector<1x80x128xbf16> to vector<80x128xbf16>
    %c6 = arith.constant 6 : index
    %c0_34 = arith.constant 0 : index
    %c0_35 = arith.constant 0 : index
    %37 = vector.load %arg3[%c6, %c0_34, %c0_35] : memref<9x128x16xbf16, #tpu.memory_space<vmem>>, vector<1x128x16xbf16>
    %38 = vector.shape_cast %37 : vector<1x128x16xbf16> to vector<128x16xbf16>
    %cst_36 = arith.constant dense<0.000000e+00> : vector<80x16xf32>
    %39 = tpu.matmul %36, %38, %cst_36 {dimension_numbers = #tpu.dot_dimension_numbers<[1], [0], [0], [1], [0, 0, 1, 1], [], []>} : vector<80x128xbf16>, vector<128x16xbf16>, vector<80x16xf32> -> vector<80x16xf32>
    %40 = arith.addf %34, %39 : vector<80x16xf32>
    %c0_37 = arith.constant 0 : index
    %c21 = arith.constant 21 : index
    %c0_38 = arith.constant 0 : index
    %41 = vector.load %arg2[%c0_37, %c21, %c0_38] : memref<1x110x128xbf16, #tpu.memory_space<vmem>>, vector<1x80x128xbf16>
    %42 = vector.shape_cast %41 : vector<1x80x128xbf16> to vector<80x128xbf16>
    %c7 = arith.constant 7 : index
    %c0_39 = arith.constant 0 : index
    %c0_40 = arith.constant 0 : index
    %43 = vector.load %arg3[%c7, %c0_39, %c0_40] : memref<9x128x16xbf16, #tpu.memory_space<vmem>>, vector<1x128x16xbf16>
    %44 = vector.shape_cast %43 : vector<1x128x16xbf16> to vector<128x16xbf16>
    %cst_41 = arith.constant dense<0.000000e+00> : vector<80x16xf32>
    %45 = tpu.matmul %42, %44, %cst_41 {dimension_numbers = #tpu.dot_dimension_numbers<[1], [0], [0], [1], [0, 0, 1, 1], [], []>} : vector<80x128xbf16>, vector<128x16xbf16>, vector<80x16xf32> -> vector<80x16xf32>
    %46 = arith.addf %40, %45 : vector<80x16xf32>
    %c0_42 = arith.constant 0 : index
    %c22 = arith.constant 22 : index
    %c0_43 = arith.constant 0 : index
    %47 = vector.load %arg2[%c0_42, %c22, %c0_43] : memref<1x110x128xbf16, #tpu.memory_space<vmem>>, vector<1x80x128xbf16>
    %48 = vector.shape_cast %47 : vector<1x80x128xbf16> to vector<80x128xbf16>
    %c8 = arith.constant 8 : index
    %c0_44 = arith.constant 0 : index
    %c0_45 = arith.constant 0 : index
    %49 = vector.load %arg3[%c8, %c0_44, %c0_45] : memref<9x128x16xbf16, #tpu.memory_space<vmem>>, vector<1x128x16xbf16>
    %50 = vector.shape_cast %49 : vector<1x128x16xbf16> to vector<128x16xbf16>
    %cst_46 = arith.constant dense<0.000000e+00> : vector<80x16xf32>
    %51 = tpu.matmul %48, %50, %cst_46 {dimension_numbers = #tpu.dot_dimension_numbers<[1], [0], [0], [1], [0, 0, 1, 1], [], []>} : vector<80x128xbf16>, vector<128x16xbf16>, vector<80x16xf32> -> vector<80x16xf32>
    %52 = arith.addf %46, %51 : vector<80x16xf32>
    %c0_47 = arith.constant 0 : index
    %c0_48 = arith.constant 0 : index
    %c0_49 = arith.constant 0 : index
    %53 = vector.load %arg4[%c0_47, %c0_48, %c0_49] : memref<1x80x16xf32, #tpu.memory_space<vmem>>, vector<1x80x16xf32>
    %54 = vector.shape_cast %53 : vector<1x80x16xf32> to vector<80x16xf32>
    %55 = vector.shape_cast %52 : vector<80x16xf32> to vector<1x80x16xf32>
    tpu.vector_store %arg4[%c0_47, %c0_48, %c0_49], %55 {strides = array<i32>} : memref<1x80x16xf32, #tpu.memory_space<vmem>>, vector<1x80x16xf32>,
    return
  }
  func.func @transform_0(%arg0: i32, %arg1: i32) -> (i32, i32, i32) {
    %c0_i32 = arith.constant 0 : i32
    %c0_i32_0 = arith.constant 0 : i32
    %c0_i32_1 = arith.constant 0 : i32
    return %arg1, %c0_i32, %c0_i32_0 : i32, i32, i32
  }
  func.func @transform_1(%arg0: i32, %arg1: i32) -> (i32, i32, i32) {
    %c0_i32 = arith.constant 0 : i32
    %c0_i32_0 = arith.constant 0 : i32
    %c0_i32_1 = arith.constant 0 : i32
    return %c0_i32, %c0_i32_0, %arg0 : i32, i32, i32
  }
  func.func @transform_2(%arg0: i32, %arg1: i32) -> (i32, i32, i32) {
    %c0_i32 = arith.constant 0 : i32
    %c0_i32_0 = arith.constant 0 : i32
    return %arg1, %c0_i32, %arg0 : i32, i32, i32
  }
}

module attributes {stable_mosaic.version = 11 : i64} {
  func.func @_matmul_1pass_kernel(%arg0: i32, %arg1: i32, %arg2: memref<256x128xbf16, #tpu.memory_space<vmem>>, %arg3: memref<128x128xbf16, #tpu.memory_space<vmem>>, %arg4: memref<256x128xf32, #tpu.memory_space<vmem>>) attributes {dimension_semantics = [#tpu.dimension_semantics<parallel>, #tpu.dimension_semantics<parallel>], iteration_bounds = array<i64: 2, 1>, scalar_prefetch = 0 : i64, scratch_operands = 0 : i64, tpu.core_type = #tpu.core_type<tc>, window_params = [{transform_indices = @transform_0, window_bounds = array<i64: 256, 128>}, {transform_indices = @transform_1, window_bounds = array<i64: 128, 128>}, {transform_indices = @transform_2, window_bounds = array<i64: 256, 128>}]} {
    %c0 = arith.constant 0 : index
    %c0_0 = arith.constant 0 : index
    %0 = vector.load %arg2[%c0, %c0_0] : memref<256x128xbf16, #tpu.memory_space<vmem>>, vector<256x128xbf16>
    %c0_1 = arith.constant 0 : index
    %c0_2 = arith.constant 0 : index
    %1 = vector.load %arg3[%c0_1, %c0_2] : memref<128x128xbf16, #tpu.memory_space<vmem>>, vector<128x128xbf16>
    %cst = arith.constant dense<0.000000e+00> : vector<256x128xf32>
    %2 = tpu.matmul %0, %1, %cst {dimension_numbers = #tpu.dot_dimension_numbers<[1], [0], [0], [1], [0, 0, 1, 1], [], []>} : vector<256x128xbf16>, vector<128x128xbf16>, vector<256x128xf32> -> vector<256x128xf32>
    %c0_3 = arith.constant 0 : index
    %c0_4 = arith.constant 0 : index
    %3 = vector.load %arg4[%c0_3, %c0_4] : memref<256x128xf32, #tpu.memory_space<vmem>>, vector<256x128xf32>
    tpu.vector_store %arg4[%c0_3, %c0_4], %2 {strides = array<i32>} : memref<256x128xf32, #tpu.memory_space<vmem>>, vector<256x128xf32>,
    return
  }
  func.func @transform_0(%arg0: i32, %arg1: i32) -> (i32, i32) {
    %c0_i32 = arith.constant 0 : i32
    %c0_i32_0 = arith.constant 0 : i32
    return %arg0, %c0_i32 : i32, i32
  }
  func.func @transform_1(%arg0: i32, %arg1: i32) -> (i32, i32) {
    %c0_i32 = arith.constant 0 : i32
    %c0_i32_0 = arith.constant 0 : i32
    return %c0_i32, %arg1 : i32, i32
  }
  func.func @transform_2(%arg0: i32, %arg1: i32) -> (i32, i32) {
    %c0_i32 = arith.constant 0 : i32
    return %arg0, %arg1 : i32, i32
  }
}

module attributes {stable_mosaic.version = 11 : i64} {
  func.func @_matmul_1pass_kernel(%arg0: i32, %arg1: i32, %arg2: memref<64x128xbf16, #tpu.memory_space<vmem>>, %arg3: memref<128x128xbf16, #tpu.memory_space<vmem>>, %arg4: memref<64x128xf32, #tpu.memory_space<vmem>>) attributes {dimension_semantics = [#tpu.dimension_semantics<parallel>, #tpu.dimension_semantics<parallel>], iteration_bounds = array<i64: 2, 1>, scalar_prefetch = 0 : i64, scratch_operands = 0 : i64, tpu.core_type = #tpu.core_type<tc>, window_params = [{transform_indices = @transform_0, window_bounds = array<i64: 64, 128>}, {transform_indices = @transform_1, window_bounds = array<i64: 128, 128>}, {transform_indices = @transform_2, window_bounds = array<i64: 64, 128>}]} {
    %c0 = arith.constant 0 : index
    %c0_0 = arith.constant 0 : index
    %0 = vector.load %arg2[%c0, %c0_0] : memref<64x128xbf16, #tpu.memory_space<vmem>>, vector<64x128xbf16>
    %c0_1 = arith.constant 0 : index
    %c0_2 = arith.constant 0 : index
    %1 = vector.load %arg3[%c0_1, %c0_2] : memref<128x128xbf16, #tpu.memory_space<vmem>>, vector<128x128xbf16>
    %cst = arith.constant dense<0.000000e+00> : vector<64x128xf32>
    %2 = tpu.matmul %0, %1, %cst {dimension_numbers = #tpu.dot_dimension_numbers<[1], [0], [0], [1], [0, 0, 1, 1], [], []>} : vector<64x128xbf16>, vector<128x128xbf16>, vector<64x128xf32> -> vector<64x128xf32>
    %c0_3 = arith.constant 0 : index
    %c0_4 = arith.constant 0 : index
    %3 = vector.load %arg4[%c0_3, %c0_4] : memref<64x128xf32, #tpu.memory_space<vmem>>, vector<64x128xf32>
    tpu.vector_store %arg4[%c0_3, %c0_4], %2 {strides = array<i32>} : memref<64x128xf32, #tpu.memory_space<vmem>>, vector<64x128xf32>,
    return
  }
  func.func @transform_0(%arg0: i32, %arg1: i32) -> (i32, i32) {
    %c0_i32 = arith.constant 0 : i32
    %c0_i32_0 = arith.constant 0 : i32
    return %arg0, %c0_i32 : i32, i32
  }
  func.func @transform_1(%arg0: i32, %arg1: i32) -> (i32, i32) {
    %c0_i32 = arith.constant 0 : i32
    %c0_i32_0 = arith.constant 0 : i32
    return %c0_i32, %arg1 : i32, i32
  }
  func.func @transform_2(%arg0: i32, %arg1: i32) -> (i32, i32) {
    %c0_i32 = arith.constant 0 : i32
    return %arg0, %arg1 : i32, i32
  }
}

module attributes {stable_mosaic.version = 11 : i64} {
  func.func @_stats_kernel(%arg0: i32, %arg1: memref<16x128xf32, #tpu.memory_space<vmem>>, %arg2: memref<1x2x128xf32, #tpu.memory_space<vmem>>) attributes {dimension_semantics = [#tpu.dimension_semantics<parallel>], iteration_bounds = array<i64: 2>, scalar_prefetch = 0 : i64, scratch_operands = 0 : i64, tpu.core_type = #tpu.core_type<tc>, window_params = [{transform_indices = @transform_0, window_bounds = array<i64: 16, 128>}, {transform_indices = @transform_1, window_bounds = array<i64: 1, 2, 128>}]} {
    %c0 = arith.constant 0 : index
    %c0_0 = arith.constant 0 : index
    %0 = vector.load %arg1[%c0, %c0_0] : memref<16x128xf32, #tpu.memory_space<vmem>>, vector<16x128xf32>
    %cst = arith.constant dense<0.000000e+00> : vector<128xf32>
    %1 = vector.multi_reduction <add>, %0, %cst [0] : vector<16x128xf32> to vector<128xf32>
    %2 = vector.shape_cast %1 : vector<128xf32> to vector<1x128xf32>
    %c0_1 = arith.constant 0 : index
    %c0_2 = arith.constant 0 : index
    %c0_3 = arith.constant 0 : index
    %3 = vector.load %arg2[%c0_1, %c0_2, %c0_3] : memref<1x2x128xf32, #tpu.memory_space<vmem>>, vector<1x1x128xf32>
    %4 = vector.shape_cast %3 : vector<1x1x128xf32> to vector<1x128xf32>
    %5 = vector.shape_cast %2 : vector<1x128xf32> to vector<1x1x128xf32>
    tpu.vector_store %arg2[%c0_1, %c0_2, %c0_3], %5 {strides = array<i32>} : memref<1x2x128xf32, #tpu.memory_space<vmem>>, vector<1x1x128xf32>,
    %6 = arith.mulf %0, %0 : vector<16x128xf32>
    %cst_4 = arith.constant dense<0.000000e+00> : vector<128xf32>
    %7 = vector.multi_reduction <add>, %6, %cst_4 [0] : vector<16x128xf32> to vector<128xf32>
    %8 = vector.shape_cast %7 : vector<128xf32> to vector<1x128xf32>
    %c0_5 = arith.constant 0 : index
    %c1 = arith.constant 1 : index
    %c0_6 = arith.constant 0 : index
    %9 = vector.load %arg2[%c0_5, %c1, %c0_6] : memref<1x2x128xf32, #tpu.memory_space<vmem>>, vector<1x1x128xf32>
    %10 = vector.shape_cast %9 : vector<1x1x128xf32> to vector<1x128xf32>
    %11 = vector.shape_cast %8 : vector<1x128xf32> to vector<1x1x128xf32>
    tpu.vector_store %arg2[%c0_5, %c1, %c0_6], %11 {strides = array<i32>} : memref<1x2x128xf32, #tpu.memory_space<vmem>>, vector<1x1x128xf32>,
    return
  }
  func.func @transform_0(%arg0: i32) -> (i32, i32) {
    %c0_i32 = arith.constant 0 : i32
    %c0_i32_0 = arith.constant 0 : i32
    return %arg0, %c0_i32 : i32, i32
  }
  func.func @transform_1(%arg0: i32) -> (i32, i32, i32) {
    %c0_i32 = arith.constant 0 : i32
    %c0_i32_0 = arith.constant 0 : i32
    %c0_i32_1 = arith.constant 0 : i32
    return %arg0, %c0_i32, %c0_i32_0 : i32, i32, i32
  }
}

module attributes {stable_mosaic.version = 11 : i64} {
  func.func @_affine_kernel(%arg0: i32, %arg1: memref<16x128xf32, #tpu.memory_space<vmem>>, %arg2: memref<1x128xf32, #tpu.memory_space<vmem>>, %arg3: memref<1x128xf32, #tpu.memory_space<vmem>>, %arg4: memref<16x128xf32, #tpu.memory_space<vmem>>) attributes {dimension_semantics = [#tpu.dimension_semantics<parallel>], iteration_bounds = array<i64: 2>, scalar_prefetch = 0 : i64, scratch_operands = 0 : i64, tpu.core_type = #tpu.core_type<tc>, window_params = [{transform_indices = @transform_0, window_bounds = array<i64: 16, 128>}, {pipeline_mode = #tpu.pipeline_mode<synchronous>, transform_indices = @transform_1, window_bounds = array<i64: 1, 128>}, {pipeline_mode = #tpu.pipeline_mode<synchronous>, transform_indices = @transform_2, window_bounds = array<i64: 1, 128>}, {transform_indices = @transform_3, window_bounds = array<i64: 16, 128>}]} {
    %c0 = arith.constant 0 : index
    %c0_0 = arith.constant 0 : index
    %0 = vector.load %arg1[%c0, %c0_0] : memref<16x128xf32, #tpu.memory_space<vmem>>, vector<16x128xf32>
    %c0_1 = arith.constant 0 : index
    %c0_2 = arith.constant 0 : index
    %1 = vector.load %arg2[%c0_1, %c0_2] : memref<1x128xf32, #tpu.memory_space<vmem>>, vector<1x128xf32>
    %2 = vector.broadcast %1 : vector<1x128xf32> to vector<16x128xf32>
    %3 = arith.mulf %0, %2 : vector<16x128xf32>
    %c0_3 = arith.constant 0 : index
    %c0_4 = arith.constant 0 : index
    %4 = vector.load %arg3[%c0_3, %c0_4] : memref<1x128xf32, #tpu.memory_space<vmem>>, vector<1x128xf32>
    %5 = vector.broadcast %4 : vector<1x128xf32> to vector<16x128xf32>
    %6 = arith.addf %3, %5 : vector<16x128xf32>
    %cst = arith.constant 0.000000e+00 : f32
    %7 = vector.broadcast %cst : f32 to vector<16x128xf32>
    %8 = arith.maximumf %6, %7 : vector<16x128xf32>
    %c0_5 = arith.constant 0 : index
    %c0_6 = arith.constant 0 : index
    %9 = vector.load %arg4[%c0_5, %c0_6] : memref<16x128xf32, #tpu.memory_space<vmem>>, vector<16x128xf32>
    tpu.vector_store %arg4[%c0_5, %c0_6], %8 {strides = array<i32>} : memref<16x128xf32, #tpu.memory_space<vmem>>, vector<16x128xf32>,
    return
  }
  func.func @transform_0(%arg0: i32) -> (i32, i32) {
    %c0_i32 = arith.constant 0 : i32
    %c0_i32_0 = arith.constant 0 : i32
    return %arg0, %c0_i32 : i32, i32
  }
  func.func @transform_1(%arg0: i32) -> (i32, i32) {
    %c0_i32 = arith.constant 0 : i32
    %c0_i32_0 = arith.constant 0 : i32
    %c0_i32_1 = arith.constant 0 : i32
    return %c0_i32, %c0_i32_0 : i32, i32
  }
  func.func @transform_2(%arg0: i32) -> (i32, i32) {
    %c0_i32 = arith.constant 0 : i32
    %c0_i32_0 = arith.constant 0 : i32
    %c0_i32_1 = arith.constant 0 : i32
    return %c0_i32, %c0_i32_0 : i32, i32
  }
  func.func @transform_3(%arg0: i32) -> (i32, i32) {
    %c0_i32 = arith.constant 0 : i32
    %c0_i32_0 = arith.constant 0 : i32
    return %arg0, %c0_i32 : i32, i32
  }
}

module attributes {stable_mosaic.version = 11 : i64} {
  func.func @_matmul_1pass_kernel(%arg0: i32, %arg1: i32, %arg2: memref<512x128xbf16, #tpu.memory_space<vmem>>, %arg3: memref<128x128xbf16, #tpu.memory_space<vmem>>, %arg4: memref<512x128xf32, #tpu.memory_space<vmem>>) attributes {dimension_semantics = [#tpu.dimension_semantics<parallel>, #tpu.dimension_semantics<parallel>], iteration_bounds = array<i64: 4, 1>, scalar_prefetch = 0 : i64, scratch_operands = 0 : i64, tpu.core_type = #tpu.core_type<tc>, window_params = [{transform_indices = @transform_0, window_bounds = array<i64: 512, 128>}, {transform_indices = @transform_1, window_bounds = array<i64: 128, 128>}, {transform_indices = @transform_2, window_bounds = array<i64: 512, 128>}]} {
    %c0 = arith.constant 0 : index
    %c0_0 = arith.constant 0 : index
    %0 = vector.load %arg2[%c0, %c0_0] : memref<512x128xbf16, #tpu.memory_space<vmem>>, vector<512x128xbf16>
    %c0_1 = arith.constant 0 : index
    %c0_2 = arith.constant 0 : index
    %1 = vector.load %arg3[%c0_1, %c0_2] : memref<128x128xbf16, #tpu.memory_space<vmem>>, vector<128x128xbf16>
    %cst = arith.constant dense<0.000000e+00> : vector<512x128xf32>
    %2 = tpu.matmul %0, %1, %cst {dimension_numbers = #tpu.dot_dimension_numbers<[1], [0], [0], [1], [0, 0, 1, 1], [], []>} : vector<512x128xbf16>, vector<128x128xbf16>, vector<512x128xf32> -> vector<512x128xf32>
    %c0_3 = arith.constant 0 : index
    %c0_4 = arith.constant 0 : index
    %3 = vector.load %arg4[%c0_3, %c0_4] : memref<512x128xf32, #tpu.memory_space<vmem>>, vector<512x128xf32>
    tpu.vector_store %arg4[%c0_3, %c0_4], %2 {strides = array<i32>} : memref<512x128xf32, #tpu.memory_space<vmem>>, vector<512x128xf32>,
    return
  }
  func.func @transform_0(%arg0: i32, %arg1: i32) -> (i32, i32) {
    %c0_i32 = arith.constant 0 : i32
    %c0_i32_0 = arith.constant 0 : i32
    return %arg0, %c0_i32 : i32, i32
  }
  func.func @transform_1(%arg0: i32, %arg1: i32) -> (i32, i32) {
    %c0_i32 = arith.constant 0 : i32
    %c0_i32_0 = arith.constant 0 : i32
    return %c0_i32, %arg1 : i32, i32
  }
  func.func @transform_2(%arg0: i32, %arg1: i32) -> (i32, i32) {
    %c0_i32 = arith.constant 0 : i32
    return %arg0, %arg1 : i32, i32
  }
}

module attributes {stable_mosaic.version = 11 : i64} {
  func.func @_stats_kernel(%arg0: i32, %arg1: memref<8x128xf32, #tpu.memory_space<vmem>>, %arg2: memref<1x2x128xf32, #tpu.memory_space<vmem>>) attributes {dimension_semantics = [#tpu.dimension_semantics<parallel>], iteration_bounds = array<i64: 1>, scalar_prefetch = 0 : i64, scratch_operands = 0 : i64, tpu.core_type = #tpu.core_type<tc>, window_params = [{transform_indices = @transform_0, window_bounds = array<i64: 8, 128>}, {transform_indices = @transform_1, window_bounds = array<i64: 1, 2, 128>}]} {
    %c0 = arith.constant 0 : index
    %c0_0 = arith.constant 0 : index
    %0 = vector.load %arg1[%c0, %c0_0] : memref<8x128xf32, #tpu.memory_space<vmem>>, vector<8x128xf32>
    %cst = arith.constant dense<0.000000e+00> : vector<128xf32>
    %1 = vector.multi_reduction <add>, %0, %cst [0] : vector<8x128xf32> to vector<128xf32>
    %2 = vector.shape_cast %1 : vector<128xf32> to vector<1x128xf32>
    %c0_1 = arith.constant 0 : index
    %c0_2 = arith.constant 0 : index
    %c0_3 = arith.constant 0 : index
    %3 = vector.load %arg2[%c0_1, %c0_2, %c0_3] : memref<1x2x128xf32, #tpu.memory_space<vmem>>, vector<1x1x128xf32>
    %4 = vector.shape_cast %3 : vector<1x1x128xf32> to vector<1x128xf32>
    %5 = vector.shape_cast %2 : vector<1x128xf32> to vector<1x1x128xf32>
    tpu.vector_store %arg2[%c0_1, %c0_2, %c0_3], %5 {strides = array<i32>} : memref<1x2x128xf32, #tpu.memory_space<vmem>>, vector<1x1x128xf32>,
    %6 = arith.mulf %0, %0 : vector<8x128xf32>
    %cst_4 = arith.constant dense<0.000000e+00> : vector<128xf32>
    %7 = vector.multi_reduction <add>, %6, %cst_4 [0] : vector<8x128xf32> to vector<128xf32>
    %8 = vector.shape_cast %7 : vector<128xf32> to vector<1x128xf32>
    %c0_5 = arith.constant 0 : index
    %c1 = arith.constant 1 : index
    %c0_6 = arith.constant 0 : index
    %9 = vector.load %arg2[%c0_5, %c1, %c0_6] : memref<1x2x128xf32, #tpu.memory_space<vmem>>, vector<1x1x128xf32>
    %10 = vector.shape_cast %9 : vector<1x1x128xf32> to vector<1x128xf32>
    %11 = vector.shape_cast %8 : vector<1x128xf32> to vector<1x1x128xf32>
    tpu.vector_store %arg2[%c0_5, %c1, %c0_6], %11 {strides = array<i32>} : memref<1x2x128xf32, #tpu.memory_space<vmem>>, vector<1x1x128xf32>,
    return
  }
  func.func @transform_0(%arg0: i32) -> (i32, i32) {
    %c0_i32 = arith.constant 0 : i32
    %c0_i32_0 = arith.constant 0 : i32
    return %arg0, %c0_i32 : i32, i32
  }
  func.func @transform_1(%arg0: i32) -> (i32, i32, i32) {
    %c0_i32 = arith.constant 0 : i32
    %c0_i32_0 = arith.constant 0 : i32
    %c0_i32_1 = arith.constant 0 : i32
    return %arg0, %c0_i32, %c0_i32_0 : i32, i32, i32
  }
}

module attributes {stable_mosaic.version = 11 : i64} {
  func.func @_affine_kernel(%arg0: i32, %arg1: memref<8x128xf32, #tpu.memory_space<vmem>>, %arg2: memref<1x128xf32, #tpu.memory_space<vmem>>, %arg3: memref<1x128xf32, #tpu.memory_space<vmem>>, %arg4: memref<8x128xf32, #tpu.memory_space<vmem>>) attributes {dimension_semantics = [#tpu.dimension_semantics<parallel>], iteration_bounds = array<i64: 1>, scalar_prefetch = 0 : i64, scratch_operands = 0 : i64, tpu.core_type = #tpu.core_type<tc>, window_params = [{transform_indices = @transform_0, window_bounds = array<i64: 8, 128>}, {pipeline_mode = #tpu.pipeline_mode<synchronous>, transform_indices = @transform_1, window_bounds = array<i64: 1, 128>}, {pipeline_mode = #tpu.pipeline_mode<synchronous>, transform_indices = @transform_2, window_bounds = array<i64: 1, 128>}, {transform_indices = @transform_3, window_bounds = array<i64: 8, 128>}]} {
    %c0 = arith.constant 0 : index
    %c0_0 = arith.constant 0 : index
    %0 = vector.load %arg1[%c0, %c0_0] : memref<8x128xf32, #tpu.memory_space<vmem>>, vector<8x128xf32>
    %c0_1 = arith.constant 0 : index
    %c0_2 = arith.constant 0 : index
    %1 = vector.load %arg2[%c0_1, %c0_2] : memref<1x128xf32, #tpu.memory_space<vmem>>, vector<1x128xf32>
    %2 = vector.broadcast %1 : vector<1x128xf32> to vector<8x128xf32>
    %3 = arith.mulf %0, %2 : vector<8x128xf32>
    %c0_3 = arith.constant 0 : index
    %c0_4 = arith.constant 0 : index
    %4 = vector.load %arg3[%c0_3, %c0_4] : memref<1x128xf32, #tpu.memory_space<vmem>>, vector<1x128xf32>
    %5 = vector.broadcast %4 : vector<1x128xf32> to vector<8x128xf32>
    %6 = arith.addf %3, %5 : vector<8x128xf32>
    %cst = arith.constant 0.000000e+00 : f32
    %7 = vector.broadcast %cst : f32 to vector<8x128xf32>
    %8 = arith.maximumf %6, %7 : vector<8x128xf32>
    %c0_5 = arith.constant 0 : index
    %c0_6 = arith.constant 0 : index
    %9 = vector.load %arg4[%c0_5, %c0_6] : memref<8x128xf32, #tpu.memory_space<vmem>>, vector<8x128xf32>
    tpu.vector_store %arg4[%c0_5, %c0_6], %8 {strides = array<i32>} : memref<8x128xf32, #tpu.memory_space<vmem>>, vector<8x128xf32>,
    return
  }
  func.func @transform_0(%arg0: i32) -> (i32, i32) {
    %c0_i32 = arith.constant 0 : i32
    %c0_i32_0 = arith.constant 0 : i32
    return %arg0, %c0_i32 : i32, i32
  }
  func.func @transform_1(%arg0: i32) -> (i32, i32) {
    %c0_i32 = arith.constant 0 : i32
    %c0_i32_0 = arith.constant 0 : i32
    %c0_i32_1 = arith.constant 0 : i32
    return %c0_i32, %c0_i32_0 : i32, i32
  }
  func.func @transform_2(%arg0: i32) -> (i32, i32) {
    %c0_i32 = arith.constant 0 : i32
    %c0_i32_0 = arith.constant 0 : i32
    %c0_i32_1 = arith.constant 0 : i32
    return %c0_i32, %c0_i32_0 : i32, i32
  }
  func.func @transform_3(%arg0: i32) -> (i32, i32) {
    %c0_i32 = arith.constant 0 : i32
    %c0_i32_0 = arith.constant 0 : i32
    return %arg0, %c0_i32 : i32, i32
  }
}

module attributes {stable_mosaic.version = 11 : i64} {
  func.func @_stats_kernel(%arg0: i32, %arg1: memref<128x128xf32, #tpu.memory_space<vmem>>, %arg2: memref<1x2x128xf32, #tpu.memory_space<vmem>>) attributes {dimension_semantics = [#tpu.dimension_semantics<parallel>], iteration_bounds = array<i64: 2>, scalar_prefetch = 0 : i64, scratch_operands = 0 : i64, tpu.core_type = #tpu.core_type<tc>, window_params = [{transform_indices = @transform_0, window_bounds = array<i64: 128, 128>}, {transform_indices = @transform_1, window_bounds = array<i64: 1, 2, 128>}]} {
    %c0 = arith.constant 0 : index
    %c0_0 = arith.constant 0 : index
    %0 = vector.load %arg1[%c0, %c0_0] : memref<128x128xf32, #tpu.memory_space<vmem>>, vector<128x128xf32>
    %cst = arith.constant dense<0.000000e+00> : vector<128xf32>
    %1 = vector.multi_reduction <add>, %0, %cst [0] : vector<128x128xf32> to vector<128xf32>
    %2 = vector.shape_cast %1 : vector<128xf32> to vector<1x128xf32>
    %c0_1 = arith.constant 0 : index
    %c0_2 = arith.constant 0 : index
    %c0_3 = arith.constant 0 : index
    %3 = vector.load %arg2[%c0_1, %c0_2, %c0_3] : memref<1x2x128xf32, #tpu.memory_space<vmem>>, vector<1x1x128xf32>
    %4 = vector.shape_cast %3 : vector<1x1x128xf32> to vector<1x128xf32>
    %5 = vector.shape_cast %2 : vector<1x128xf32> to vector<1x1x128xf32>
    tpu.vector_store %arg2[%c0_1, %c0_2, %c0_3], %5 {strides = array<i32>} : memref<1x2x128xf32, #tpu.memory_space<vmem>>, vector<1x1x128xf32>,
    %6 = arith.mulf %0, %0 : vector<128x128xf32>
    %cst_4 = arith.constant dense<0.000000e+00> : vector<128xf32>
    %7 = vector.multi_reduction <add>, %6, %cst_4 [0] : vector<128x128xf32> to vector<128xf32>
    %8 = vector.shape_cast %7 : vector<128xf32> to vector<1x128xf32>
    %c0_5 = arith.constant 0 : index
    %c1 = arith.constant 1 : index
    %c0_6 = arith.constant 0 : index
    %9 = vector.load %arg2[%c0_5, %c1, %c0_6] : memref<1x2x128xf32, #tpu.memory_space<vmem>>, vector<1x1x128xf32>
    %10 = vector.shape_cast %9 : vector<1x1x128xf32> to vector<1x128xf32>
    %11 = vector.shape_cast %8 : vector<1x128xf32> to vector<1x1x128xf32>
    tpu.vector_store %arg2[%c0_5, %c1, %c0_6], %11 {strides = array<i32>} : memref<1x2x128xf32, #tpu.memory_space<vmem>>, vector<1x1x128xf32>,
    return
  }
  func.func @transform_0(%arg0: i32) -> (i32, i32) {
    %c0_i32 = arith.constant 0 : i32
    %c0_i32_0 = arith.constant 0 : i32
    return %arg0, %c0_i32 : i32, i32
  }
  func.func @transform_1(%arg0: i32) -> (i32, i32, i32) {
    %c0_i32 = arith.constant 0 : i32
    %c0_i32_0 = arith.constant 0 : i32
    %c0_i32_1 = arith.constant 0 : i32
    return %arg0, %c0_i32, %c0_i32_0 : i32, i32, i32
  }
}

module attributes {stable_mosaic.version = 11 : i64} {
  func.func @_affine_kernel(%arg0: i32, %arg1: memref<128x128xf32, #tpu.memory_space<vmem>>, %arg2: memref<1x128xf32, #tpu.memory_space<vmem>>, %arg3: memref<1x128xf32, #tpu.memory_space<vmem>>, %arg4: memref<128x128xf32, #tpu.memory_space<vmem>>) attributes {dimension_semantics = [#tpu.dimension_semantics<parallel>], iteration_bounds = array<i64: 2>, scalar_prefetch = 0 : i64, scratch_operands = 0 : i64, tpu.core_type = #tpu.core_type<tc>, window_params = [{transform_indices = @transform_0, window_bounds = array<i64: 128, 128>}, {pipeline_mode = #tpu.pipeline_mode<synchronous>, transform_indices = @transform_1, window_bounds = array<i64: 1, 128>}, {pipeline_mode = #tpu.pipeline_mode<synchronous>, transform_indices = @transform_2, window_bounds = array<i64: 1, 128>}, {transform_indices = @transform_3, window_bounds = array<i64: 128, 128>}]} {
    %c0 = arith.constant 0 : index
    %c0_0 = arith.constant 0 : index
    %0 = vector.load %arg1[%c0, %c0_0] : memref<128x128xf32, #tpu.memory_space<vmem>>, vector<128x128xf32>
    %c0_1 = arith.constant 0 : index
    %c0_2 = arith.constant 0 : index
    %1 = vector.load %arg2[%c0_1, %c0_2] : memref<1x128xf32, #tpu.memory_space<vmem>>, vector<1x128xf32>
    %2 = vector.broadcast %1 : vector<1x128xf32> to vector<128x128xf32>
    %3 = arith.mulf %0, %2 : vector<128x128xf32>
    %c0_3 = arith.constant 0 : index
    %c0_4 = arith.constant 0 : index
    %4 = vector.load %arg3[%c0_3, %c0_4] : memref<1x128xf32, #tpu.memory_space<vmem>>, vector<1x128xf32>
    %5 = vector.broadcast %4 : vector<1x128xf32> to vector<128x128xf32>
    %6 = arith.addf %3, %5 : vector<128x128xf32>
    %cst = arith.constant 0.000000e+00 : f32
    %7 = vector.broadcast %cst : f32 to vector<128x128xf32>
    %8 = arith.maximumf %6, %7 : vector<128x128xf32>
    %c0_5 = arith.constant 0 : index
    %c0_6 = arith.constant 0 : index
    %9 = vector.load %arg4[%c0_5, %c0_6] : memref<128x128xf32, #tpu.memory_space<vmem>>, vector<128x128xf32>
    tpu.vector_store %arg4[%c0_5, %c0_6], %8 {strides = array<i32>} : memref<128x128xf32, #tpu.memory_space<vmem>>, vector<128x128xf32>,
    return
  }
  func.func @transform_0(%arg0: i32) -> (i32, i32) {
    %c0_i32 = arith.constant 0 : i32
    %c0_i32_0 = arith.constant 0 : i32
    return %arg0, %c0_i32 : i32, i32
  }
  func.func @transform_1(%arg0: i32) -> (i32, i32) {
    %c0_i32 = arith.constant 0 : i32
    %c0_i32_0 = arith.constant 0 : i32
    %c0_i32_1 = arith.constant 0 : i32
    return %c0_i32, %c0_i32_0 : i32, i32
  }
  func.func @transform_2(%arg0: i32) -> (i32, i32) {
    %c0_i32 = arith.constant 0 : i32
    %c0_i32_0 = arith.constant 0 : i32
    %c0_i32_1 = arith.constant 0 : i32
    return %c0_i32, %c0_i32_0 : i32, i32
  }
  func.func @transform_3(%arg0: i32) -> (i32, i32) {
    %c0_i32 = arith.constant 0 : i32
    %c0_i32_0 = arith.constant 0 : i32
    return %arg0, %c0_i32 : i32, i32
  }
}

module attributes {stable_mosaic.version = 11 : i64} {
  func.func @_stats_kernel(%arg0: i32, %arg1: memref<32x128xf32, #tpu.memory_space<vmem>>, %arg2: memref<1x2x128xf32, #tpu.memory_space<vmem>>) attributes {dimension_semantics = [#tpu.dimension_semantics<parallel>], iteration_bounds = array<i64: 2>, scalar_prefetch = 0 : i64, scratch_operands = 0 : i64, tpu.core_type = #tpu.core_type<tc>, window_params = [{transform_indices = @transform_0, window_bounds = array<i64: 32, 128>}, {transform_indices = @transform_1, window_bounds = array<i64: 1, 2, 128>}]} {
    %c0 = arith.constant 0 : index
    %c0_0 = arith.constant 0 : index
    %0 = vector.load %arg1[%c0, %c0_0] : memref<32x128xf32, #tpu.memory_space<vmem>>, vector<32x128xf32>
    %cst = arith.constant dense<0.000000e+00> : vector<128xf32>
    %1 = vector.multi_reduction <add>, %0, %cst [0] : vector<32x128xf32> to vector<128xf32>
    %2 = vector.shape_cast %1 : vector<128xf32> to vector<1x128xf32>
    %c0_1 = arith.constant 0 : index
    %c0_2 = arith.constant 0 : index
    %c0_3 = arith.constant 0 : index
    %3 = vector.load %arg2[%c0_1, %c0_2, %c0_3] : memref<1x2x128xf32, #tpu.memory_space<vmem>>, vector<1x1x128xf32>
    %4 = vector.shape_cast %3 : vector<1x1x128xf32> to vector<1x128xf32>
    %5 = vector.shape_cast %2 : vector<1x128xf32> to vector<1x1x128xf32>
    tpu.vector_store %arg2[%c0_1, %c0_2, %c0_3], %5 {strides = array<i32>} : memref<1x2x128xf32, #tpu.memory_space<vmem>>, vector<1x1x128xf32>,
    %6 = arith.mulf %0, %0 : vector<32x128xf32>
    %cst_4 = arith.constant dense<0.000000e+00> : vector<128xf32>
    %7 = vector.multi_reduction <add>, %6, %cst_4 [0] : vector<32x128xf32> to vector<128xf32>
    %8 = vector.shape_cast %7 : vector<128xf32> to vector<1x128xf32>
    %c0_5 = arith.constant 0 : index
    %c1 = arith.constant 1 : index
    %c0_6 = arith.constant 0 : index
    %9 = vector.load %arg2[%c0_5, %c1, %c0_6] : memref<1x2x128xf32, #tpu.memory_space<vmem>>, vector<1x1x128xf32>
    %10 = vector.shape_cast %9 : vector<1x1x128xf32> to vector<1x128xf32>
    %11 = vector.shape_cast %8 : vector<1x128xf32> to vector<1x1x128xf32>
    tpu.vector_store %arg2[%c0_5, %c1, %c0_6], %11 {strides = array<i32>} : memref<1x2x128xf32, #tpu.memory_space<vmem>>, vector<1x1x128xf32>,
    return
  }
  func.func @transform_0(%arg0: i32) -> (i32, i32) {
    %c0_i32 = arith.constant 0 : i32
    %c0_i32_0 = arith.constant 0 : i32
    return %arg0, %c0_i32 : i32, i32
  }
  func.func @transform_1(%arg0: i32) -> (i32, i32, i32) {
    %c0_i32 = arith.constant 0 : i32
    %c0_i32_0 = arith.constant 0 : i32
    %c0_i32_1 = arith.constant 0 : i32
    return %arg0, %c0_i32, %c0_i32_0 : i32, i32, i32
  }
}

module attributes {stable_mosaic.version = 11 : i64} {
  func.func @_affine_kernel(%arg0: i32, %arg1: memref<32x128xf32, #tpu.memory_space<vmem>>, %arg2: memref<1x128xf32, #tpu.memory_space<vmem>>, %arg3: memref<1x128xf32, #tpu.memory_space<vmem>>, %arg4: memref<32x128xf32, #tpu.memory_space<vmem>>) attributes {dimension_semantics = [#tpu.dimension_semantics<parallel>], iteration_bounds = array<i64: 2>, scalar_prefetch = 0 : i64, scratch_operands = 0 : i64, tpu.core_type = #tpu.core_type<tc>, window_params = [{transform_indices = @transform_0, window_bounds = array<i64: 32, 128>}, {pipeline_mode = #tpu.pipeline_mode<synchronous>, transform_indices = @transform_1, window_bounds = array<i64: 1, 128>}, {pipeline_mode = #tpu.pipeline_mode<synchronous>, transform_indices = @transform_2, window_bounds = array<i64: 1, 128>}, {transform_indices = @transform_3, window_bounds = array<i64: 32, 128>}]} {
    %c0 = arith.constant 0 : index
    %c0_0 = arith.constant 0 : index
    %0 = vector.load %arg1[%c0, %c0_0] : memref<32x128xf32, #tpu.memory_space<vmem>>, vector<32x128xf32>
    %c0_1 = arith.constant 0 : index
    %c0_2 = arith.constant 0 : index
    %1 = vector.load %arg2[%c0_1, %c0_2] : memref<1x128xf32, #tpu.memory_space<vmem>>, vector<1x128xf32>
    %2 = vector.broadcast %1 : vector<1x128xf32> to vector<32x128xf32>
    %3 = arith.mulf %0, %2 : vector<32x128xf32>
    %c0_3 = arith.constant 0 : index
    %c0_4 = arith.constant 0 : index
    %4 = vector.load %arg3[%c0_3, %c0_4] : memref<1x128xf32, #tpu.memory_space<vmem>>, vector<1x128xf32>
    %5 = vector.broadcast %4 : vector<1x128xf32> to vector<32x128xf32>
    %6 = arith.addf %3, %5 : vector<32x128xf32>
    %cst = arith.constant 0.000000e+00 : f32
    %7 = vector.broadcast %cst : f32 to vector<32x128xf32>
    %8 = arith.maximumf %6, %7 : vector<32x128xf32>
    %c0_5 = arith.constant 0 : index
    %c0_6 = arith.constant 0 : index
    %9 = vector.load %arg4[%c0_5, %c0_6] : memref<32x128xf32, #tpu.memory_space<vmem>>, vector<32x128xf32>
    tpu.vector_store %arg4[%c0_5, %c0_6], %8 {strides = array<i32>} : memref<32x128xf32, #tpu.memory_space<vmem>>, vector<32x128xf32>,
    return
  }
  func.func @transform_0(%arg0: i32) -> (i32, i32) {
    %c0_i32 = arith.constant 0 : i32
    %c0_i32_0 = arith.constant 0 : i32
    return %arg0, %c0_i32 : i32, i32
  }
  func.func @transform_1(%arg0: i32) -> (i32, i32) {
    %c0_i32 = arith.constant 0 : i32
    %c0_i32_0 = arith.constant 0 : i32
    %c0_i32_1 = arith.constant 0 : i32
    return %c0_i32, %c0_i32_0 : i32, i32
  }
  func.func @transform_2(%arg0: i32) -> (i32, i32) {
    %c0_i32 = arith.constant 0 : i32
    %c0_i32_0 = arith.constant 0 : i32
    %c0_i32_1 = arith.constant 0 : i32
    return %c0_i32, %c0_i32_0 : i32, i32
  }
  func.func @transform_3(%arg0: i32) -> (i32, i32) {
    %c0_i32 = arith.constant 0 : i32
    %c0_i32_0 = arith.constant 0 : i32
    return %arg0, %c0_i32 : i32, i32
  }
}

</mosaic_0001>

<bundles_post_ra>
// kernel: tpu_custom_call.1
= control target key start
LH: loop header
LB: loop body
LE: loop exit
PB: predicated region body
PF: predicated region fallthrough
CT: control target
= control target key end

     0   :  { %s549_s9 = smov 0   ;;  %s551_s10 = smov 0   ;;  %s606_s0 = inlined_call_operand.vmem [shape: bf16[128,64], index: 0, kind: input, shape index: {}]   ;;  %s607_s1 = inlined_call_operand.vmem [shape: bf16[64,16], index: 1, kind: input, shape index: {}]   ;;  %s608_s2 = inlined_call_operand.vmem [shape: f32[128,16], index: 2, kind: output, shape index: {}]  }
   0x1   :  { %s553_s11 = smov 0  }
   0x2 LB: > { %s24_s12 = sadd.s32 1, %s528_s10  ;;  %p427_p0 = scmp.ge.s32.totalorder %s532_s11, 1  ;;  %s532_s11 = sphi %s553_s11, %s12_s11   ;;  %s528_s10 = sphi %s551_s10, %s610_s10   ;;  %s524_s9 = sphi %s549_s9, %s609_s9  }
   0x3   : > { %p26_p1 = scmp.ge.s32.totalorder %s24_s12, 2  ;;  %p136_p2 = scmp.lt.s32.totalorder %s532_s11, 3 }
   0x5   : > { %s612_s12 = smov (%p26_p1, %s24_s12), 0  ;;  %p137_p3 = pnand %p427_p0, %p136_p2 }
   0x6   : > { %s428_s15 = sshll.u32 (!%p137_p3), %s524_s9, 3 }
   0x7   : > { %140 = sbr.rel (%p137_p3) target bundleno = 229 (0xe5), region = 28  ;;  %p166_p4 = scmp.lt.s32.totalorder (!%p137_p3), %s428_s15, 15 }
   0xc   : > { %v502_v0 = vld [vmem:[%s607_s1 + $0x18] sm:$0xff]   ;;  %v503_v1 = vld [vmem:[%s607_s1 + $0x10] sm:$0xff]   ;;  %s614_s15 = smov (!%p166_p4, %s428_s15), 15  ;;  %v504_v2 = vld [vmem:[%s607_s1 + $0x8] sm:$0xff]   ;;  %vm245_vm0 = vcmask 523264   ;;  %vm323_vm1 = vcmask 130048  }
   0xd   : > { %454 = vmatprep.subr.bf16.mxu0 %v502_v0  ;;  %470 = vmatprep.subr.bf16.mxu1 %v502_v0  ;;  %s429_s20 = sshll.u32 %s614_s15, 2  ;;  %v505_v3 = vld [vmem:[%s607_s1] sm:$0xff]   ;;  %s431_s26 = sshll.u32 %s614_s15, 3 }
   0xe   : > { %455 = vmatpush3.bf16.msra.mxu0 %v502_v0  ;;  %474 = vmatpush3.bf16.msra.mxu1 %v502_v0  ;;  %s169_s25 = scalar_lea.vmem %s606_s0, %s429_s20  ;;  %s182_s29 = scalar_lea.vmem %s608_s2, %s431_s26 }
   0xf   : > { %456 = vmatprep.subr.bf16.mxu0 %v503_v1  ;;  %471 = vmatprep.subr.bf16.mxu1 %v503_v1  ;;  %v506_v4 = vld [vmem:[%s169_s25] sm:$0xff]   ;;  %v507_v5 = vld [vmem:[%s169_s25 + $0x10] sm:$0xff]   ;;  %v508_v6 = vld [vmem:[%s169_s25 + $0x8] sm:$0xff]  }
  0x10   : > { %462 = vmatprep.mubr.msk.bf16.mxu0 %vm245_vm0, %v506_v4  ;;  %466 = vmatprep.mubr.msk.bf16.mxu1 %vm245_vm0, %v507_v5  ;;  %v509_v7 = vld [vmem:[%s169_s25 + $0x18] sm:$0xff]  }
  0x12   : > { %457 = vmatpush3.bf16.msra.mxu0 %v503_v1  ;;  %475 = vmatpush3.bf16.msra.mxu1 %v503_v1 }
  0x13   : > { %458 = vmatprep.subr.bf16.mxu0 %v504_v2  ;;  %472 = vmatprep.subr.bf16.mxu1 %v504_v2 }
  0x16   : > { %459 = vmatpush3.bf16.msra.mxu0 %v504_v2  ;;  %476 = vmatpush3.bf16.msra.mxu1 %v504_v2 }
  0x17   : > { %460 = vmatprep.subr.bf16.mxu0 %v505_v3  ;;  %473 = vmatprep.subr.bf16.mxu1 %v505_v3 }
  0x1a   : > { %461 = vmatpush3.bf16.msra.mxu0 %v505_v3  ;;  %477 = vmatpush3.bf16.msra.mxu1 %v505_v3 }
  0x1d   : > { %463 = vmatmul.mubr.msk.bf16.vlgmr.msra.gmra.mxu0 %vm245_vm0, %v508_v6  ;;  %467 = vmatmul.mubr.msk.bf16.vlgmr.msra.gmra.mxu1 %vm245_vm0, %v509_v7 }
  0xdd   : > { %v464_v8 = vpop.f32.mrf.mxu0  ;;  %v468_v9 = vpop.f32.mrf.mxu1 }
  0xde   : > { %326 = vst.msk [vmem:[%s182_s29 + $0x10] sm:$0xff] %vm323_vm1, %v464_v8  ;;  %330 = vst.msk [vmem:[%s182_s29 + $0x30] sm:$0xff] %vm323_vm1, %v468_v9 }
  0xdf   : > { %v292_v10 = vpop.f32.mrf.mxu0  ;;  %v308_v11 = vpop.f32.mrf.mxu1 }
  0xe0   : > { %324 = vst.msk [vmem:[%s182_s29] sm:$0xff] %vm323_vm1, %v292_v10  ;;  %328 = vst.msk [vmem:[%s182_s29 + $0x20] sm:$0xff] %vm323_vm1, %v308_v11 }
  0xe1   : > { %v465_v12 = vpop.f32.mrf.mxu0  ;;  %v469_v13 = vpop.f32.mrf.mxu1 }
  0xe2   : > { %327 = vst.msk [vmem:[%s182_s29 + $0x18] sm:$0xff] %vm323_vm1, %v465_v12  ;;  %331 = vst.msk [vmem:[%s182_s29 + $0x38] sm:$0xff] %vm323_vm1, %v469_v13 }
  0xe3   : > { %v295_v14 = vpop.f32.mrf.mxu0  ;;  %v311_v15 = vpop.f32.mrf.mxu1 }
  0xe4   : > { %325 = vst.msk [vmem:[%s182_s29 + $0x8] sm:$0xff] %vm323_vm1, %v295_v14  ;;  %329 = vst.msk [vmem:[%s182_s29 + $0x28] sm:$0xff] %vm323_vm1, %v311_v15 }
  0xe5 PF: > { %s12_s11 = sadd.s32 1, %s532_s11   ;;  %s609_s9 = smov %s528_s10 }
  0xe6   : > { %p9_p5 = scmp.ge.s32.totalorder %s12_s11, 4   ;;  %s610_s10 = smov %s612_s12 }
  0xe8   :  { %11 = sbr.rel (!%p9_p5) target bundleno = 2 (0x2), region = 61 }

// kernel: tpu_custom_call.1
= control target key start
LH: loop header
LB: loop body
LE: loop exit
PB: predicated region body
PF: predicated region fallthrough
CT: control target
= control target key end

     0   :  { %v2508_v0 = vmov 0.0   ;;  %vm2509_vm0 = vmmov 0   ;;  %vm84_vm1 = vsmask.f32 7424  ;;  %vm402_vm2 = vcmask 1046528   ;;  %s3221_s1 = inlined_call_operand.vmem [shape: bf16[9,128,16], index: 1, kind: input, shape index: {}]   ;;  %s3222_s0 = inlined_call_operand.vmem [shape: bf16[1,110,128], index: 0, kind: input, shape index: {}]   ;;  %s3223_s2 = inlined_call_operand.vmem [shape: f32[1,80,16], index: 2, kind: output, shape index: {}]  }
   0x1   :  { %2071 = vmatprep.subr.bf16.mxu0 %v2508_v0  ;;  %2107 = vmatprep.subr.bf16.mxu1 %v2508_v0  ;;  %v2413_v1 = vld [vmem:[%s3221_s1 + $0x78] sm:$0xff]   ;;  %v2415_v3 = vld [vmem:[%s3221_s1 + $0x70] sm:$0xff]   ;;  %v2417_v5 = vld [vmem:[%s3221_s1 + $0x68] sm:$0xff]   ;;  %vm774_vm3 = vsmask.f32 6400  ;;  %vm985_vm4 = vcmask 1045504  }
   0x2   :  { %v2414_v2 = vld [vmem:[%s3221_s1 + $0x38] sm:$0xff]   ;;  %2087 = vmatprep.mubr.msk.bf16.mxu0 %vm2509_vm0, %v2508_v0  ;;  %2123 = vmatprep.mubr.msk.bf16.mxu1 %vm2509_vm0, %v2508_v0  ;;  %v2416_v4 = vld [vmem:[%s3221_s1 + $0x30] sm:$0xff]   ;;  %v2418_v6 = vld [vmem:[%s3221_s1 + $0x28] sm:$0xff]   ;;  %vm1357_vm5 = vsmask.f32 5376  ;;  %vm1568_vm6 = vcmask 1044480  }
   0x3   :  { %2072 = vmatpush3.bf16.msra.mxu0 %v2413_v1  ;;  %2108 = vmatpush3.bf16.msra.mxu1 %v2414_v2  ;;  %v2419_v7 = vld [vmem:[%s3221_s1 + $0x60] sm:$0xff]   ;;  %v2421_v9 = vld [vmem:[%s3221_s1 + $0x58] sm:$0xff]   ;;  %v2423_v13 = vld [vmem:[%s3221_s1 + $0x50] sm:$0xff]   ;;  %vm1716_vm7 = vcmask 130048  }
   0x4   :  { %2073 = vmatprep.subr.bf16.mxu0 %v2508_v0  ;;  %2109 = vmatprep.subr.bf16.mxu1 %v2508_v0  ;;  %v2420_v8 = vld [vmem:[%s3221_s1 + $0x20] sm:$0xff]   ;;  %v2422_v10 = vld [vmem:[%s3221_s1 + $0x18] sm:$0xff]   ;;  %v2584_v15 = vld [vmem:[%s3222_s0 + $0x8] sm:$0xff]  }
   0x5   :  { %v12_v11 = vld [vmem:[%s3222_s0] sm:$0xf]  ;;  %v2575_v12 = vld [vmem:[%s3222_s0 + $0x4] sm:$0xf]  ;;  %v2424_v16 = vld [vmem:[%s3221_s1 + $0x10] sm:$0xff]   ;;  %v93_v21 = vshll.u32 %v2584_v15, 16 }
   0x6   :  { %v1747_v14 = vcombine.low %v12_v11, %v2575_v12  ;;  %v2425_v18 = vld [vmem:[%s3221_s1 + $0x48] sm:$0xff]   ;;  %v2427_v23 = vld [vmem:[%s3221_s1 + $0x40] sm:$0xff]   ;;  %v2606_v26 = vld [vmem:[%s3222_s0 + $0x10] sm:$0xff]   ;;  %v97_v30 = vshrl.u32 %v2584_v15, 16 }
   0x7   :  { %2074 = vmatpush3.bf16.msra.mxu0 %v2415_v3  ;;  %2110 = vmatpush3.bf16.msra.mxu1 %v2416_v4  ;;  %v2426_v22 = vld [vmem:[%s3221_s1 + $0x8] sm:$0xff]   ;;  %v95_v25 = vrot.slane %v93_v21, 1  ;;  %v2428_v27 = vld [vmem:[%s3221_s1] sm:$0xff]   ;;  %v2431_v28 = vld [vmem:[%s3221_s1 + $0xb8] sm:$0xff]   ;;  %v101_v31 = vshll.u32 %v2606_v26, 16  ;;  %v105_v41 = vshrl.u32 %v2606_v26, 16 }
   0x8   :  { %2075 = vmatprep.subr.bf16.mxu0 %v2508_v0  ;;  %2111 = vmatprep.subr.bf16.mxu1 %v2508_v0  ;;  %v88_v17 = vshll.u32 %v1747_v14, 16  ;;  %v86_v19 = vshrl.u32 %v1747_v14, 16  ;;  %v2434_v32 = vld [vmem:[%s3221_s1 + $0xf8] sm:$0xff]   ;;  %v2432_v34 = vld [vmem:[%s3221_s1 + $0xb0] sm:$0xff]   ;;  %v2435_v40 = vld [vmem:[%s3221_s1 + $0xa8] sm:$0xff]   ;;  %v406_v21 = vrot.slane %v2606_v26, 1 }
   0x9   :  { %v2627_v33 = vld [vmem:[%s3222_s0 + $0x18] sm:$0xff]   ;;  %v99_v35 = vor.u32 %v97_v30, %v95_v25  ;;  %v103_v36 = vrot.slane %v101_v31, 1  ;;  %v2436_v37 = vld [vmem:[%s3221_s1 + $0xf0] sm:$0xff]   ;;  %v2439_v42 = vld [vmem:[%s3221_s1 + $0xe8] sm:$0xff]  }
   0xa   :  { %v90_v20 = vrot.slane %v88_v17, 1  ;;  %v109_v38 = vshll.u32 %v2627_v33, 16  ;;  %v2438_v44 = vld [vmem:[%s3221_s1 + $0xa0] sm:$0xff]   ;;  %v2440_v48 = vld [vmem:[%s3221_s1 + $0x98] sm:$0xff]   ;;  %v113_v50 = vshrl.u32 %v2627_v33, 16  ;;  %v2444_v56 = vld [vmem:[%s3221_s1 + $0x90] sm:$0xff]  }
   0xb   :  { %2076 = vmatpush3.bf16.msra.mxu0 %v2417_v5  ;;  %2112 = vmatpush3.bf16.msra.mxu1 %v2418_v6  ;;  %v104_v39 = vsel %vm84_vm1, %v99_v35, %v103_v36  ;;  %v2658_v45 = vld [vmem:[%s3222_s0 + $0x20] sm:$0xff]   ;;  %v107_v46 = vor.u32 %v105_v41, %v103_v36  ;;  %v2443_v52 = vld [vmem:[%s3221_s1 + $0xd8] sm:$0xff]   ;;  %v2683_v53 = vld [vmem:[%s3222_s0 + $0x28] ss:$0 sps:$4 sm:$0x11]  }
   0xc   :  { %2077 = vmatprep.subr.bf16.mxu0 %v2508_v0  ;;  %2113 = vmatprep.subr.bf16.mxu1 %v2508_v0  ;;  %v91_v24 = vor.u32 %v90_v20, %v86_v19  ;;  %v111_v43 = vrot.slane %v109_v38, 1  ;;  %v2441_v47 = vld [vmem:[%s3221_s1 + $0xe0] sm:$0xff]   ;;  %v117_v51 = vshll.u32 %v2658_v45, 16  ;;  %v2445_v57 = vld [vmem:[%s3221_s1 + $0xd0] sm:$0xff]   ;;  %v121_v59 = vshrl.u32 %v2658_v45, 16  ;;  %v2446_v61 = vld [vmem:[%s3221_s1 + $0x88] sm:$0xff]  }
   0xd   :  { %v125_v60 = vshll.u32 %v2683_v53, 16  ;;  %v2448_v62 = vld [vmem:[%s3221_s1 + $0xc8] sm:$0xff]   ;;  %v2449_v63 = vld [vmem:[%s3221_s1 + $0x80] sm:$0xff]   ;;  %v2454_v17 = vld [vmem:[%s3221_s1 + $0x138] sm:$0xff]   ;;  %v410_v38 = vrot.slane %v2658_v45, 1 }
   0xe   :  { %v96_v29 = vsel %vm84_vm1, %v91_v24, %v95_v25  ;;  %v112_v49 = vsel %vm84_vm1, %v107_v46, %v111_v43  ;;  %v115_v54 = vor.u32 %v113_v50, %v111_v43  ;;  %v119_v55 = vrot.slane %v117_v51, 1  ;;  %v2450_v3 = vld [vmem:[%s3221_s1 + $0xc0] sm:$0xff]   ;;  %v2731_v6 = vld [vmem:[%s3222_s0 + $0x8] sm:$0xf]  ;;  %v2762_v19 = vld [vmem:[%s3222_s0 + $0x14] sm:$0xff]  }
   0xf   :  { %2078 = vmatpush3.bf16.msra.mxu0 %v2419_v7  ;;  %2114 = vmatpush3.bf16.msra.mxu1 %v2420_v8  ;;  %v127_v2 = vrot.slane %v125_v60, 1  ;;  %v381_v4 = vld [vmem:[%s3222_s0] sm:$0xe]  ;;  %v550_v5 = vld [vmem:[%s3222_s0 + $0x4] sm:$0xe]  ;;  %v2455_v20 = vld [vmem:[%s3221_s1 + $0x130] sm:$0xff]  }
  0x10   :  { %2079 = vmatprep.subr.bf16.mxu0 %v2508_v0  ;;  %2115 = vmatprep.subr.bf16.mxu1 %v2508_v0  ;;  %v120_v58 = vsel %vm84_vm1, %v115_v54, %v119_v55  ;;  %v123_v1 = vor.u32 %v121_v59, %v119_v55  ;;  %v1785_v8 = vcombine.low %v381_v4, %v2575_v12  ;;  %v404_v12 = vrot.slane %v2584_v15, 1  ;;  %v2458_v25 = vld [vmem:[%s3221_s1 + $0x128] sm:$0xff]   ;;  %v2461_v30 = vld [vmem:[%s3221_s1 + $0x120] sm:$0xff]   ;;  %v2468_v41 = vld [vmem:[%s3221_s1 + $0x150] sm:$0xff]  }
  0x11   :  { %v2819_v36 = vld [vmem:[%s3222_s0 + $0x24] sm:$0xff]   ;;  %v2470_v43 = vld [vmem:[%s3222_s0 + $0x2c] ss:$0 sps:$4 sm:$0x11]  }
  0x12   :  { %v128_v7 = vsel %vm84_vm1, %v123_v1, %v127_v2  ;;  %v403_v11 = vrot.slane %v1785_v8, 1  ;;  %v407_v24 = vsel %vm402_vm2, %v404_v12, %v406_v21  ;;  %v2471_v46 = vld [vmem:[%s3221_s1 + $0x148] sm:$0xff]   ;;  %v2473_v54 = vld [vmem:[%s3221_s1 + $0x140] sm:$0xff]   ;;  %v793_v2 = vshrl.u32 %v2762_v19, 16 }
  0x13   :  { %2080 = vmatpush3.bf16.msra.mxu0 %v2421_v9  ;;  %2116 = vmatpush3.bf16.msra.mxu1 %v2422_v10  ;;  %v2737_v9 = vcombine.low %v550_v5, %v2731_v6  ;;  %v2742_v10 = vld [vmem:[%s3222_s0 + $0xc] sm:$0xff]   ;;  %v964_v55 = vld [vmem:[%s3222_s0 + $0x4] sm:$0xc] }
  0x14   :  { %2081 = vmatprep.subr.bf16.mxu0 %v2508_v0  ;;  %2117 = vmatprep.subr.bf16.mxu1 %v2508_v0  ;;  %v784_v50 = vshrl.u32 %v2742_v10, 16  ;;  %v787_v51 = vshll.u32 %v2742_v10, 16  ;;  %v987_v5 = vrot.slane %v2742_v10, 2  ;;  %v795_v8 = vrot.slane %v793_v2, 1 }
  0x16   :  { %v786_v59 = vrot.slane %v784_v50, 1  ;;  %v789_v60 = vrot.slane %v787_v51, 2  ;;  %v2976_v51 = vld [vmem:[%s3222_s0 + $0x10] sm:$0xff]  }
  0x17   :  { %2082 = vmatpush3.bf16.msra.mxu0 %v2423_v13  ;;  %2118 = vmatpush3.bf16.msra.mxu1 %v2424_v16  ;;  %v606_v13 = vrot.slane %v2737_v9, 1  ;;  %v405_v16 = vsel %vm402_vm2, %v403_v11, %v404_v12  ;;  %v2477_v12 = vld [vmem:[%s3221_s1 + $0x1f8] sm:$0xff]  }
  0x18   :  { %2083 = vmatprep.subr.bf16.mxu0 %v2508_v0  ;;  %2119 = vmatprep.subr.bf16.mxu1 %v2508_v0  ;;  %v790_v1 = vor.u32 %v789_v60, %v786_v59  ;;  %v1370_v59 = vshll.u32 %v2976_v51, 16  ;;  %v2491_v60 = vld [vmem:[%s3221_s1 + $0x1c0] sm:$0xff]  }
  0x1b   :  { %2084 = vmatpush3.bf16.msra.mxu0 %v2425_v18  ;;  %2120 = vmatpush3.bf16.msra.mxu1 %v2426_v22  ;;  %v609_v22 = vrot.slane %v2762_v19, 1 }
  0x1c   :  { %2085 = vmatprep.subr.bf16.mxu0 %v2508_v0  ;;  %2121 = vmatprep.subr.bf16.mxu1 %v2508_v0 }
  0x1f   :  { %2086 = vmatpush3.bf16.msra.mxu0 %v2427_v23  ;;  %2122 = vmatpush3.bf16.msra.mxu1 %v2428_v27  ;;  %v2459_v23 = vld [vmem:[%s3221_s1 + $0x170] sm:$0xff]   ;;  %v2790_v27 = vld [vmem:[%s3222_s0 + $0x1c] sm:$0xff]  }
  0x20   :  { %2143 = vmatprep.subr.bf16.mxu0 %v2508_v0  ;;  %2179 = vmatprep.subr.bf16.mxu1 %v2508_v0  ;;  %v611_v31 = vrot.slane %v2790_v27, 1 }
  0x22   :  { %2088 = vmatmul.mubr.bf16.vlgmr.msra.gmra.mxu0 %v96_v29  ;;  %2124 = vmatmul.mubr.bf16.vlgmr.msra.gmra.mxu1 %v1747_v14  ;;  %v607_v14 = vrot.slane %v2742_v10, 1  ;;  %v408_v29 = vrot.slane %v2627_v33, 1  ;;  %v612_v35 = vsel %vm402_vm2, %v609_v22, %v611_v31  ;;  %v2476_v10 = vld [vmem:[%s3221_s1 + $0x1b0] sm:$0xff]  }
  0x23   :  { %2144 = vmatpush3.bf16.msra.mxu0 %v2431_v28  ;;  %2091 = vmatprep.mubr.msk.bf16.mxu0 %vm2509_vm0, %v2508_v0  ;;  %v2462_v28 = vld [vmem:[%s3221_s1 + $0x168] sm:$0xff]  }
  0x24   :  { %2145 = vmatprep.subr.bf16.mxu0 %v2508_v0  ;;  %2127 = vmatprep.mubr.msk.bf16.mxu1 %vm2509_vm0, %v2508_v0  ;;  %v608_v18 = vsel %vm402_vm2, %v606_v13, %v607_v14 }
  0x25   :  { %2180 = vmatpush3.bf16.msra.mxu1 %v2434_v32  ;;  %v2464_v32 = vld [vmem:[%s3221_s1 + $0x160] sm:$0xff]  }
  0x26   :  { %2181 = vmatprep.subr.bf16.mxu1 %v2508_v0 }
  0x27   :  { %2146 = vmatpush3.bf16.msra.mxu0 %v2432_v34  ;;  %v2463_v34 = vld [vmem:[%s3221_s1 + $0x118] sm:$0xff]  }
  0x28   :  { %2147 = vmatprep.subr.bf16.mxu0 %v2508_v0 }
  0x29   :  { %2182 = vmatpush3.bf16.msra.mxu1 %v2436_v37  ;;  %v2466_v37 = vld [vmem:[%s3221_s1 + $0x158] sm:$0xff]  }
  0x2a   :  { %2092 = vmatmul.mubr.bf16.gmra.mxu0 %v104_v39  ;;  %2183 = vmatprep.subr.bf16.mxu1 %v2508_v0  ;;  %v2467_v39 = vld [vmem:[%s3221_s1 + $0x110] sm:$0xff]  }
  0x2b   :  { %2128 = vmatmul.mubr.bf16.gmra.mxu1 %v2584_v15  ;;  %2148 = vmatpush3.bf16.msra.mxu0 %v2435_v40  ;;  %v2457_v15 = vld [vmem:[%s3221_s1 + $0x178] sm:$0xff]   ;;  %v613_v40 = vrot.slane %v2819_v36, 1 }
  0x2c   :  { %2095 = vmatprep.mubr.msk.bf16.mxu0 %vm2509_vm0, %v2508_v0  ;;  %2131 = vmatprep.mubr.msk.bf16.mxu1 %vm2509_vm0, %v2508_v0 }
  0x2d   :  { %2149 = vmatprep.subr.bf16.mxu0 %v2508_v0  ;;  %2184 = vmatpush3.bf16.msra.mxu1 %v2439_v42  ;;  %v411_v42 = vsel %vm402_vm2, %v408_v29, %v410_v38 }
  0x2e   :  { %2185 = vmatprep.subr.bf16.mxu1 %v2508_v0 }
  0x2f   :  { %2150 = vmatpush3.bf16.msra.mxu0 %v2438_v44  ;;  %v614_v44 = vsel %vm402_vm2, %v611_v31, %v613_v40 }
  0x30   :  { %2151 = vmatprep.subr.bf16.mxu0 %v2508_v0 }
  0x31   :  { %2186 = vmatpush3.bf16.msra.mxu1 %v2441_v47  ;;  %v412_v47 = vrot.slane %v2683_v53, 1  ;;  %v2472_v53 = vld [vmem:[%s3221_s1 + $0x100] sm:$0xff]  }
  0x32   :  { %2096 = vmatmul.mubr.bf16.gmra.mxu0 %v112_v49  ;;  %2187 = vmatprep.subr.bf16.mxu1 %v2508_v0  ;;  %v779_v49 = vshll.u32 %v2737_v9, 16 }
  0x33   :  { %2132 = vmatmul.mubr.bf16.gmra.mxu1 %v2606_v26  ;;  %2152 = vmatpush3.bf16.msra.mxu0 %v2440_v48  ;;  %v610_v26 = vsel %vm402_vm2, %v607_v14, %v609_v22  ;;  %v776_v48 = vshrl.u32 %v2737_v9, 16  ;;  %v802_v14 = vshrl.u32 %v2790_v27, 16 }
  0x34   :  { %2099 = vmatprep.mubr.msk.bf16.mxu0 %vm2509_vm0, %v2508_v0  ;;  %2135 = vmatprep.mubr.msk.bf16.mxu1 %vm2509_vm0, %v2508_v0 }
  0x35   :  { %2153 = vmatprep.subr.bf16.mxu0 %v2508_v0  ;;  %2188 = vmatpush3.bf16.msra.mxu1 %v2443_v52  ;;  %v615_v52 = vrot.slane %v2470_v43, 1  ;;  %v2486_v43 = vld [vmem:[%s3221_s1 + $0x1d0] sm:$0xff]  }
  0x36   :  { %2189 = vmatprep.subr.bf16.mxu1 %v2508_v0 }
  0x37   :  { %2154 = vmatpush3.bf16.msra.mxu0 %v2444_v56  ;;  %v413_v56 = vsel %vm402_vm2, %v410_v38, %v412_v47 }
  0x38   :  { %2155 = vmatprep.subr.bf16.mxu0 %v2508_v0 }
  0x39   :  { %2190 = vmatpush3.bf16.msra.mxu1 %v2445_v57  ;;  %v778_v57 = vrot.slane %v776_v48, 1 }
  0x3a   :  { %2100 = vmatmul.mubr.bf16.gmra.mxu0 %v120_v58  ;;  %2191 = vmatprep.subr.bf16.mxu1 %v2508_v0  ;;  %v781_v58 = vrot.slane %v779_v49, 2  ;;  %v2487_v49 = vld [vmem:[%s3221_s1 + $0x188] sm:$0xff]  }
  0x3b   :  { %2136 = vmatmul.mubr.bf16.gmra.mxu1 %v2627_v33  ;;  %2103 = vmatprep.mubr.msk.bf16.mxu0 %vm2509_vm0, %v2508_v0  ;;  %v409_v33 = vsel %vm402_vm2, %v406_v21, %v408_v29  ;;  %v804_v21 = vrot.slane %v802_v14, 1  ;;  %v991_v29 = vrot.slane %v2790_v27, 2 }
  0x3c   :  { %2139 = vmatprep.mubr.msk.bf16.mxu1 %vm2509_vm0, %v2508_v0  ;;  %2156 = vmatpush3.bf16.msra.mxu0 %v2446_v61  ;;  %v616_v61 = vsel %vm402_vm2, %v613_v40, %v615_v52  ;;  %v2489_v52 = vld [vmem:[%s3221_s1 + $0x1c8] sm:$0xff]  }
  0x3d   :  { %2192 = vmatpush3.bf16.msra.mxu1 %v2448_v62  ;;  %2157 = vmatprep.subr.bf16.mxu0 %v2508_v0  ;;  %v1865_v62 = vcombine.low %v964_v55, %v2731_v6  ;;  %v2490_v55 = vld [vmem:[%s3221_s1 + $0x180] sm:$0xff]  }
  0x3e   :  { %2193 = vmatprep.subr.bf16.mxu1 %v2508_v0 }
  0x3f   :  { %v986_v4 = vrot.slane %v1865_v62, 2 }
  0x40   :  { %2158 = vmatpush3.bf16.msra.mxu0 %v2449_v63  ;;  %v782_v63 = vor.u32 %v781_v58, %v778_v57  ;;  %v1367_v58 = vshrl.u32 %v2976_v51, 16 }
  0x41   :  { %2194 = vmatpush3.bf16.msra.mxu1 %v2450_v3  ;;  %2215 = vmatprep.subr.bf16.mxu0 %v2508_v0  ;;  %v796_v3 = vshll.u32 %v2762_v19, 16  ;;  %v988_v11 = vsel %vm985_vm4, %v986_v4, %v987_v5  ;;  %v3001_v4 = vld [vmem:[%s3222_s0 + $0x18] sm:$0xff]  }
  0x42   :  { %2104 = vmatmul.mubr.bf16.gmra.mxu0 %v128_v7  ;;  %2251 = vmatprep.subr.bf16.mxu1 %v2508_v0  ;;  %v791_v6 = vsel %vm774_vm3, %v782_v63, %v790_v1  ;;  %v2475_v7 = vld [vmem:[%s3221_s1 + $0x1b8] sm:$0xff]   ;;  %v1369_v2 = vrot.slane %v1367_v58, 2 }
  0x43   :  { %2140 = vmatmul.mubr.bf16.gmra.mxu1 %v2658_v45  ;;  %2159 = vmatprep.mubr.msk.bf16.mxu0 %vm2509_vm0, %v2508_v0  ;;  %v2469_v45 = vld [vmem:[%s3221_s1 + $0x108] sm:$0xff]   ;;  %v798_v9 = vrot.slane %v796_v3, 2  ;;  %v1372_v3 = vrot.slane %v1370_v59, 3 }
  0x44   :  { %2195 = vmatprep.mubr.msk.bf16.mxu1 %vm2509_vm0, %v2508_v0 }
  0x45   :  { %v799_v13 = vor.u32 %v798_v9, %v795_v8  ;;  %v1373_v8 = vor.u32 %v1372_v3, %v1369_v2  ;;  %v1376_v9 = vshrl.u32 %v3001_v4, 16 }
  0x47   :  { %v1378_v14 = vrot.slane %v1376_v9, 2 }
  0x4a   :  { %2160 = vmatmul.mubr.bf16.vlgmr.msra.gmra.mxu0 %v405_v16  ;;  %v805_v16 = vshll.u32 %v2790_v27, 16  ;;  %v2488_v27 = vld [vmem:[%s3222_s0 + $0x2c] ss:$0 sps:$4 sm:$0x33]  }
  0x4b   :  { %2196 = vmatmul.mubr.bf16.vlgmr.msra.gmra.mxu1 %v608_v18  ;;  %2216 = vmatpush3.bf16.msra.mxu0 %v2454_v17  ;;  %v989_v17 = vrot.slane %v2762_v19, 2  ;;  %v2479_v18 = vld [vmem:[%s3221_s1 + $0x1f0] sm:$0xff]   ;;  %v820_v40 = vshrl.u32 %v2488_v27, 16 }
  0x4c   :  { %2217 = vmatprep.subr.bf16.mxu0 %v2508_v0  ;;  %2163 = vmatprep.mubr.msk.bf16.mxu0 %vm2509_vm0, %v2508_v0  ;;  %v807_v22 = vrot.slane %v805_v16, 2 }
  0x4d   :  { %2199 = vmatprep.mubr.msk.bf16.mxu1 %vm2509_vm0, %v2508_v0  ;;  %2252 = vmatpush3.bf16.msra.mxu1 %v2457_v15  ;;  %v800_v15 = vsel %vm774_vm3, %v790_v1, %v799_v13  ;;  %v990_v19 = vsel %vm985_vm4, %v987_v5, %v989_v17 }
  0x4e   :  { %2253 = vmatprep.subr.bf16.mxu1 %v2508_v0 }
  0x4f   :  { %2218 = vmatpush3.bf16.msra.mxu0 %v2455_v20  ;;  %v2478_v20 = vld [vmem:[%s3221_s1 + $0x1a8] sm:$0xff]  }
  0x50   :  { %2219 = vmatprep.subr.bf16.mxu0 %v2508_v0 }
  0x51   :  { %2254 = vmatpush3.bf16.msra.mxu1 %v2459_v23  ;;  %v2481_v23 = vld [vmem:[%s3221_s1 + $0x1e8] sm:$0xff]  }
  0x52   :  { %2164 = vmatmul.mubr.bf16.gmra.mxu0 %v407_v24  ;;  %2255 = vmatprep.subr.bf16.mxu1 %v2508_v0  ;;  %v808_v24 = vor.u32 %v807_v22, %v804_v21 }
  0x53   :  { %2200 = vmatmul.mubr.bf16.gmra.mxu1 %v610_v26  ;;  %2220 = vmatpush3.bf16.msra.mxu0 %v2458_v25  ;;  %v2480_v25 = vld [vmem:[%s3221_s1 + $0x1a0] sm:$0xff]   ;;  %v811_v26 = vshrl.u32 %v2819_v36, 16 }
  0x54   :  { %2167 = vmatprep.mubr.msk.bf16.mxu0 %vm2509_vm0, %v2508_v0  ;;  %2203 = vmatprep.mubr.msk.bf16.mxu1 %vm2509_vm0, %v2508_v0  ;;  %v809_v31 = vsel %vm774_vm3, %v799_v13, %v808_v24 }
  0x55   :  { %2221 = vmatprep.subr.bf16.mxu0 %v2508_v0  ;;  %2256 = vmatpush3.bf16.msra.mxu1 %v2462_v28  ;;  %v814_v28 = vshll.u32 %v2819_v36, 16 }
  0x56   :  { %2257 = vmatprep.subr.bf16.mxu1 %v2508_v0 }
  0x57   :  { %2222 = vmatpush3.bf16.msra.mxu0 %v2461_v30  ;;  %v2483_v30 = vld [vmem:[%s3221_s1 + $0x1e0] sm:$0xff]  }
  0x58   :  { %2223 = vmatprep.subr.bf16.mxu0 %v2508_v0 }
  0x59   :  { %2258 = vmatpush3.bf16.msra.mxu1 %v2464_v32  ;;  %v2482_v32 = vld [vmem:[%s3221_s1 + $0x198] sm:$0xff]  }
  0x5a   :  { %2168 = vmatmul.mubr.bf16.gmra.mxu0 %v409_v33  ;;  %2259 = vmatprep.subr.bf16.mxu1 %v2508_v0  ;;  %v813_v33 = vrot.slane %v811_v26, 1 }
  0x5b   :  { %2204 = vmatmul.mubr.bf16.gmra.mxu1 %v612_v35  ;;  %2224 = vmatpush3.bf16.msra.mxu0 %v2463_v34  ;;  %v816_v34 = vrot.slane %v814_v28, 2  ;;  %v992_v35 = vsel %vm985_vm4, %v989_v17, %v991_v29  ;;  %v3020_v17 = vld [vmem:[%s3222_s0 + $0x20] sm:$0xff]   ;;  %v3043_v28 = vld [vmem:[%s3222_s0 + $0x28] sm:$0xff]  }
  0x5c   :  { %2171 = vmatprep.mubr.msk.bf16.mxu0 %vm2509_vm0, %v2508_v0  ;;  %2207 = vmatprep.mubr.msk.bf16.mxu1 %vm2509_vm0, %v2508_v0  ;;  %v1385_v21 = vshrl.u32 %v3020_v17, 16  ;;  %v1388_v22 = vshll.u32 %v3020_v17, 16 }
  0x5d   :  { %2225 = vmatprep.subr.bf16.mxu0 %v2508_v0  ;;  %2260 = vmatpush3.bf16.msra.mxu1 %v2466_v37  ;;  %v2484_v37 = vld [vmem:[%s3221_s1 + $0x1d8] sm:$0xff]   ;;  %v817_v38 = vor.u32 %v816_v34, %v813_v33  ;;  %v1397_v33 = vshll.u32 %v3043_v28, 16 }
  0x5e   :  { %2261 = vmatprep.subr.bf16.mxu1 %v2508_v0  ;;  %v1390_v26 = vrot.slane %v1388_v22, 3 }
  0x5f   :  { %2226 = vmatpush3.bf16.msra.mxu0 %v2467_v39  ;;  %v2485_v39 = vld [vmem:[%s3221_s1 + $0x190] sm:$0xff]  }
  0x60   :  { %2227 = vmatprep.subr.bf16.mxu0 %v2508_v0 }
  0x61   :  { %2262 = vmatpush3.bf16.msra.mxu1 %v2468_v41  ;;  %v823_v41 = vshll.u32 %v2488_v27, 16 }
  0x62   :  { %2172 = vmatmul.mubr.bf16.gmra.mxu0 %v411_v42  ;;  %2263 = vmatprep.subr.bf16.mxu1 %v2508_v0  ;;  %v993_v42 = vrot.slane %v2819_v36, 2  ;;  %v818_v36 = vsel %vm774_vm3, %v808_v24, %v817_v38 }
  0x63   :  { %2208 = vmatmul.mubr.bf16.gmra.mxu1 %v614_v44  ;;  %2175 = vmatprep.mubr.msk.bf16.mxu0 %vm2509_vm0, %v2508_v0  ;;  %v1133_v44 = vld [vmem:[%s3222_s0 + $0x8] sm:$0xc]  ;;  %v825_v47 = vrot.slane %v823_v41, 2  ;;  %v2502_v41 = vld [vmem:[%s3221_s1 + $0x210] sm:$0xff]  }
  0x64   :  { %2211 = vmatprep.mubr.msk.bf16.mxu1 %vm2509_vm0, %v2508_v0  ;;  %2228 = vmatpush3.bf16.msra.mxu0 %v2469_v45  ;;  %v2963_v45 = vld [vmem:[%s3222_s0 + $0xc] sm:$0xf]  ;;  %v994_v48 = vsel %vm985_vm4, %v991_v29, %v993_v42  ;;  %v1194_v29 = vrot.slane %v3020_v17, 2 }
  0x65   :  { %2264 = vmatpush3.bf16.msra.mxu1 %v2471_v46  ;;  %2229 = vmatprep.subr.bf16.mxu0 %v2508_v0  ;;  %v822_v46 = vrot.slane %v820_v40, 1  ;;  %v1890_v50 = vcombine.low %v1133_v44, %v2963_v45  ;;  %v1196_v40 = vrot.slane %v3043_v28, 2 }
  0x66   :  { %2265 = vmatprep.subr.bf16.mxu1 %v2508_v0 }
  0x67   :  { %v1362_v57 = vshll.u32 %v1890_v50, 16  ;;  %v1189_v5 = vrot.slane %v1890_v50, 2 }
  0x68   :  { %2230 = vmatpush3.bf16.msra.mxu0 %v2472_v53  ;;  %v826_v53 = vor.u32 %v825_v47, %v822_v46  ;;  %v2504_v46 = vld [vmem:[%s3222_s0 + $0x30] ss:$0 sps:$4 sm:$0x33]  }
  0x69   :  { %2266 = vmatpush3.bf16.msra.mxu1 %v2473_v54  ;;  %2287 = vmatprep.subr.bf16.mxu0 %v2508_v0  ;;  %v995_v54 = vrot.slane %v2488_v27, 2  ;;  %v1364_v1 = vrot.slane %v1362_v57, 3  ;;  %v2500_v27 = vld [vmem:[%s3221_s1 + $0x218] sm:$0xff]  }
  0x6a   :  { %2176 = vmatmul.mubr.bf16.gmra.mxu0 %v413_v56  ;;  %2323 = vmatprep.subr.bf16.mxu1 %v2508_v0  ;;  %v1359_v56 = vshrl.u32 %v1890_v50, 16 }
  0x6b   :  { %2212 = vmatmul.mubr.bf16.gmra.mxu1 %v616_v61  ;;  %2231 = vmatprep.mubr.msk.bf16.mxu0 %vm2509_vm0, %v2508_v0  ;;  %v827_v61 = vsel %vm774_vm3, %v817_v38, %v826_v53  ;;  %v996_v62 = vsel %vm985_vm4, %v993_v42, %v995_v54  ;;  %v1399_v38 = vrot.slane %v1397_v33, 3  ;;  %v2506_v54 = vld [vmem:[%s3221_s1 + $0x200] sm:$0xff]  }
  0x6c   :  { %2267 = vmatprep.mubr.msk.bf16.mxu1 %vm2509_vm0, %v2508_v0  ;;  %v1361_v63 = vrot.slane %v1359_v56, 2 }
  0x72   :  { %2232 = vmatmul.mubr.bf16.vlgmr.msra.gmra.mxu0 %v791_v6  ;;  %v1190_v6 = vrot.slane %v2976_v51, 2 }
  0x73   :  { %2268 = vmatmul.mubr.bf16.vlgmr.msra.gmra.mxu1 %v988_v11  ;;  %2288 = vmatpush3.bf16.msra.mxu0 %v2475_v7  ;;  %v1365_v7 = vor.u32 %v1364_v1, %v1361_v63  ;;  %v1379_v11 = vshll.u32 %v3001_v4, 16  ;;  %v1572_v1 = vrot.slane %v3001_v4, 3 }
  0x74   :  { %2289 = vmatprep.subr.bf16.mxu0 %v2508_v0  ;;  %2235 = vmatprep.mubr.msk.bf16.mxu0 %vm2509_vm0, %v2508_v0 }
  0x75   :  { %2271 = vmatprep.mubr.msk.bf16.mxu1 %vm2509_vm0, %v2508_v0  ;;  %2324 = vmatpush3.bf16.msra.mxu1 %v2477_v12  ;;  %v1191_v12 = vsel %vm985_vm4, %v1189_v5, %v1190_v6  ;;  %v1374_v13 = vsel %vm1357_vm5, %v1365_v7, %v1373_v8  ;;  %v1381_v16 = vrot.slane %v1379_v11, 3 }
  0x76   :  { %2325 = vmatprep.subr.bf16.mxu1 %v2508_v0 }
  0x77   :  { %2290 = vmatpush3.bf16.msra.mxu0 %v2476_v10  ;;  %v2494_v10 = vld [vmem:[%s3221_s1 + $0x238] sm:$0xff]  }
  0x78   :  { %2291 = vmatprep.subr.bf16.mxu0 %v2508_v0 }
  0x79   :  { %2326 = vmatpush3.bf16.msra.mxu1 %v2479_v18  ;;  %v2495_v18 = vld [vmem:[%s3221_s1 + $0x230] sm:$0xff]  }
  0x7a   :  { %2236 = vmatmul.mubr.bf16.gmra.mxu0 %v800_v15  ;;  %2327 = vmatprep.subr.bf16.mxu1 %v2508_v0  ;;  %v1192_v15 = vrot.slane %v3001_v4, 2 }
  0x7b   :  { %2272 = vmatmul.mubr.bf16.gmra.mxu1 %v990_v19  ;;  %2292 = vmatpush3.bf16.msra.mxu0 %v2478_v20  ;;  %v1382_v20 = vor.u32 %v1381_v16, %v1378_v14 }
  0x7c   :  { %2239 = vmatprep.mubr.msk.bf16.mxu0 %vm2509_vm0, %v2508_v0  ;;  %2275 = vmatprep.mubr.msk.bf16.mxu1 %vm2509_vm0, %v2508_v0  ;;  %v1193_v19 = vsel %vm985_vm4, %v1190_v6, %v1192_v15  ;;  %v1195_v34 = vsel %vm985_vm4, %v1192_v15, %v1194_v29 }
  0x7d   :  { %2293 = vmatprep.subr.bf16.mxu0 %v2508_v0  ;;  %2328 = vmatpush3.bf16.msra.mxu1 %v2481_v23  ;;  %v2497_v23 = vld [vmem:[%s3221_s1 + $0x228] sm:$0xff]   ;;  %v1383_v24 = vsel %vm1357_vm5, %v1373_v8, %v1382_v20 }
  0x7e   :  { %2329 = vmatprep.subr.bf16.mxu1 %v2508_v0 }
  0x7f   :  { %2294 = vmatpush3.bf16.msra.mxu0 %v2480_v25  ;;  %v1387_v25 = vrot.slane %v1385_v21, 2 }
  0x80   :  { %2295 = vmatprep.subr.bf16.mxu0 %v2508_v0 }
  0x81   :  { %2330 = vmatpush3.bf16.msra.mxu1 %v2483_v30  ;;  %v2499_v30 = vld [vmem:[%s3221_s1 + $0x220] sm:$0xff]  }
  0x82   :  { %2240 = vmatmul.mubr.bf16.gmra.mxu0 %v809_v31  ;;  %2331 = vmatprep.subr.bf16.mxu1 %v2508_v0  ;;  %v1391_v31 = vor.u32 %v1390_v26, %v1387_v25 }
  0x83   :  { %2276 = vmatmul.mubr.bf16.gmra.mxu1 %v992_v35  ;;  %2296 = vmatpush3.bf16.msra.mxu0 %v2482_v32  ;;  %v1394_v32 = vshrl.u32 %v3043_v28, 16 }
  0x84   :  { %2243 = vmatprep.mubr.msk.bf16.mxu0 %vm2509_vm0, %v2508_v0  ;;  %2279 = vmatprep.mubr.msk.bf16.mxu1 %vm2509_vm0, %v2508_v0  ;;  %v1392_v35 = vsel %vm1357_vm5, %v1382_v20, %v1391_v31 }
  0x85   :  { %2297 = vmatprep.subr.bf16.mxu0 %v2508_v0  ;;  %2332 = vmatpush3.bf16.msra.mxu1 %v2484_v37  ;;  %v1396_v37 = vrot.slane %v1394_v32, 2 }
  0x86   :  { %2333 = vmatprep.subr.bf16.mxu1 %v2508_v0 }
  0x87   :  { %2298 = vmatpush3.bf16.msra.mxu0 %v2485_v39  ;;  %v3067_v39 = vld [vmem:[%s3222_s0 + $0x30] ss:$0 sps:$4 sm:$0x77]   ;;  %v1400_v42 = vor.u32 %v1399_v38, %v1396_v37 }
  0x88   :  { %2299 = vmatprep.subr.bf16.mxu0 %v2508_v0  ;;  %v1406_v44 = vshll.u32 %v3067_v39, 16 }
  0x89   :  { %2334 = vmatpush3.bf16.msra.mxu1 %v2486_v43  ;;  %v1403_v43 = vshrl.u32 %v3067_v39, 16  ;;  %v1401_v47 = vsel %vm1357_vm5, %v1391_v31, %v1400_v42 }
  0x8a   :  { %2244 = vmatmul.mubr.bf16.gmra.mxu0 %v818_v36  ;;  %2335 = vmatprep.subr.bf16.mxu1 %v2508_v0  ;;  %v1197_v36 = vsel %vm985_vm4, %v1194_v29, %v1196_v40  ;;  %v1408_v50 = vrot.slane %v1406_v44, 3 }
  0x8b   :  { %2280 = vmatmul.mubr.bf16.gmra.mxu1 %v994_v48  ;;  %2247 = vmatprep.mubr.msk.bf16.mxu0 %vm2509_vm0, %v2508_v0  ;;  %v2503_v48 = vld [vmem:[%s3221_s1 + $0x208] sm:$0xff]  }
  0x8c   :  { %2283 = vmatprep.mubr.msk.bf16.mxu1 %vm2509_vm0, %v2508_v0  ;;  %2300 = vmatpush3.bf16.msra.mxu0 %v2487_v49  ;;  %v1405_v49 = vrot.slane %v1403_v43, 2 }
  0x8d   :  { %2336 = vmatpush3.bf16.msra.mxu1 %v2489_v52  ;;  %2301 = vmatprep.subr.bf16.mxu0 %v2508_v0  ;;  %v1198_v52 = vrot.slane %v2504_v46, 2 }
  0x8e   :  { %2337 = vmatprep.subr.bf16.mxu1 %v2508_v0  ;;  %v1409_v53 = vor.u32 %v1408_v50, %v1405_v49 }
  0x8f   :  { %v1199_v56 = vsel %vm985_vm4, %v1196_v40, %v1198_v52 }
  0x90   :  { %2302 = vmatpush3.bf16.msra.mxu0 %v2490_v55  ;;  %v1547_v55 = vld [vmem:[%s3222_s0 + $0x8] sm:$0x8]  ;;  %v1410_v58 = vsel %vm1357_vm5, %v1400_v42, %v1409_v53 }
  0x91   :  { %2338 = vmatpush3.bf16.msra.mxu1 %v2491_v60  ;;  %2359 = vmatprep.subr.bf16.mxu0 %v2508_v0  ;;  %v1945_v57 = vcombine.low %v1547_v55, %v2963_v45  ;;  %v1570_v60 = vrot.slane %v2976_v51, 3  ;;  %v1576_v45 = vrot.slane %v3043_v28, 3  ;;  %v1578_v51 = vrot.slane %v3067_v39, 3 }
  0x92   :  { %2248 = vmatmul.mubr.bf16.gmra.mxu0 %v827_v61  ;;  %2395 = vmatprep.subr.bf16.mxu1 %v2508_v0  ;;  %v1574_v61 = vrot.slane %v3020_v17, 3 }
  0x93   :  { %2284 = vmatmul.mubr.bf16.gmra.mxu1 %v996_v62  ;;  %2303 = vmatprep.mubr.msk.bf16.mxu0 %vm2509_vm0, %v2508_v0  ;;  %v1569_v59 = vrot.slane %v1945_v57, 3  ;;  %v1573_v2 = vsel %vm1568_vm6, %v1570_v60, %v1572_v1  ;;  %v1579_v3 = vsel %vm1568_vm6, %v1576_v45, %v1578_v51 }
  0x94   :  { %2339 = vmatprep.mubr.msk.bf16.mxu1 %vm2509_vm0, %v2508_v0  ;;  %v1577_v63 = vsel %vm1568_vm6, %v1574_v61, %v1576_v45  ;;  %v1575_v5 = vsel %vm1568_vm6, %v1572_v1, %v1574_v61 }
  0x95   :  { %v1571_v62 = vsel %vm1568_vm6, %v1569_v59, %v1570_v60 }
  0x9a   :  { %2304 = vmatmul.mubr.bf16.vlgmr.msra.gmra.mxu0 %v1191_v12 }
  0x9b   :  { %2340 = vmatmul.mubr.bf16.vlgmr.msra.gmra.mxu1 %v1374_v13  ;;  %2360 = vmatpush3.bf16.msra.mxu0 %v2494_v10 }
  0x9c   :  { %2361 = vmatprep.subr.bf16.mxu0 %v2508_v0  ;;  %2307 = vmatprep.mubr.msk.bf16.mxu0 %vm2509_vm0, %v2508_v0 }
  0x9d   :  { %2343 = vmatprep.mubr.msk.bf16.mxu1 %vm2509_vm0, %v2508_v0  ;;  %2403 = vmatpush3.bf16.msra.mxu1 %v2494_v10 }
  0x9e   :  { %2396 = vmatprep.subr.bf16.mxu1 %v2508_v0 }
  0x9f   :  { %2362 = vmatpush3.bf16.msra.mxu0 %v2495_v18 }
  0xa0   :  { %2363 = vmatprep.subr.bf16.mxu0 %v2508_v0 }
  0xa1   :  { %2404 = vmatpush3.bf16.msra.mxu1 %v2495_v18 }
  0xa2   :  { %2308 = vmatmul.mubr.bf16.gmra.mxu0 %v1193_v19  ;;  %2397 = vmatprep.subr.bf16.mxu1 %v2508_v0 }
  0xa3   :  { %2344 = vmatmul.mubr.bf16.gmra.mxu1 %v1383_v24  ;;  %2364 = vmatpush3.bf16.msra.mxu0 %v2497_v23 }
  0xa4   :  { %2311 = vmatprep.mubr.msk.bf16.mxu0 %vm2509_vm0, %v2508_v0  ;;  %2347 = vmatprep.mubr.msk.bf16.mxu1 %vm2509_vm0, %v2508_v0 }
  0xa5   :  { %2365 = vmatprep.subr.bf16.mxu0 %v2508_v0  ;;  %2405 = vmatpush3.bf16.msra.mxu1 %v2497_v23 }
  0xa6   :  { %2398 = vmatprep.subr.bf16.mxu1 %v2508_v0 }
  0xa7   :  { %2366 = vmatpush3.bf16.msra.mxu0 %v2499_v30 }
  0xa8   :  { %2367 = vmatprep.subr.bf16.mxu0 %v2508_v0 }
  0xa9   :  { %2406 = vmatpush3.bf16.msra.mxu1 %v2499_v30 }
  0xaa   :  { %2312 = vmatmul.mubr.bf16.gmra.mxu0 %v1195_v34  ;;  %2399 = vmatprep.subr.bf16.mxu1 %v2508_v0 }
  0xab   :  { %2348 = vmatmul.mubr.bf16.gmra.mxu1 %v1392_v35  ;;  %2368 = vmatpush3.bf16.msra.mxu0 %v2500_v27 }
  0xac   :  { %2315 = vmatprep.mubr.msk.bf16.mxu0 %vm2509_vm0, %v2508_v0  ;;  %2351 = vmatprep.mubr.msk.bf16.mxu1 %vm2509_vm0, %v2508_v0 }
  0xad   :  { %2407 = vmatpush3.bf16.msra.mxu1 %v2500_v27  ;;  %2369 = vmatprep.subr.bf16.mxu0 %v2508_v0 }
  0xae   :  { %2400 = vmatprep.subr.bf16.mxu1 %v2508_v0 }
  0xaf   :  { %2370 = vmatpush3.bf16.msra.mxu0 %v2502_v41 }
  0xb0   :  { %2371 = vmatprep.subr.bf16.mxu0 %v2508_v0 }
  0xb1   :  { %2408 = vmatpush3.bf16.msra.mxu1 %v2502_v41 }
  0xb2   :  { %2316 = vmatmul.mubr.bf16.gmra.mxu0 %v1197_v36  ;;  %2401 = vmatprep.subr.bf16.mxu1 %v2508_v0 }
  0xb3   :  { %2352 = vmatmul.mubr.bf16.gmra.mxu1 %v1401_v47  ;;  %2319 = vmatprep.mubr.msk.bf16.mxu0 %vm2509_vm0, %v2508_v0 }
  0xb4   :  { %2355 = vmatprep.mubr.msk.bf16.mxu1 %vm2509_vm0, %v2508_v0  ;;  %2372 = vmatpush3.bf16.msra.mxu0 %v2503_v48 }
  0xb5   :  { %2409 = vmatpush3.bf16.msra.mxu1 %v2503_v48  ;;  %2373 = vmatprep.subr.bf16.mxu0 %v2508_v0 }
  0xb6   :  { %2402 = vmatprep.subr.bf16.mxu1 %v2508_v0 }
  0xb8   :  { %2374 = vmatpush3.bf16.msra.mxu0 %v2506_v54 }
  0xb9   :  { %2410 = vmatpush3.bf16.msra.mxu1 %v2506_v54 }
  0xba   :  { %2320 = vmatmul.mubr.bf16.gmra.mxu0 %v1199_v56 }
  0xbb   :  { %2356 = vmatmul.mubr.bf16.gmra.mxu1 %v1410_v58  ;;  %2375 = vmatprep.mubr.msk.bf16.mxu0 %vm2509_vm0, %v2508_v0 }
  0xbc   :  { %2387 = vmatprep.mubr.msk.bf16.mxu1 %vm2509_vm0, %v2508_v0 }
  0xc2   :  { %2376 = vmatmul.mubr.bf16.vlgmr.msra.gmra.mxu0 %v1571_v62 }
  0xc3   :  { %2388 = vmatmul.mubr.bf16.vlgmr.msra.gmra.mxu1 %v1577_v63  ;;  %2379 = vmatprep.mubr.msk.bf16.mxu0 %vm2509_vm0, %v2508_v0 }
  0xc4   :  { %2391 = vmatprep.mubr.msk.bf16.mxu1 %vm2509_vm0, %v2508_v0 }
  0xca   :  { %2380 = vmatmul.mubr.bf16.gmra.mxu0 %v1573_v2 }
  0xcb   :  { %2392 = vmatmul.mubr.bf16.gmra.mxu1 %v1579_v3  ;;  %2383 = vmatprep.mubr.msk.bf16.mxu0 %vm2509_vm0, %v2508_v0 }
  0xd2   :  { %2384 = vmatmul.mubr.bf16.gmra.mxu0 %v1575_v5 }
  0xe2   :  { %v216_v6 = vpop.f32.mrf.mxu0  ;;  %v342_v7 = vpop.f32.mrf.mxu1 }
  0xe3   :  { %v343_v4 = vadd.f32 %v342_v7, %v216_v6 }
  0xe4   :  { %v2089_v8 = vpop.f32.mrf.mxu0  ;;  %v2125_v9 = vpop.f32.mrf.mxu1 }
  0xe6   :  { %v219_v11 = vpop.f32.mrf.mxu0  ;;  %v345_v12 = vpop.f32.mrf.mxu1 }
  0xe7   :  { %v346_v10 = vadd.f32 %v345_v12, %v219_v11 }
  0xe8   :  { %v2090_v13 = vpop.f32.mrf.mxu0  ;;  %v2126_v14 = vpop.f32.mrf.mxu1 }
  0xea   :  { %v224_v16 = vpop.f32.mrf.mxu0 }
  0xeb   :  { %v350_v17 = vpop.f32.mrf.mxu1 }
  0xec   :  { %v351_v18 = vadd.f32 %v350_v17, %v224_v16  ;;  %v2093_v15 = vpop.f32.mrf.mxu0 }
  0xed   :  { %v2129_v20 = vpop.f32.mrf.mxu1 }
  0xee   :  { %v227_v21 = vpop.f32.mrf.mxu0 }
  0xef   :  { %v353_v0 = vpop.f32.mrf.mxu1 }
  0xf0   :  { %v354_v22 = vadd.f32 %v353_v0, %v227_v21  ;;  %v2094_v19 = vpop.f32.mrf.mxu0 }
  0xf1   :  { %v2130_v23 = vpop.f32.mrf.mxu1 }
  0xf2   :  { %v232_v24 = vpop.f32.mrf.mxu0 }
  0xf3   :  { %v358_v25 = vpop.f32.mrf.mxu1 }
  0xf4   :  { %v359_v26 = vadd.f32 %v358_v25, %v232_v24  ;;  %v2097_v28 = vpop.f32.mrf.mxu0 }
  0xf5   :  { %v2133_v29 = vpop.f32.mrf.mxu1 }
  0xf6   :  { %v235_v30 = vpop.f32.mrf.mxu0 }
  0xf7   :  { %v361_v31 = vpop.f32.mrf.mxu1 }
  0xf8   :  { %v362_v32 = vadd.f32 %v361_v31, %v235_v30  ;;  %v2098_v33 = vpop.f32.mrf.mxu0 }
  0xf9   :  { %v2134_v34 = vpop.f32.mrf.mxu1 }
  0xfa   :  { %v240_v27 = vpop.f32.mrf.mxu0 }
  0xfb   :  { %v366_v35 = vpop.f32.mrf.mxu1 }
  0xfc   :  { %v367_v37 = vadd.f32 %v366_v35, %v240_v27  ;;  %v2101_v38 = vpop.f32.mrf.mxu0 }
  0xfd   :  { %v2137_v39 = vpop.f32.mrf.mxu1 }
  0xfe   :  { %v243_v40 = vpop.f32.mrf.mxu0 }
  0xff   :  { %v369_v41 = vpop.f32.mrf.mxu1 }
 0x100   :  { %v370_v42 = vadd.f32 %v369_v41, %v243_v40  ;;  %v2102_v43 = vpop.f32.mrf.mxu0 }
 0x101   :  { %v2138_v44 = vpop.f32.mrf.mxu1 }
 0x102   :  { %v248_v36 = vpop.f32.mrf.mxu0 }
 0x103   :  { %v374_v46 = vpop.f32.mrf.mxu1 }
 0x104   :  { %v375_v47 = vadd.f32 %v374_v46, %v248_v36  ;;  %v2105_v48 = vpop.f32.mrf.mxu0 }
 0x105   :  { %v2141_v49 = vpop.f32.mrf.mxu1 }
 0x106   :  { %v251_v50 = vpop.f32.mrf.mxu0 }
 0x107   :  { %v377_v52 = vpop.f32.mrf.mxu1 }
 0x108   :  { %v378_v53 = vadd.f32 %v377_v52, %v251_v50  ;;  %v2106_v54 = vpop.f32.mrf.mxu0 }
 0x109   :  { %v2142_v55 = vpop.f32.mrf.mxu1 }
 0x10a   :  { %v501_v56 = vpop.f32.mrf.mxu0 }
 0x10b   :  { %v540_v57 = vadd.f32 %v501_v56, %v343_v4  ;;  %v704_v58 = vpop.f32.mrf.mxu1 }
 0x10c   :  { %v2161_v59 = vpop.f32.mrf.mxu0 }
 0x10d   :  { %v743_v60 = vadd.f32 %v704_v58, %v540_v57  ;;  %v2197_v61 = vpop.f32.mrf.mxu1 }
 0x10e   :  { %v504_v45 = vpop.f32.mrf.mxu0 }
 0x10f   :  { %v541_v62 = vadd.f32 %v504_v45, %v346_v10  ;;  %v707_v63 = vpop.f32.mrf.mxu1 }
 0x110   :  { %v2162_v1 = vpop.f32.mrf.mxu0 }
 0x111   :  { %v744_v51 = vadd.f32 %v707_v63, %v541_v62  ;;  %v2198_v2 = vpop.f32.mrf.mxu1 }
 0x112   :  { %v509_v3 = vpop.f32.mrf.mxu0 }
 0x113   :  { %v542_v5 = vadd.f32 %v509_v3, %v351_v18  ;;  %v712_v6 = vpop.f32.mrf.mxu1 }
 0x114   :  { %v2165_v7 = vpop.f32.mrf.mxu0 }
 0x115   :  { %v745_v8 = vadd.f32 %v712_v6, %v542_v5  ;;  %v2201_v9 = vpop.f32.mrf.mxu1 }
 0x116   :  { %v512_v11 = vpop.f32.mrf.mxu0 }
 0x117   :  { %v543_v12 = vadd.f32 %v512_v11, %v354_v22  ;;  %v715_v13 = vpop.f32.mrf.mxu1 }
 0x118   :  { %v2166_v4 = vpop.f32.mrf.mxu0 }
 0x119   :  { %v746_v14 = vadd.f32 %v715_v13, %v543_v12  ;;  %v2202_v16 = vpop.f32.mrf.mxu1 }
 0x11a   :  { %v517_v17 = vpop.f32.mrf.mxu0 }
 0x11b   :  { %v544_v15 = vadd.f32 %v517_v17, %v359_v26  ;;  %v720_v20 = vpop.f32.mrf.mxu1 }
 0x11c   :  { %v2169_v10 = vpop.f32.mrf.mxu0 }
 0x11d   :  { %v747_v21 = vadd.f32 %v720_v20, %v544_v15  ;;  %v2205_v0 = vpop.f32.mrf.mxu1 }
 0x11e   :  { %v520_v19 = vpop.f32.mrf.mxu0 }
 0x11f   :  { %v545_v23 = vadd.f32 %v520_v19, %v362_v32  ;;  %v723_v24 = vpop.f32.mrf.mxu1 }
 0x120   :  { %v2170_v18 = vpop.f32.mrf.mxu0 }
 0x121   :  { %v748_v25 = vadd.f32 %v723_v24, %v545_v23  ;;  %v2206_v28 = vpop.f32.mrf.mxu1 }
 0x122   :  { %v525_v29 = vpop.f32.mrf.mxu0 }
 0x123   :  { %v546_v30 = vadd.f32 %v525_v29, %v367_v37  ;;  %v728_v31 = vpop.f32.mrf.mxu1 }
 0x124   :  { %v2173_v22 = vpop.f32.mrf.mxu0 }
 0x125   :  { %v3127_v33 = vadd.f32 %v728_v31, %v546_v30  ;;  %v2209_v34 = vpop.f32.mrf.mxu1 }
 0x126   :  { %v528_v27 = vpop.f32.mrf.mxu0 }
 0x127   :  { %v547_v35 = vadd.f32 %v528_v27, %v370_v42  ;;  %v731_v26 = vpop.f32.mrf.mxu1 }
 0x128   :  { %v2174_v38 = vpop.f32.mrf.mxu0 }
 0x129   :  { %v3129_v39 = vadd.f32 %v731_v26, %v547_v35  ;;  %v2210_v40 = vpop.f32.mrf.mxu1 }
 0x12a   :  { %v533_v41 = vpop.f32.mrf.mxu0 }
 0x12b   :  { %v548_v32 = vadd.f32 %v533_v41, %v375_v47  ;;  %v736_v43 = vpop.f32.mrf.mxu1 }
 0x12c   :  { %v2177_v44 = vpop.f32.mrf.mxu0 }
 0x12d   :  { %v3131_v36 = vadd.f32 %v736_v43, %v548_v32  ;;  %v2213_v46 = vpop.f32.mrf.mxu1 }
 0x12e   :  { %v536_v37 = vpop.f32.mrf.mxu0 }
 0x12f   :  { %v549_v48 = vadd.f32 %v536_v37, %v378_v53  ;;  %v739_v49 = vpop.f32.mrf.mxu1 }
 0x130   :  { %v2178_v50 = vpop.f32.mrf.mxu0 }
 0x131   :  { %v3133_v52 = vadd.f32 %v739_v49, %v549_v48  ;;  %v2214_v54 = vpop.f32.mrf.mxu1 }
 0x132   :  { %v915_v42 = vpop.f32.mrf.mxu0 }
 0x133   :  { %v954_v55 = vadd.f32 %v915_v42, %v743_v60  ;;  %v1084_v56 = vpop.f32.mrf.mxu1 }
 0x134   :  { %v2233_v57 = vpop.f32.mrf.mxu0 }
 0x135   :  { %v3135_v58 = vadd.f32 %v1084_v56, %v954_v55  ;;  %v2269_v59 = vpop.f32.mrf.mxu1 }
 0x136   :  { %v918_v47 = vpop.f32.mrf.mxu0 }
 0x137   :  { %v955_v61 = vadd.f32 %v918_v47, %v744_v51  ;;  %v1087_v45 = vpop.f32.mrf.mxu1 }
 0x138   :  { %v2234_v62 = vpop.f32.mrf.mxu0 }
 0x139   :  { %v3137_v63 = vadd.f32 %v1087_v45, %v955_v61  ;;  %v2270_v1 = vpop.f32.mrf.mxu1 }
 0x13a   :  { %v923_v53 = vpop.f32.mrf.mxu0 }
 0x13b   :  { %v956_v2 = vadd.f32 %v923_v53, %v745_v8  ;;  %v1092_v3 = vpop.f32.mrf.mxu1 }
 0x13c   :  { %v2237_v5 = vpop.f32.mrf.mxu0 }
 0x13d   :  { %v3139_v6 = vadd.f32 %v1092_v3, %v956_v2  ;;  %v2273_v7 = vpop.f32.mrf.mxu1 }
 0x13e   :  { %v926_v60 = vpop.f32.mrf.mxu0 }
 0x13f   :  { %v957_v9 = vadd.f32 %v926_v60, %v746_v14  ;;  %v1095_v11 = vpop.f32.mrf.mxu1 }
 0x140   :  { %v2238_v12 = vpop.f32.mrf.mxu0 }
 0x141   :  { %v3141_v13 = vadd.f32 %v1095_v11, %v957_v9  ;;  %v2274_v4 = vpop.f32.mrf.mxu1 }
 0x142   :  { %v931_v51 = vpop.f32.mrf.mxu0 }
 0x143   :  { %v958_v16 = vadd.f32 %v931_v51, %v747_v21  ;;  %v1100_v17 = vpop.f32.mrf.mxu1 }
 0x144   :  { %v2241_v15 = vpop.f32.mrf.mxu0 }
 0x145   :  { %v3143_v20 = vadd.f32 %v1100_v17, %v958_v16  ;;  %v2277_v10 = vpop.f32.mrf.mxu1 }
 0x146   :  { %v934_v8 = vpop.f32.mrf.mxu0 }
 0x147   :  { %v959_v0 = vadd.f32 %v934_v8, %v748_v25  ;;  %v1103_v19 = vpop.f32.mrf.mxu1 }
 0x148   :  { %v2242_v23 = vpop.f32.mrf.mxu0 }
 0x149   :  { %v3145_v24 = vadd.f32 %v1103_v19, %v959_v0  ;;  %v2278_v18 = vpop.f32.mrf.mxu1 }
 0x14a   :  { %v939_v14 = vpop.f32.mrf.mxu0 }
 0x14b   :  { %v1108_v28 = vpop.f32.mrf.mxu1  ;;  %v960_v17 = vadd.f32 %v939_v14, %v3127_v33 }
 0x14c   :  { %v2245_v29 = vpop.f32.mrf.mxu0 }
 0x14d   :  { %v2281_v30 = vpop.f32.mrf.mxu1  ;;  %v1129_v19 = vadd.f32 %v1108_v28, %v960_v17 }
 0x14e   :  { %v942_v31 = vpop.f32.mrf.mxu0 }
 0x14f   :  { %v1111_v22 = vpop.f32.mrf.mxu1  ;;  %v961_v23 = vadd.f32 %v942_v31, %v3129_v39 }
 0x150   :  { %v2246_v34 = vpop.f32.mrf.mxu0 }
 0x151   :  { %v2282_v21 = vpop.f32.mrf.mxu1 }
 0x152   :  { %v947_v27 = vpop.f32.mrf.mxu0 }
 0x153   :  { %v3147_v35 = vpop.f32.mrf.mxu1 }
 0x154   :  { %v2249_v26 = vpop.f32.mrf.mxu0 }
 0x155   :  { %v2285_v38 = vpop.f32.mrf.mxu1 }
 0x156   :  { %v950_v40 = vpop.f32.mrf.mxu0  ;;  %v1130_v38 = vadd.f32 %v1111_v22, %v961_v23 }
 0x157   :  { %v3149_v25 = vpop.f32.mrf.mxu1 }
 0x158   :  { %v2250_v41 = vpop.f32.mrf.mxu0 }
 0x159   :  { %v2286_v32 = vpop.f32.mrf.mxu1  ;;  %v962_v41 = vadd.f32 %v947_v27, %v3131_v36 }
 0x15a   :  { %v1287_v43 = vpop.f32.mrf.mxu0 }
 0x15b   :  { %v1498_v44 = vpop.f32.mrf.mxu1  ;;  %v1326_v29 = vadd.f32 %v1287_v43, %v3135_v58  ;;  %v1131_v58 = vadd.f32 %v3147_v35, %v962_v41  ;;  %v963_v43 = vadd.f32 %v950_v40, %v3133_v52 }
 0x15c   :  { %v2305_v46 = vpop.f32.mrf.mxu0 }
 0x15d   :  { %v2341_v37 = vpop.f32.mrf.mxu1  ;;  %v1537_v46 = vadd.f32 %v1498_v44, %v1326_v29 }
 0x15e   :  { %v1290_v48 = vpop.f32.mrf.mxu0 }
 0x15f   :  { %v1501_v49 = vpop.f32.mrf.mxu1  ;;  %v1327_v33 = vadd.f32 %v1290_v48, %v3137_v63  ;;  %v1132_v48 = vadd.f32 %v3149_v25, %v963_v43 }
 0x160   :  { %v2306_v50 = vpop.f32.mrf.mxu0 }
 0x161   :  { %v2342_v54 = vpop.f32.mrf.mxu1  ;;  %v1538_v22 = vadd.f32 %v1501_v49, %v1327_v33 }
 0x162   :  { %v1295_v42 = vpop.f32.mrf.mxu0 }
 0x163   :  { %v3151_v55 = vpop.f32.mrf.mxu1  ;;  %v1328_v36 = vadd.f32 %v1295_v42, %v3139_v6 }
 0x164   :  { %v2309_v56 = vpop.f32.mrf.mxu0 }
 0x165   :  { %v2345_v57 = vpop.f32.mrf.mxu1  ;;  %v1539_v42 = vadd.f32 %v3151_v55, %v1328_v36 }
 0x166   :  { %v1298_v59 = vpop.f32.mrf.mxu0 }
 0x167   :  { %v3153_v47 = vpop.f32.mrf.mxu1  ;;  %v1329_v57 = vadd.f32 %v1298_v59, %v3141_v13 }
 0x168   :  { %v2310_v61 = vpop.f32.mrf.mxu0 }
 0x169   :  { %v2346_v45 = vpop.f32.mrf.mxu1  ;;  %v1540_v13 = vadd.f32 %v3153_v47, %v1329_v57 }
 0x16a   :  { %v3155_v62 = vpop.f32.mrf.mxu0 }
 0x16b   :  { %v3157_v1 = vpop.f32.mrf.mxu1  ;;  %v1330_v59 = vadd.f32 %v3155_v62, %v3143_v20 }
 0x16c   :  { %v2313_v53 = vpop.f32.mrf.mxu0 }
 0x16d   :  { %v2349_v2 = vpop.f32.mrf.mxu1  ;;  %v1541_v17 = vadd.f32 %v3157_v1, %v1330_v59 }
 0x16e   :  { %v3159_v3 = vpop.f32.mrf.mxu0 }
 0x16f   :  { %v3161_v5 = vpop.f32.mrf.mxu1  ;;  %v1331_v20 = vadd.f32 %v3159_v3, %v3145_v24 }
 0x170   :  { %v2314_v7 = vpop.f32.mrf.mxu0 }
 0x171   :  { %v2350_v60 = vpop.f32.mrf.mxu1 }
 0x172   :  { %v1311_v9 = vpop.f32.mrf.mxu0 }
 0x173   :  { %v1522_v11 = vpop.f32.mrf.mxu1  ;;  %v1332_v34 = vadd.f32 %v1311_v9, %v1129_v19 }
 0x174   :  { %v2317_v12 = vpop.f32.mrf.mxu0 }
 0x175   :  { %v2353_v4 = vpop.f32.mrf.mxu1  ;;  %v1543_v37 = vadd.f32 %v1522_v11, %v1332_v34 }
 0x176   :  { %v1314_v51 = vpop.f32.mrf.mxu0 }
 0x177   :  { %v1525_v16 = vpop.f32.mrf.mxu1  ;;  %v1333_v50 = vadd.f32 %v1314_v51, %v1130_v38 }
 0x178   :  { %v2318_v15 = vpop.f32.mrf.mxu0 }
 0x179   :  { %v2354_v10 = vpop.f32.mrf.mxu1  ;;  %v1544_v27 = vadd.f32 %v1525_v16, %v1333_v50 }
 0x17a   :  { %v1319_v8 = vpop.f32.mrf.mxu0 }
 0x17b   :  { %v1530_v0 = vpop.f32.mrf.mxu1  ;;  %v1334_v44 = vadd.f32 %v1319_v8, %v1131_v58 }
 0x17c   :  { %v2321_v18 = vpop.f32.mrf.mxu0 }
 0x17d   :  { %v2357_v30 = vpop.f32.mrf.mxu1  ;;  %v1545_v45 = vadd.f32 %v1530_v0, %v1334_v44  ;;  %v1542_v0 = vadd.f32 %v3161_v5, %v1331_v20 }
 0x17e   :  { %v1322_v21 = vpop.f32.mrf.mxu0 }
 0x17f   :  { %v1533_v26 = vpop.f32.mrf.mxu1  ;;  %v1335_v53 = vadd.f32 %v1322_v21, %v1132_v48 }
 0x180   :  { %v2322_v32 = vpop.f32.mrf.mxu0 }
 0x181   :  { %v2358_v14 = vpop.f32.mrf.mxu1  ;;  %v1546_v11 = vadd.f32 %v1533_v26, %v1335_v53 }
 0x182   :  { %v1667_v28 = vpop.f32.mrf.mxu0 }
 0x183   :  { %v1706_v39 = vadd.f32 %v1667_v28, %v1537_v46  ;;  %v1691_v31 = vpop.f32.mrf.mxu1 }
 0x184   :  { %v1712_v54 = vadd.f32 %v1691_v31, %v1543_v37  ;;  %v2377_v56 = vpop.f32.mrf.mxu0 }
 0x185   :  { %1717 = vst.msk [vmem:[%s3223_s2] sm:$0xff] %vm1716_vm7, %v1706_v39  ;;  %v2389_v63 = vpop.f32.mrf.mxu1 }
 0x186   :  { %1723 = vst.msk [vmem:[%s3223_s2 + $0x30] sm:$0xff] %vm1716_vm7, %v1712_v54  ;;  %v1670_v35 = vpop.f32.mrf.mxu0 }
 0x187   :  { %v1707_v52 = vadd.f32 %v1670_v35, %v1538_v22  ;;  %v1694_v40 = vpop.f32.mrf.mxu1 }
 0x188   :  { %v1713_v49 = vadd.f32 %v1694_v40, %v1544_v27  ;;  %v2378_v6 = vpop.f32.mrf.mxu0 }
 0x189   :  { %1718 = vst.msk [vmem:[%s3223_s2 + $0x8] sm:$0xff] %vm1716_vm7, %v1707_v52  ;;  %v2390_v61 = vpop.f32.mrf.mxu1 }
 0x18a   :  { %1724 = vst.msk [vmem:[%s3223_s2 + $0x38] sm:$0xff] %vm1716_vm7, %v1713_v49  ;;  %v1675_v25 = vpop.f32.mrf.mxu0 }
 0x18b   :  { %v1708_v2 = vadd.f32 %v1675_v25, %v1539_v42  ;;  %v1699_v7 = vpop.f32.mrf.mxu1 }
 0x18c   :  { %v1714_v60 = vadd.f32 %v1699_v7, %v1545_v45  ;;  %v2381_v55 = vpop.f32.mrf.mxu0 }
 0x18d   :  { %1719 = vst.msk [vmem:[%s3223_s2 + $0x10] sm:$0xff] %vm1716_vm7, %v1708_v2  ;;  %v2393_v9 = vpop.f32.mrf.mxu1 }
 0x18e   :  { %1725 = vst.msk [vmem:[%s3223_s2 + $0x40] sm:$0xff] %vm1716_vm7, %v1714_v60  ;;  %v1678_v12 = vpop.f32.mrf.mxu0 }
 0x18f   :  { %v1709_v4 = vadd.f32 %v1678_v12, %v1540_v13  ;;  %v1702_v51 = vpop.f32.mrf.mxu1 }
 0x190   :  { %v1715_v16 = vadd.f32 %v1702_v51, %v1546_v11  ;;  %v2382_v47 = vpop.f32.mrf.mxu0 }
 0x191   :  { %1720 = vst.msk [vmem:[%s3223_s2 + $0x18] sm:$0xff] %vm1716_vm7, %v1709_v4  ;;  %v2394_v62 = vpop.f32.mrf.mxu1 }
 0x192   :  { %1726 = vst.msk [vmem:[%s3223_s2 + $0x48] sm:$0xff] %vm1716_vm7, %v1715_v16  ;;  %v1683_v15 = vpop.f32.mrf.mxu0 }
 0x193   :  { %v1710_v10 = vadd.f32 %v1683_v15, %v1541_v17 }
 0x194   :  { %v2385_v8 = vpop.f32.mrf.mxu0 }
 0x195   :  { %1721 = vst.msk [vmem:[%s3223_s2 + $0x20] sm:$0xff] %vm1716_vm7, %v1710_v10 }
 0x196   :  { %v1686_v24 = vpop.f32.mrf.mxu0 }
 0x197   :  { %v1711_v1 = vadd.f32 %v1686_v24, %v1542_v0 }
 0x198   :  { %v2386_v3 = vpop.f32.mrf.mxu0 }
 0x199   :  { %1722 = vst.msk [vmem:[%s3223_s2 + $0x28] sm:$0xff] %vm1716_vm7, %v1711_v1 }

// kernel: a_call__.14
= control target key start
LH: loop header
LB: loop body
LE: loop exit
PB: predicated region body
PF: predicated region fallthrough
CT: control target
= control target key end

     0   :  { %s871_s9 = smov 0   ;;  %s873_s10 = smov 0   ;;  %s984_s0 = inlined_call_operand.vmem [shape: bf16[512,128], index: 0, kind: input, shape index: {}]   ;;  %s985_s1 = inlined_call_operand.vmem [shape: bf16[128,128], index: 1, kind: input, shape index: {}]   ;;  %s986_s2 = inlined_call_operand.vmem [shape: f32[512,128], index: 2, kind: output, shape index: {}]  }
   0x1   :  { %s875_s11 = smov 0  }
   0x2 LB: > { %s24_s12 = sadd.s32 1, %s850_s10  ;;  %p665_p0 = scmp.ge.s32.totalorder %s854_s11, 1  ;;  %s854_s11 = sphi %s875_s11, %s12_s11   ;;  %s850_s10 = sphi %s873_s10, %s988_s10   ;;  %s846_s9 = sphi %s871_s9, %s987_s9  }
   0x3   : > { %p26_p1 = scmp.ge.s32.totalorder %s24_s12, 2  ;;  %p136_p2 = scmp.lt.s32.totalorder %s854_s11, 3 }
   0x5   : > { %s990_s12 = smov (%p26_p1, %s24_s12), 0  ;;  %p137_p3 = pnand %p665_p0, %p136_p2 }
   0x6   : > { %s666_s15 = sshll.u32 (!%p137_p3), %s846_s9, 5 }
   0x7   : > { %140 = sbr.rel (%p137_p3) target bundleno = 269 (0x10d), region = 28  ;;  %p166_p4 = scmp.lt.s32.totalorder (!%p137_p3), %s666_s15, 63 }
   0xc   : > { %v808_v0 = vld [vmem:[%s985_s1 + $0x38] sm:$0xff]   ;;  %v809_v1 = vld [vmem:[%s985_s1 + $0x30] sm:$0xff]   ;;  %s992_s15 = smov (!%p166_p4, %s666_s15), 63  ;;  %v810_v2 = vld [vmem:[%s985_s1 + $0x28] sm:$0xff]  }
   0xd   : > { %720 = vmatprep.subr.bf16.mxu0 %v808_v0  ;;  %768 = vmatprep.subr.bf16.mxu1 %v808_v0  ;;  %s667_s20 = sshll.u32 %s992_s15, 2  ;;  %v811_v3 = vld [vmem:[%s985_s1 + $0x20] sm:$0xff]   ;;  %v812_v6 = vld [vmem:[%s985_s1 + $0x18] sm:$0xff]   ;;  %v813_v7 = vld [vmem:[%s985_s1 + $0x10] sm:$0xff]   ;;  %s669_s6 = sshll.u32 %s992_s15, 3 }
   0xe   : > { %721 = vmatpush3.bf16.msra.mxu0 %v808_v0  ;;  %776 = vmatpush3.bf16.msra.mxu1 %v808_v0  ;;  %s904_s23 = scalar_lea.vmem %s984_s0, %s667_s20  ;;  %v814_v8 = vld [vmem:[%s985_s1 + $0x8] sm:$0xff]   ;;  %v815_v9 = vld [vmem:[%s985_s1] sm:$0xff]   ;;  %s941_s9 = scalar_lea.vmem %s986_s2, %s669_s6 }
   0xf   : > { %722 = vmatprep.subr.bf16.mxu0 %v809_v1  ;;  %769 = vmatprep.subr.bf16.mxu1 %v809_v1  ;;  %v816_v4 = vld [vmem:[%s904_s23] sm:$0xff]   ;;  %v818_v10 = vld [vmem:[%s904_s23 + $0x8] sm:$0xff]   ;;  %v820_v12 = vld [vmem:[%s904_s23 + $0x10] sm:$0xff]  }
  0x10   : > { %v817_v5 = vld [vmem:[%s904_s23 + $0x40] sm:$0xff]   ;;  %736 = vmatprep.mubr.bf16.mxu0 %v816_v4  ;;  %v819_v11 = vld [vmem:[%s904_s23 + $0x48] sm:$0xff]   ;;  %v821_v13 = vld [vmem:[%s904_s23 + $0x50] sm:$0xff]  }
  0x11   : > { %752 = vmatprep.mubr.bf16.mxu1 %v817_v5  ;;  %v822_v14 = vld [vmem:[%s904_s23 + $0x18] sm:$0xff]   ;;  %v824_v16 = vld [vmem:[%s904_s23 + $0x20] sm:$0xff]   ;;  %v826_v18 = vld [vmem:[%s904_s23 + $0x28] sm:$0xff]  }
  0x12   : > { %723 = vmatpush3.bf16.msra.mxu0 %v809_v1  ;;  %777 = vmatpush3.bf16.msra.mxu1 %v809_v1  ;;  %v823_v15 = vld [vmem:[%s904_s23 + $0x58] sm:$0xff]   ;;  %v825_v17 = vld [vmem:[%s904_s23 + $0x60] sm:$0xff]   ;;  %v827_v19 = vld [vmem:[%s904_s23 + $0x68] sm:$0xff]  }
  0x13   : > { %724 = vmatprep.subr.bf16.mxu0 %v810_v2  ;;  %770 = vmatprep.subr.bf16.mxu1 %v810_v2  ;;  %v828_v20 = vld [vmem:[%s904_s23 + $0x30] sm:$0xff]   ;;  %v830_v22 = vld [vmem:[%s904_s23 + $0x38] sm:$0xff]  }
  0x14   : > { %v829_v21 = vld [vmem:[%s904_s23 + $0x70] sm:$0xff]   ;;  %v831_v23 = vld [vmem:[%s904_s23 + $0x78] sm:$0xff]  }
  0x16   : > { %725 = vmatpush3.bf16.msra.mxu0 %v810_v2  ;;  %778 = vmatpush3.bf16.msra.mxu1 %v810_v2 }
  0x17   : > { %726 = vmatprep.subr.bf16.mxu0 %v811_v3  ;;  %771 = vmatprep.subr.bf16.mxu1 %v811_v3 }
  0x1a   : > { %727 = vmatpush3.bf16.msra.mxu0 %v811_v3  ;;  %779 = vmatpush3.bf16.msra.mxu1 %v811_v3 }
  0x1b   : > { %728 = vmatprep.subr.bf16.mxu0 %v812_v6  ;;  %772 = vmatprep.subr.bf16.mxu1 %v812_v6 }
  0x1e   : > { %729 = vmatpush3.bf16.msra.mxu0 %v812_v6  ;;  %780 = vmatpush3.bf16.msra.mxu1 %v812_v6 }
  0x1f   : > { %730 = vmatprep.subr.bf16.mxu0 %v813_v7  ;;  %773 = vmatprep.subr.bf16.mxu1 %v813_v7 }
  0x22   : > { %731 = vmatpush3.bf16.msra.mxu0 %v813_v7  ;;  %781 = vmatpush3.bf16.msra.mxu1 %v813_v7 }
  0x23   : > { %732 = vmatprep.subr.bf16.mxu0 %v814_v8  ;;  %774 = vmatprep.subr.bf16.mxu1 %v814_v8 }
  0x26   : > { %733 = vmatpush3.bf16.msra.mxu0 %v814_v8  ;;  %782 = vmatpush3.bf16.msra.mxu1 %v814_v8 }
  0x27   : > { %734 = vmatprep.subr.bf16.mxu0 %v815_v9  ;;  %775 = vmatprep.subr.bf16.mxu1 %v815_v9 }
  0x2a   : > { %735 = vmatpush3.bf16.msra.mxu0 %v815_v9  ;;  %783 = vmatpush3.bf16.msra.mxu1 %v815_v9 }
  0x2d   : > { %737 = vmatmul.mubr.bf16.vlgmr.msra.gmra.mxu0 %v818_v10  ;;  %753 = vmatmul.mubr.bf16.vlgmr.msra.gmra.mxu1 %v819_v11 }
  0x2e   : > { %740 = vmatprep.mubr.bf16.mxu0 %v820_v12  ;;  %756 = vmatprep.mubr.bf16.mxu1 %v821_v13 }
  0x35   : > { %741 = vmatmul.mubr.bf16.gmra.mxu0 %v822_v14  ;;  %757 = vmatmul.mubr.bf16.gmra.mxu1 %v823_v15 }
  0x36   : > { %744 = vmatprep.mubr.bf16.mxu0 %v824_v16  ;;  %760 = vmatprep.mubr.bf16.mxu1 %v825_v17 }
  0x3d   : > { %745 = vmatmul.mubr.bf16.gmra.mxu0 %v826_v18  ;;  %761 = vmatmul.mubr.bf16.gmra.mxu1 %v827_v19 }
  0x3e   : > { %748 = vmatprep.mubr.bf16.mxu0 %v828_v20  ;;  %764 = vmatprep.mubr.bf16.mxu1 %v829_v21 }
  0x45   : > { %749 = vmatmul.mubr.bf16.gmra.mxu0 %v830_v22  ;;  %765 = vmatmul.mubr.bf16.gmra.mxu1 %v831_v23 }
  0xed   : > { %v738_v24 = vpop.f32.mrf.mxu0  ;;  %v754_v25 = vpop.f32.mrf.mxu1 }
  0xee   : > { %540 = vst [vmem:[%s941_s9 + $0x10] sm:$0xff] %v738_v24  ;;  %556 = vst [vmem:[%s941_s9 + $0x90] sm:$0xff] %v754_v25 }
  0xef   : > { %v411_v26 = vpop.f32.mrf.mxu0  ;;  %v475_v27 = vpop.f32.mrf.mxu1 }
  0xf0   : > { %538 = vst [vmem:[%s941_s9] sm:$0xff] %v411_v26  ;;  %554 = vst [vmem:[%s941_s9 + $0x80] sm:$0xff] %v475_v27 }
  0xf1   : > { %v739_v28 = vpop.f32.mrf.mxu0  ;;  %v755_v29 = vpop.f32.mrf.mxu1 }
  0xf2   : > { %541 = vst [vmem:[%s941_s9 + $0x18] sm:$0xff] %v739_v28  ;;  %557 = vst [vmem:[%s941_s9 + $0x98] sm:$0xff] %v755_v29 }
  0xf3   : > { %v414_v30 = vpop.f32.mrf.mxu0  ;;  %v478_v31 = vpop.f32.mrf.mxu1 }
  0xf4   : > { %539 = vst [vmem:[%s941_s9 + $0x8] sm:$0xff] %v414_v30  ;;  %555 = vst [vmem:[%s941_s9 + $0x88] sm:$0xff] %v478_v31 }
  0xf5   : > { %v742_v32 = vpop.f32.mrf.mxu0  ;;  %v758_v33 = vpop.f32.mrf.mxu1 }
  0xf6   : > { %544 = vst [vmem:[%s941_s9 + $0x30] sm:$0xff] %v742_v32  ;;  %560 = vst [vmem:[%s941_s9 + $0xb0] sm:$0xff] %v758_v33 }
  0xf7   : > { %v427_v34 = vpop.f32.mrf.mxu0  ;;  %v491_v35 = vpop.f32.mrf.mxu1 }
  0xf8   : > { %542 = vst [vmem:[%s941_s9 + $0x20] sm:$0xff] %v427_v34  ;;  %558 = vst [vmem:[%s941_s9 + $0xa0] sm:$0xff] %v491_v35 }
  0xf9   : > { %v743_v36 = vpop.f32.mrf.mxu0  ;;  %v759_v37 = vpop.f32.mrf.mxu1 }
  0xfa   : > { %545 = vst [vmem:[%s941_s9 + $0x38] sm:$0xff] %v743_v36  ;;  %561 = vst [vmem:[%s941_s9 + $0xb8] sm:$0xff] %v759_v37 }
  0xfb   : > { %v430_v38 = vpop.f32.mrf.mxu0  ;;  %v494_v39 = vpop.f32.mrf.mxu1 }
  0xfc   : > { %543 = vst [vmem:[%s941_s9 + $0x28] sm:$0xff] %v430_v38  ;;  %559 = vst [vmem:[%s941_s9 + $0xa8] sm:$0xff] %v494_v39 }
  0xfd   : > { %v746_v40 = vpop.f32.mrf.mxu0  ;;  %v762_v41 = vpop.f32.mrf.mxu1 }
  0xfe   : > { %548 = vst [vmem:[%s941_s9 + $0x50] sm:$0xff] %v746_v40  ;;  %564 = vst [vmem:[%s941_s9 + $0xd0] sm:$0xff] %v762_v41 }
  0xff   : > { %v443_v42 = vpop.f32.mrf.mxu0  ;;  %v507_v43 = vpop.f32.mrf.mxu1 }
 0x100   : > { %546 = vst [vmem:[%s941_s9 + $0x40] sm:$0xff] %v443_v42  ;;  %562 = vst [vmem:[%s941_s9 + $0xc0] sm:$0xff] %v507_v43 }
 0x101   : > { %v747_v44 = vpop.f32.mrf.mxu0  ;;  %v763_v45 = vpop.f32.mrf.mxu1 }
 0x102   : > { %549 = vst [vmem:[%s941_s9 + $0x58] sm:$0xff] %v747_v44  ;;  %565 = vst [vmem:[%s941_s9 + $0xd8] sm:$0xff] %v763_v45 }
 0x103   : > { %v446_v46 = vpop.f32.mrf.mxu0  ;;  %v510_v47 = vpop.f32.mrf.mxu1 }
 0x104   : > { %547 = vst [vmem:[%s941_s9 + $0x48] sm:$0xff] %v446_v46  ;;  %563 = vst [vmem:[%s941_s9 + $0xc8] sm:$0xff] %v510_v47 }
 0x105   : > { %v750_v48 = vpop.f32.mrf.mxu0  ;;  %v766_v49 = vpop.f32.mrf.mxu1 }
 0x106   : > { %552 = vst [vmem:[%s941_s9 + $0x70] sm:$0xff] %v750_v48  ;;  %568 = vst [vmem:[%s941_s9 + $0xf0] sm:$0xff] %v766_v49 }
 0x107   : > { %v459_v50 = vpop.f32.mrf.mxu0  ;;  %v523_v51 = vpop.f32.mrf.mxu1 }
 0x108   : > { %550 = vst [vmem:[%s941_s9 + $0x60] sm:$0xff] %v459_v50  ;;  %566 = vst [vmem:[%s941_s9 + $0xe0] sm:$0xff] %v523_v51 }
 0x109   : > { %v751_v52 = vpop.f32.mrf.mxu0  ;;  %v767_v53 = vpop.f32.mrf.mxu1 }
 0x10a   : > { %553 = vst [vmem:[%s941_s9 + $0x78] sm:$0xff] %v751_v52  ;;  %569 = vst [vmem:[%s941_s9 + $0xf8] sm:$0xff] %v767_v53 }
 0x10b   : > { %v462_v54 = vpop.f32.mrf.mxu0  ;;  %v526_v55 = vpop.f32.mrf.mxu1 }
 0x10c   : > { %551 = vst [vmem:[%s941_s9 + $0x68] sm:$0xff] %v462_v54  ;;  %567 = vst [vmem:[%s941_s9 + $0xe8] sm:$0xff] %v526_v55 }
 0x10d PF: > { %s12_s11 = sadd.s32 1, %s854_s11   ;;  %s987_s9 = smov %s850_s10 }
 0x10e   : > { %p9_p5 = scmp.ge.s32.totalorder %s12_s11, 4   ;;  %s988_s10 = smov %s990_s12 }
 0x110   :  { %11 = sbr.rel (!%p9_p5) target bundleno = 2 (0x2), region = 61 }

// kernel: a_call__.15
= control target key start
LH: loop header
LB: loop body
LE: loop exit
PB: predicated region body
PF: predicated region fallthrough
CT: control target
= control target key end

     0   :  { %s595_s9 = smov 0   ;;  %s597_s10 = smov 0   ;;  %s662_s0 = inlined_call_operand.vmem [shape: bf16[128,128], index: 0, kind: input, shape index: {}]   ;;  %s663_s1 = inlined_call_operand.vmem [shape: bf16[128,128], index: 1, kind: input, shape index: {}]   ;;  %s664_s2 = inlined_call_operand.vmem [shape: f32[128,128], index: 2, kind: output, shape index: {}]  }
   0x1   :  { %s599_s11 = smov 0  }
   0x2 LB: > { %s24_s12 = sadd.s32 1, %s574_s10  ;;  %p449_p0 = scmp.ge.s32.totalorder %s578_s11, 1  ;;  %s578_s11 = sphi %s599_s11, %s12_s11   ;;  %s574_s10 = sphi %s597_s10, %s666_s10   ;;  %s570_s9 = sphi %s595_s9, %s665_s9  }
   0x3   : > { %p26_p1 = scmp.ge.s32.totalorder %s24_s12, 2  ;;  %p136_p2 = scmp.lt.s32.totalorder %s578_s11, 3 }
   0x5   : > { %s668_s12 = smov (%p26_p1, %s24_s12), 0  ;;  %p137_p3 = pnand %p449_p0, %p136_p2 }
   0x6   : > { %s450_s15 = sshll.u32 (!%p137_p3), %s570_s9, 3 }
   0x7   : > { %140 = sbr.rel (%p137_p3) target bundleno = 245 (0xf5), region = 28  ;;  %p166_p4 = scmp.lt.s32.totalorder (!%p137_p3), %s450_s15, 15 }
   0xc   : > { %v544_v0 = vld [vmem:[%s663_s1 + $0x38] sm:$0xff]   ;;  %v545_v1 = vld [vmem:[%s663_s1 + $0x30] sm:$0xff]   ;;  %s670_s15 = smov (!%p166_p4, %s450_s15), 15  ;;  %v546_v2 = vld [vmem:[%s663_s1 + $0x28] sm:$0xff]  }
   0xd   : > { %480 = vmatprep.subr.bf16.mxu0 %v544_v0  ;;  %504 = vmatprep.subr.bf16.mxu1 %v544_v0  ;;  %s451_s20 = sshll.u32 %s670_s15, 2  ;;  %v547_v3 = vld [vmem:[%s663_s1 + $0x20] sm:$0xff]   ;;  %v548_v6 = vld [vmem:[%s663_s1 + $0x18] sm:$0xff]   ;;  %v549_v7 = vld [vmem:[%s663_s1 + $0x10] sm:$0xff]   ;;  %s453_s6 = sshll.u32 %s670_s15, 3 }
   0xe   : > { %481 = vmatpush3.bf16.msra.mxu0 %v544_v0  ;;  %512 = vmatpush3.bf16.msra.mxu1 %v544_v0  ;;  %s628_s23 = scalar_lea.vmem %s662_s0, %s451_s20  ;;  %v550_v8 = vld [vmem:[%s663_s1 + $0x8] sm:$0xff]   ;;  %v551_v9 = vld [vmem:[%s663_s1] sm:$0xff]   ;;  %s182_s9 = scalar_lea.vmem %s664_s2, %s453_s6 }
   0xf   : > { %482 = vmatprep.subr.bf16.mxu0 %v545_v1  ;;  %505 = vmatprep.subr.bf16.mxu1 %v545_v1  ;;  %v552_v4 = vld [vmem:[%s628_s23] sm:$0xff]   ;;  %v553_v5 = vld [vmem:[%s628_s23 + $0x10] sm:$0xff]   ;;  %v554_v10 = vld [vmem:[%s628_s23 + $0x8] sm:$0xff]  }
  0x10   : > { %496 = vmatprep.mubr.bf16.mxu0 %v552_v4  ;;  %500 = vmatprep.mubr.bf16.mxu1 %v553_v5  ;;  %v555_v11 = vld [vmem:[%s628_s23 + $0x18] sm:$0xff]  }
  0x12   : > { %483 = vmatpush3.bf16.msra.mxu0 %v545_v1  ;;  %513 = vmatpush3.bf16.msra.mxu1 %v545_v1 }
  0x13   : > { %484 = vmatprep.subr.bf16.mxu0 %v546_v2  ;;  %506 = vmatprep.subr.bf16.mxu1 %v546_v2 }
  0x16   : > { %485 = vmatpush3.bf16.msra.mxu0 %v546_v2  ;;  %514 = vmatpush3.bf16.msra.mxu1 %v546_v2 }
  0x17   : > { %486 = vmatprep.subr.bf16.mxu0 %v547_v3  ;;  %507 = vmatprep.subr.bf16.mxu1 %v547_v3 }
  0x1a   : > { %487 = vmatpush3.bf16.msra.mxu0 %v547_v3  ;;  %515 = vmatpush3.bf16.msra.mxu1 %v547_v3 }
  0x1b   : > { %488 = vmatprep.subr.bf16.mxu0 %v548_v6  ;;  %508 = vmatprep.subr.bf16.mxu1 %v548_v6 }
  0x1e   : > { %489 = vmatpush3.bf16.msra.mxu0 %v548_v6  ;;  %516 = vmatpush3.bf16.msra.mxu1 %v548_v6 }
  0x1f   : > { %490 = vmatprep.subr.bf16.mxu0 %v549_v7  ;;  %509 = vmatprep.subr.bf16.mxu1 %v549_v7 }
  0x22   : > { %491 = vmatpush3.bf16.msra.mxu0 %v549_v7  ;;  %517 = vmatpush3.bf16.msra.mxu1 %v549_v7 }
  0x23   : > { %492 = vmatprep.subr.bf16.mxu0 %v550_v8  ;;  %510 = vmatprep.subr.bf16.mxu1 %v550_v8 }
  0x26   : > { %493 = vmatpush3.bf16.msra.mxu0 %v550_v8  ;;  %518 = vmatpush3.bf16.msra.mxu1 %v550_v8 }
  0x27   : > { %494 = vmatprep.subr.bf16.mxu0 %v551_v9  ;;  %511 = vmatprep.subr.bf16.mxu1 %v551_v9 }
  0x2a   : > { %495 = vmatpush3.bf16.msra.mxu0 %v551_v9  ;;  %519 = vmatpush3.bf16.msra.mxu1 %v551_v9 }
  0x2d   : > { %497 = vmatmul.mubr.bf16.vlgmr.msra.gmra.mxu0 %v554_v10  ;;  %501 = vmatmul.mubr.bf16.vlgmr.msra.gmra.mxu1 %v555_v11 }
  0xed   : > { %v498_v12 = vpop.f32.mrf.mxu0  ;;  %v502_v13 = vpop.f32.mrf.mxu1 }
  0xee   : > { %348 = vst [vmem:[%s182_s9 + $0x10] sm:$0xff] %v498_v12  ;;  %352 = vst [vmem:[%s182_s9 + $0x30] sm:$0xff] %v502_v13 }
  0xef   : > { %v315_v14 = vpop.f32.mrf.mxu0  ;;  %v331_v15 = vpop.f32.mrf.mxu1 }
  0xf0   : > { %346 = vst [vmem:[%s182_s9] sm:$0xff] %v315_v14  ;;  %350 = vst [vmem:[%s182_s9 + $0x20] sm:$0xff] %v331_v15 }
  0xf1   : > { %v499_v16 = vpop.f32.mrf.mxu0  ;;  %v503_v17 = vpop.f32.mrf.mxu1 }
  0xf2   : > { %349 = vst [vmem:[%s182_s9 + $0x18] sm:$0xff] %v499_v16  ;;  %353 = vst [vmem:[%s182_s9 + $0x38] sm:$0xff] %v503_v17 }
  0xf3   : > { %v318_v18 = vpop.f32.mrf.mxu0  ;;  %v334_v19 = vpop.f32.mrf.mxu1 }
  0xf4   : > { %347 = vst [vmem:[%s182_s9 + $0x8] sm:$0xff] %v318_v18  ;;  %351 = vst [vmem:[%s182_s9 + $0x28] sm:$0xff] %v334_v19 }
  0xf5 PF: > { %s12_s11 = sadd.s32 1, %s578_s11   ;;  %s665_s9 = smov %s574_s10 }
  0xf6   : > { %p9_p5 = scmp.ge.s32.totalorder %s12_s11, 4   ;;  %s666_s10 = smov %s668_s12 }
  0xf8   :  { %11 = sbr.rel (!%p9_p5) target bundleno = 2 (0x2), region = 61 }

// kernel: tile.43
= control target key start
LH: loop header
LB: loop body
LE: loop exit
PB: predicated region body
PF: predicated region fallthrough
CT: control target
= control target key end

     0   :  { %s28_s0 = inlined_call_operand.vmem [shape: f32[8], index: 0, kind: input, shape index: {}]   ;;  %s29_s1 = inlined_call_operand.vmem [shape: f32[16,8], index: 1, kind: output, shape index: {}]  }
   0x1   :  { %v4_v0 = vld [vmem:[%s28_s0] ss:$0 sm:$0xff] }
   0x2   :  { %5 = vst [vmem:[%s29_s1] sm:$0xff] %v4_v0  ;;  %8 = vst [vmem:[%s29_s1 + $0x8] sm:$0xff] %v4_v0 }

// kernel: tile.48
= control target key start
LH: loop header
LB: loop body
LE: loop exit
PB: predicated region body
PF: predicated region fallthrough
CT: control target
= control target key end

     0   :  { %s133_s10 = smov 120   ;;  %s134_s11 = smov 104   ;;  %vm3_vm0 = vcmask 64512   ;;  %vm9_vm1 = vcmask 1048512   ;;  %vm15_vm2 = vcmask 982912   ;;  %vm21_vm3 = vcmask 917312   ;;  %s209_s0 = inlined_call_operand.vmem [shape: f32[16,8], index: 0, kind: input, shape index: {}]   ;;  %s210_s1 = inlined_call_operand.vmem [shape: f32[1,128], index: 1, kind: output, shape index: {}]  }
   0x1   :  { %v103_v0 = vld [vmem:[%s209_s0 + $0xf] sm:$0x1]   ;;  %v105_v1 = vld [vmem:[%s209_s0 + $0xd] sm:$0x1]   ;;  %v104_v2 = vld [vmem:[%s209_s0 + $0xe] sm:$0x1]  }
   0x2   :  { %7 = vrot.lane.b32.xlu0 %v103_v0, %s133_s10  ;;  %19 = vrot.lane.b32.xlu1 %v105_v1, %s134_s11  ;;  %v106_v3 = vld [vmem:[%s209_s0 + $0xc] sm:$0x1]   ;;  %s135_s16 = smov 112   ;;  %s136_s17 = smov 96   ;;  %v107_v4 = vld [vmem:[%s209_s0 + $0xb] sm:$0x1]  }
   0x3   :  { %v108_v5 = vld [vmem:[%s209_s0 + $0xa] sm:$0x1]   ;;  %v2_v6 = vld [vmem:[%s209_s0] sm:$0x1]   ;;  %s137_s24 = smov 88   ;;  %s138_s25 = smov 80  }
   0x4   :  { %4 = vst.msk [vmem:[#allocation0] sm:$0x1] %vm3_vm0, %v2_v6   ;;  %v109_v7 = vld [vmem:[%s209_s0 + $0x9] sm:$0x1]   ;;  %v110_v8 = vld [vmem:[%s209_s0 + $0x8] sm:$0x1]  }
   0x5   :  { %s139_s30 = smov 72   ;;  %s140_s2 = smov 64   ;;  %v111_v9 = vld [vmem:[%s209_s0 + $0x7] sm:$0x1]   ;;  %v112_v10 = vld [vmem:[%s209_s0 + $0x6] sm:$0x1]  }
   0x6   :  { %13 = vrot.lane.b32.xlu0 %v104_v2, %s135_s16  ;;  %25 = vrot.lane.b32.xlu1 %v106_v3, %s136_s17  ;;  %s141_s7 = smov 56   ;;  %s142_s8 = smov 48   ;;  %v113_v11 = vld [vmem:[%s209_s0 + $0x5] sm:$0x1]   ;;  %v114_v12 = vld [vmem:[%s209_s0 + $0x4] sm:$0x1]  }
   0x7   :  { %s143_s13 = smov 40   ;;  %s144_s14 = smov 32   ;;  %v115_v13 = vld [vmem:[%s209_s0 + $0x3] sm:$0x1]   ;;  %v116_v14 = vld [vmem:[%s209_s0 + $0x2] sm:$0x1]  }
   0x8   :  { %s145_s19 = smov 24   ;;  %s146_s20 = smov 16   ;;  %v117_v15 = vld [vmem:[%s209_s0 + $0x1] sm:$0x1]   ;;  %vm27_vm4 = vcmask 851712   ;;  %vm33_vm5 = vcmask 786112  }
   0x9   :  { %s147_s0 = smov 8   ;;  %vm39_vm6 = vcmask 720512   ;;  %vm45_vm7 = vcmask 654912   ;;  %vm51_vm8 = vcmask 589312   ;;  %vm57_vm9 = vcmask 523712  }
   0xa   :  { %31 = vrot.lane.b32.xlu0 %v107_v4, %s137_s24  ;;  %37 = vrot.lane.b32.xlu1 %v108_v5, %s138_s25  ;;  %vm63_vm10 = vcmask 458112   ;;  %vm69_vm11 = vcmask 392512   ;;  %vm75_vm12 = vcmask 326912   ;;  %vm81_vm13 = vcmask 261312  }
   0xb   :  { %vm87_vm14 = vcmask 195712   ;;  %vm93_vm15 = vcmask 130112  }
   0xe   :  { %43 = vrot.lane.b32.xlu0 %v109_v7, %s139_s30  ;;  %49 = vrot.lane.b32.xlu1 %v110_v8, %s140_s2 }
  0x12   :  { %55 = vrot.lane.b32.xlu0 %v111_v9, %s141_s7  ;;  %61 = vrot.lane.b32.xlu1 %v112_v10, %s142_s8 }
  0x16   :  { %67 = vrot.lane.b32.xlu0 %v113_v11, %s143_s13  ;;  %73 = vrot.lane.b32.xlu1 %v114_v12, %s144_s14 }
  0x1a   :  { %79 = vrot.lane.b32.xlu0 %v115_v13, %s145_s19  ;;  %85 = vrot.lane.b32.xlu1 %v116_v14, %s146_s20 }
  0x1e   :  { %91 = vrot.lane.b32.xlu0 %v117_v15, %s147_s0 }
  0x74   :  { %v8_v16 = vpop.permute.xlu0 %7   ;;  %v20_v17 = vpop.permute.xlu1 %19  }
  0x75   :  { %10 = vst.msk [vmem:[#allocation0] sm:$0x1] %vm9_vm1, %v8_v16  }
  0x78   :  { %v14_v18 = vpop.permute.xlu0 %13   ;;  %v26_v19 = vpop.permute.xlu1 %25  }
  0x79   :  { %16 = vst.msk [vmem:[#allocation0] sm:$0x1] %vm15_vm2, %v14_v18  }
  0x7a   :  { %22 = vst.msk [vmem:[#allocation0] sm:$0x1] %vm21_vm3, %v20_v17  }
  0x7b   :  { %28 = vst.msk [vmem:[#allocation0] sm:$0x1] %vm27_vm4, %v26_v19  }
  0x7c   :  { %v32_v20 = vpop.permute.xlu0 %31   ;;  %v38_v21 = vpop.permute.xlu1 %37  }
  0x7d   :  { %34 = vst.msk [vmem:[#allocation0] sm:$0x1] %vm33_vm5, %v32_v20  }
  0x7e   :  { %40 = vst.msk [vmem:[#allocation0] sm:$0x1] %vm39_vm6, %v38_v21  }
  0x80   :  { %v44_v22 = vpop.permute.xlu0 %43   ;;  %v50_v23 = vpop.permute.xlu1 %49  }
  0x81   :  { %46 = vst.msk [vmem:[#allocation0] sm:$0x1] %vm45_vm7, %v44_v22  }
  0x82   :  { %52 = vst.msk [vmem:[#allocation0] sm:$0x1] %vm51_vm8, %v50_v23  }
  0x84   :  { %v56_v24 = vpop.permute.xlu0 %55   ;;  %v62_v25 = vpop.permute.xlu1 %61  }
  0x85   :  { %58 = vst.msk [vmem:[#allocation0] sm:$0x1] %vm57_vm9, %v56_v24  }
  0x86   :  { %64 = vst.msk [vmem:[#allocation0] sm:$0x1] %vm63_vm10, %v62_v25  }
  0x88   :  { %v68_v26 = vpop.permute.xlu0 %67   ;;  %v74_v27 = vpop.permute.xlu1 %73  }
  0x89   :  { %70 = vst.msk [vmem:[#allocation0] sm:$0x1] %vm69_vm11, %v68_v26  }
  0x8a   :  { %76 = vst.msk [vmem:[#allocation0] sm:$0x1] %vm75_vm12, %v74_v27  }
  0x8c   :  { %v80_v28 = vpop.permute.xlu0 %79   ;;  %v86_v29 = vpop.permute.xlu1 %85  }
  0x8d   :  { %82 = vst.msk [vmem:[#allocation0] sm:$0x1] %vm81_vm13, %v80_v28  }
  0x8e   :  { %88 = vst.msk [vmem:[#allocation0] sm:$0x1] %vm87_vm14, %v86_v29  }
  0x90   :  { %v92_v30 = vpop.permute.xlu0 %91  }
  0x91   :  { %94 = vst.msk [vmem:[#allocation0] sm:$0x1] %vm93_vm15, %v92_v30  }
  0x98   :  { %v99_v31 = vld [vmem:[#allocation0] sm:$0x1] }
  0x99   :  { %102 = vst [vmem:[%s210_s1] sm:$0x1] %v99_v31 }

// kernel: a_call__.17
= control target key start
LH: loop header
LB: loop body
LE: loop exit
PB: predicated region body
PF: predicated region fallthrough
CT: control target
= control target key end

     0   :  { %s226_s6 = smov 0   ;;  %s243_s0 = inlined_call_operand.vmem [shape: f32[32,128], index: 0, kind: input, shape index: {}]   ;;  %s244_s1 = inlined_call_operand.vmem [shape: f32[2,2,128], index: 1, kind: output, shape index: {}]  }
   0x1 LB: > { %s190_s7 = sadd.s32 4294967295, %s214_s6   ;;  %p194_p0 = scmp.ge.s32.totalorder %s214_s6, 1  ;;  %s214_s6 = sphi %s226_s6, %s11_s6  }
   0x2   : > { %p88_p1 = scmp.lt.s32.totalorder %s214_s6, 3 }
   0x4   : > { %p89_p2 = pnand %p194_p0, %p88_p1 }
   0x5   : > { %s195_s8 = sshll.u32 (!%p89_p2), %s190_s7, 1  ;;  %p113_p4 = scmp.lt.s32.totalorder (!%p89_p2), %s190_s7, 1 }
   0x6   : > { %92 = sbr.rel (%p89_p2) target bundleno = 32 (0x20), region = 24  ;;  %p108_p3 = scmp.lt.s32.totalorder (!%p89_p2), %s195_s8, 3 }
   0xb   : > { %s246_s8 = smov (!%p108_p3, %s195_s8), 3  ;;  %s248_s7 = smov (!%p113_p4, %s190_s7), 1 }
   0xc   : > { %s196_s9 = sshll.u32 %s246_s8, 3  ;;  %s197_s13 = sshll.u32 %s248_s7, 1 }
   0xd   : > { %s111_s12 = scalar_lea.vmem %s243_s0, %s196_s9  ;;  %s116_s16 = scalar_lea.vmem %s244_s1, %s197_s13 }
   0xe   : > { %v117_v0 = vld [vmem:[%s111_s12] sm:$0xff]  ;;  %v118_v1 = vld [vmem:[%s111_s12 + $0x8] sm:$0xff] }
   0xf   : > { %v119_v2 = vadd.f32 %v118_v1, %v117_v0  ;;  %v127_v3 = vmul.f32 %v117_v0, %v117_v0  ;;  %v128_v4 = vmul.f32 %v118_v1, %v118_v1 }
  0x11   : > { %v120_v5 = vrot.slane %v119_v2, 4  ;;  %v129_v6 = vadd.f32 %v128_v4, %v127_v3 }
  0x13   : > { %v121_v7 = vadd.f32 %v120_v5, %v119_v2  ;;  %v130_v8 = vrot.slane %v129_v6, 4 }
  0x15   : > { %v122_v9 = vrot.slane %v121_v7, 2  ;;  %v131_v10 = vadd.f32 %v130_v8, %v129_v6 }
  0x17   : > { %v123_v11 = vadd.f32 %v122_v9, %v121_v7  ;;  %v132_v12 = vrot.slane %v131_v10, 2 }
  0x19   : > { %v124_v13 = vrot.slane %v123_v11, 1  ;;  %v133_v14 = vadd.f32 %v132_v12, %v131_v10 }
  0x1b   : > { %v125_v15 = vadd.f32 %v124_v13, %v123_v11  ;;  %v134_v16 = vrot.slane %v133_v14, 1 }
  0x1d   : > { %126 = vst [vmem:[%s116_s16] sm:$0x1] %v125_v15  ;;  %v135_v17 = vadd.f32 %v134_v16, %v133_v14 }
  0x1f   : > { %136 = vst [vmem:[%s116_s16 + $0x1] sm:$0x1] %v135_v17 }
  0x20 PF: > { %s11_s6 = sadd.s32 1, %s214_s6  }
  0x21   : > { %p8_p5 = scmp.ge.s32.totalorder %s11_s6, 4  }
  0x23   :  { %10 = sbr.rel (!%p8_p5) target bundleno = 1 (0x1), region = 54 }

// kernel: a_call__.18
= control target key start
LH: loop header
LB: loop body
LE: loop exit
PB: predicated region body
PF: predicated region fallthrough
CT: control target
= control target key end

     0   :  { %s303_s12 = smov 0   ;;  %s320_s0 = inlined_call_operand.vmem [shape: f32[32,128], index: 0, kind: input, shape index: {}]   ;;  %s321_s1 = inlined_call_operand.vmem [shape: f32[1,128], index: 1, kind: input, shape index: {}]   ;;  %s322_s2 = inlined_call_operand.vmem [shape: f32[1,128], index: 2, kind: input, shape index: {}]   ;;  %s323_s3 = inlined_call_operand.vmem [shape: f32[32,128], index: 3, kind: output, shape index: {}]  }
   0x1 LB: > { %s254_s13 = sadd.s32 4294967295, %s281_s12   ;;  %p258_p0 = scmp.ge.s32.totalorder %s281_s12, 1  ;;  %s281_s12 = sphi %s303_s12, %s13_s12  }
   0x2   : > { %p138_p1 = scmp.lt.s32.totalorder %s281_s12, 3 }
   0x4   : > { %p139_p2 = pnand %p258_p0, %p138_p1 }
   0x5   : > { %s259_s14 = sshll.u32 (!%p139_p2), %s254_s13, 1 }
   0x6   : > { %142 = sbr.rel (%p139_p2) target bundleno = 22 (0x16), region = 32  ;;  %p163_p3 = scmp.lt.s32.totalorder (!%p139_p2), %s259_s14, 3 }
   0xb   : > { %s325_s14 = smov (!%p163_p3, %s259_s14), 3  ;;  %v263_v0 = vld [vmem:[%s321_s1] ss:$0 sm:$0xff] }
   0xc   : > { %s260_s15 = sshll.u32 %s325_s14, 3  ;;  %v264_v3 = vld [vmem:[%s322_s2] ss:$0 sm:$0xff] }
   0xd   : > { %s166_s20 = scalar_lea.vmem %s320_s0, %s260_s15  ;;  %s172_s25 = scalar_lea.vmem %s323_s3, %s260_s15 }
   0xe   : > { %v174_v1 = vld [vmem:[%s166_s20] sm:$0xff]  ;;  %v175_v2 = vld [vmem:[%s166_s20 + $0x8] sm:$0xff] }
   0xf   : > { %v183_v4 = vmul.f32 %v263_v0, %v174_v1  ;;  %v184_v5 = vmul.f32 %v263_v0, %v175_v2 }
  0x11   : > { %v192_v6 = vadd.f32 %v264_v3, %v183_v4  ;;  %v193_v7 = vadd.f32 %v264_v3, %v184_v5 }
  0x13   : > { %v194_v8 = vmax.f32 %v192_v6, 0.0  ;;  %v195_v9 = vmax.f32 %v193_v7, 0.0 }
  0x15   : > { %196 = vst [vmem:[%s172_s25] sm:$0xff] %v194_v8  ;;  %197 = vst [vmem:[%s172_s25 + $0x8] sm:$0xff] %v195_v9 }
  0x16 PF: > { %s13_s12 = sadd.s32 1, %s281_s12  }
  0x17   : > { %p10_p4 = scmp.ge.s32.totalorder %s13_s12, 4  }
  0x19   :  { %12 = sbr.rel (!%p10_p4) target bundleno = 1 (0x1), region = 62 }

// kernel: a_call__.21
= control target key start
LH: loop header
LB: loop body
LE: loop exit
PB: predicated region body
PF: predicated region fallthrough
CT: control target
= control target key end

     0   :  { %s1239_s9 = smov 0   ;;  %s1241_s10 = smov 0   ;;  %s1400_s0 = inlined_call_operand.vmem [shape: bf16[2048,128], index: 0, kind: input, shape index: {}]   ;;  %s1401_s1 = inlined_call_operand.vmem [shape: bf16[128,128], index: 1, kind: input, shape index: {}]   ;;  %s1402_s2 = inlined_call_operand.vmem [shape: f32[2048,128], index: 2, kind: output, shape index: {}]  }
   0x1   :  { %s1243_s11 = smov 0  }
   0x2 LB: > { %s24_s12 = sadd.s32 1, %s1218_s10  ;;  %p953_p0 = scmp.ge.s32.totalorder %s1222_s11, 1  ;;  %s1222_s11 = sphi %s1243_s11, %s12_s11   ;;  %s1218_s10 = sphi %s1241_s10, %s1404_s10   ;;  %s1214_s9 = sphi %s1239_s9, %s1403_s9  }
   0x3   : > { %p26_p1 = scmp.ge.s32.totalorder %s24_s12, 4  ;;  %p136_p2 = scmp.lt.s32.totalorder %s1222_s11, 5 }
   0x5   : > { %s1406_s12 = smov (%p26_p1, %s24_s12), 0  ;;  %p137_p3 = pnand %p953_p0, %p136_p2 }
   0x6   : > { %s954_s15 = sshll.u32 (!%p137_p3), %s1214_s9, 6 }
   0x7   : > { %140 = sbr.rel (%p137_p3) target bundleno = 301 (0x12d), region = 28  ;;  %p166_p4 = scmp.lt.s32.totalorder (!%p137_p3), %s954_s15, 255 }
   0xc   : > { %v1160_v0 = vld [vmem:[%s1401_s1 + $0x38] sm:$0xff]   ;;  %v1161_v1 = vld [vmem:[%s1401_s1 + $0x30] sm:$0xff]   ;;  %s1408_s15 = smov (!%p166_p4, %s954_s15), 255  ;;  %v1162_v2 = vld [vmem:[%s1401_s1 + $0x28] sm:$0xff]  }
   0xd   : > { %1040 = vmatprep.subr.bf16.mxu0 %v1160_v0  ;;  %1120 = vmatprep.subr.bf16.mxu1 %v1160_v0  ;;  %s955_s20 = sshll.u32 %s1408_s15, 2  ;;  %v1163_v3 = vld [vmem:[%s1401_s1 + $0x20] sm:$0xff]   ;;  %v1164_v6 = vld [vmem:[%s1401_s1 + $0x18] sm:$0xff]   ;;  %v1165_v7 = vld [vmem:[%s1401_s1 + $0x10] sm:$0xff]   ;;  %s957_s6 = sshll.u32 %s1408_s15, 3 }
   0xe   : > { %1041 = vmatpush3.bf16.msra.mxu0 %v1160_v0  ;;  %1128 = vmatpush3.bf16.msra.mxu1 %v1160_v0  ;;  %s1272_s23 = scalar_lea.vmem %s1400_s0, %s955_s20  ;;  %v1166_v8 = vld [vmem:[%s1401_s1 + $0x8] sm:$0xff]   ;;  %v1167_v9 = vld [vmem:[%s1401_s1] sm:$0xff]   ;;  %s1325_s9 = scalar_lea.vmem %s1402_s2, %s957_s6 }
   0xf   : > { %1042 = vmatprep.subr.bf16.mxu0 %v1161_v1  ;;  %1121 = vmatprep.subr.bf16.mxu1 %v1161_v1  ;;  %v1168_v4 = vld [vmem:[%s1272_s23] sm:$0xff]   ;;  %v1170_v10 = vld [vmem:[%s1272_s23 + $0x8] sm:$0xff]   ;;  %v1172_v12 = vld [vmem:[%s1272_s23 + $0x10] sm:$0xff]  }
  0x10   : > { %v1169_v5 = vld [vmem:[%s1272_s23 + $0x80] sm:$0xff]   ;;  %1056 = vmatprep.mubr.bf16.mxu0 %v1168_v4  ;;  %v1171_v11 = vld [vmem:[%s1272_s23 + $0x88] sm:$0xff]   ;;  %v1173_v13 = vld [vmem:[%s1272_s23 + $0x90] sm:$0xff]  }
  0x11   : > { %1088 = vmatprep.mubr.bf16.mxu1 %v1169_v5  ;;  %v1174_v14 = vld [vmem:[%s1272_s23 + $0x18] sm:$0xff]   ;;  %v1176_v16 = vld [vmem:[%s1272_s23 + $0x20] sm:$0xff]   ;;  %v1178_v18 = vld [vmem:[%s1272_s23 + $0x28] sm:$0xff]  }
  0x12   : > { %1043 = vmatpush3.bf16.msra.mxu0 %v1161_v1  ;;  %1129 = vmatpush3.bf16.msra.mxu1 %v1161_v1  ;;  %v1175_v15 = vld [vmem:[%s1272_s23 + $0x98] sm:$0xff]   ;;  %v1177_v17 = vld [vmem:[%s1272_s23 + $0xa0] sm:$0xff]   ;;  %v1179_v19 = vld [vmem:[%s1272_s23 + $0xa8] sm:$0xff]  }
  0x13   : > { %1044 = vmatprep.subr.bf16.mxu0 %v1162_v2  ;;  %1122 = vmatprep.subr.bf16.mxu1 %v1162_v2  ;;  %v1180_v20 = vld [vmem:[%s1272_s23 + $0x30] sm:$0xff]   ;;  %v1182_v22 = vld [vmem:[%s1272_s23 + $0x38] sm:$0xff]   ;;  %v1184_v24 = vld [vmem:[%s1272_s23 + $0x40] sm:$0xff]  }
  0x14   : > { %v1181_v21 = vld [vmem:[%s1272_s23 + $0xb0] sm:$0xff]   ;;  %v1183_v23 = vld [vmem:[%s1272_s23 + $0xb8] sm:$0xff]   ;;  %v1185_v25 = vld [vmem:[%s1272_s23 + $0xc0] sm:$0xff]  }
  0x15   : > { %v1186_v26 = vld [vmem:[%s1272_s23 + $0x48] sm:$0xff]   ;;  %v1188_v28 = vld [vmem:[%s1272_s23 + $0x50] sm:$0xff]   ;;  %v1190_v30 = vld [vmem:[%s1272_s23 + $0x58] sm:$0xff]  }
  0x16   : > { %1045 = vmatpush3.bf16.msra.mxu0 %v1162_v2  ;;  %1130 = vmatpush3.bf16.msra.mxu1 %v1162_v2  ;;  %v1187_v27 = vld [vmem:[%s1272_s23 + $0xc8] sm:$0xff]   ;;  %v1189_v29 = vld [vmem:[%s1272_s23 + $0xd0] sm:$0xff]   ;;  %v1191_v31 = vld [vmem:[%s1272_s23 + $0xd8] sm:$0xff]  }
  0x17   : > { %1046 = vmatprep.subr.bf16.mxu0 %v1163_v3  ;;  %1123 = vmatprep.subr.bf16.mxu1 %v1163_v3  ;;  %v1192_v32 = vld [vmem:[%s1272_s23 + $0x60] sm:$0xff]   ;;  %v1194_v34 = vld [vmem:[%s1272_s23 + $0x68] sm:$0xff]   ;;  %v1196_v36 = vld [vmem:[%s1272_s23 + $0x70] sm:$0xff]  }
  0x18   : > { %v1193_v33 = vld [vmem:[%s1272_s23 + $0xe0] sm:$0xff]   ;;  %v1195_v35 = vld [vmem:[%s1272_s23 + $0xe8] sm:$0xff]   ;;  %v1197_v37 = vld [vmem:[%s1272_s23 + $0xf0] sm:$0xff]  }
  0x19   : > { %v1198_v38 = vld [vmem:[%s1272_s23 + $0x78] sm:$0xff]  }
  0x1a   : > { %1047 = vmatpush3.bf16.msra.mxu0 %v1163_v3  ;;  %1131 = vmatpush3.bf16.msra.mxu1 %v1163_v3  ;;  %v1199_v39 = vld [vmem:[%s1272_s23 + $0xf8] sm:$0xff]  }
  0x1b   : > { %1048 = vmatprep.subr.bf16.mxu0 %v1164_v6  ;;  %1124 = vmatprep.subr.bf16.mxu1 %v1164_v6 }
  0x1e   : > { %1049 = vmatpush3.bf16.msra.mxu0 %v1164_v6  ;;  %1132 = vmatpush3.bf16.msra.mxu1 %v1164_v6 }
  0x1f   : > { %1050 = vmatprep.subr.bf16.mxu0 %v1165_v7  ;;  %1125 = vmatprep.subr.bf16.mxu1 %v1165_v7 }
  0x22   : > { %1051 = vmatpush3.bf16.msra.mxu0 %v1165_v7  ;;  %1133 = vmatpush3.bf16.msra.mxu1 %v1165_v7 }
  0x23   : > { %1052 = vmatprep.subr.bf16.mxu0 %v1166_v8  ;;  %1126 = vmatprep.subr.bf16.mxu1 %v1166_v8 }
  0x26   : > { %1053 = vmatpush3.bf16.msra.mxu0 %v1166_v8  ;;  %1134 = vmatpush3.bf16.msra.mxu1 %v1166_v8 }
  0x27   : > { %1054 = vmatprep.subr.bf16.mxu0 %v1167_v9  ;;  %1127 = vmatprep.subr.bf16.mxu1 %v1167_v9 }
  0x2a   : > { %1055 = vmatpush3.bf16.msra.mxu0 %v1167_v9  ;;  %1135 = vmatpush3.bf16.msra.mxu1 %v1167_v9 }
  0x2d   : > { %1057 = vmatmul.mubr.bf16.vlgmr.msra.gmra.mxu0 %v1170_v10  ;;  %1089 = vmatmul.mubr.bf16.vlgmr.msra.gmra.mxu1 %v1171_v11 }
  0x2e   : > { %1060 = vmatprep.mubr.bf16.mxu0 %v1172_v12  ;;  %1092 = vmatprep.mubr.bf16.mxu1 %v1173_v13 }
  0x35   : > { %1061 = vmatmul.mubr.bf16.gmra.mxu0 %v1174_v14  ;;  %1093 = vmatmul.mubr.bf16.gmra.mxu1 %v1175_v15 }
  0x36   : > { %1064 = vmatprep.mubr.bf16.mxu0 %v1176_v16  ;;  %1096 = vmatprep.mubr.bf16.mxu1 %v1177_v17 }
  0x3d   : > { %1065 = vmatmul.mubr.bf16.gmra.mxu0 %v1178_v18  ;;  %1097 = vmatmul.mubr.bf16.gmra.mxu1 %v1179_v19 }
  0x3e   : > { %1068 = vmatprep.mubr.bf16.mxu0 %v1180_v20  ;;  %1100 = vmatprep.mubr.bf16.mxu1 %v1181_v21 }
  0x45   : > { %1069 = vmatmul.mubr.bf16.gmra.mxu0 %v1182_v22  ;;  %1101 = vmatmul.mubr.bf16.gmra.mxu1 %v1183_v23 }
  0x46   : > { %1072 = vmatprep.mubr.bf16.mxu0 %v1184_v24  ;;  %1104 = vmatprep.mubr.bf16.mxu1 %v1185_v25 }
  0x4d   : > { %1073 = vmatmul.mubr.bf16.gmra.mxu0 %v1186_v26  ;;  %1105 = vmatmul.mubr.bf16.gmra.mxu1 %v1187_v27 }
  0x4e   : > { %1076 = vmatprep.mubr.bf16.mxu0 %v1188_v28  ;;  %1108 = vmatprep.mubr.bf16.mxu1 %v1189_v29 }
  0x55   : > { %1077 = vmatmul.mubr.bf16.gmra.mxu0 %v1190_v30  ;;  %1109 = vmatmul.mubr.bf16.gmra.mxu1 %v1191_v31 }
  0x56   : > { %1080 = vmatprep.mubr.bf16.mxu0 %v1192_v32  ;;  %1112 = vmatprep.mubr.bf16.mxu1 %v1193_v33 }
  0x5d   : > { %1081 = vmatmul.mubr.bf16.gmra.mxu0 %v1194_v34  ;;  %1113 = vmatmul.mubr.bf16.gmra.mxu1 %v1195_v35 }
  0x5e   : > { %1084 = vmatprep.mubr.bf16.mxu0 %v1196_v36  ;;  %1116 = vmatprep.mubr.bf16.mxu1 %v1197_v37 }
  0x65   : > { %1085 = vmatmul.mubr.bf16.gmra.mxu0 %v1198_v38  ;;  %1117 = vmatmul.mubr.bf16.gmra.mxu1 %v1199_v39 }
  0xed   : > { %v1058_v40 = vpop.f32.mrf.mxu0  ;;  %v1090_v41 = vpop.f32.mrf.mxu1 }
  0xee   : > { %796 = vst [vmem:[%s1325_s9 + $0x10] sm:$0xff] %v1058_v40  ;;  %828 = vst [vmem:[%s1325_s9 + $0x110] sm:$0xff] %v1090_v41 }
  0xef   : > { %v539_v42 = vpop.f32.mrf.mxu0  ;;  %v667_v43 = vpop.f32.mrf.mxu1 }
  0xf0   : > { %794 = vst [vmem:[%s1325_s9] sm:$0xff] %v539_v42  ;;  %826 = vst [vmem:[%s1325_s9 + $0x100] sm:$0xff] %v667_v43 }
  0xf1   : > { %v1059_v44 = vpop.f32.mrf.mxu0  ;;  %v1091_v45 = vpop.f32.mrf.mxu1 }
  0xf2   : > { %797 = vst [vmem:[%s1325_s9 + $0x18] sm:$0xff] %v1059_v44  ;;  %829 = vst [vmem:[%s1325_s9 + $0x118] sm:$0xff] %v1091_v45 }
  0xf3   : > { %v542_v46 = vpop.f32.mrf.mxu0  ;;  %v670_v47 = vpop.f32.mrf.mxu1 }
  0xf4   : > { %795 = vst [vmem:[%s1325_s9 + $0x8] sm:$0xff] %v542_v46  ;;  %827 = vst [vmem:[%s1325_s9 + $0x108] sm:$0xff] %v670_v47 }
  0xf5   : > { %v1062_v48 = vpop.f32.mrf.mxu0  ;;  %v1094_v49 = vpop.f32.mrf.mxu1 }
  0xf6   : > { %800 = vst [vmem:[%s1325_s9 + $0x30] sm:$0xff] %v1062_v48  ;;  %832 = vst [vmem:[%s1325_s9 + $0x130] sm:$0xff] %v1094_v49 }
  0xf7   : > { %v555_v50 = vpop.f32.mrf.mxu0  ;;  %v683_v51 = vpop.f32.mrf.mxu1 }
  0xf8   : > { %798 = vst [vmem:[%s1325_s9 + $0x20] sm:$0xff] %v555_v50  ;;  %830 = vst [vmem:[%s1325_s9 + $0x120] sm:$0xff] %v683_v51 }
  0xf9   : > { %v1063_v52 = vpop.f32.mrf.mxu0  ;;  %v1095_v53 = vpop.f32.mrf.mxu1 }
  0xfa   : > { %801 = vst [vmem:[%s1325_s9 + $0x38] sm:$0xff] %v1063_v52  ;;  %833 = vst [vmem:[%s1325_s9 + $0x138] sm:$0xff] %v1095_v53 }
  0xfb   : > { %v558_v54 = vpop.f32.mrf.mxu0  ;;  %v686_v55 = vpop.f32.mrf.mxu1 }
  0xfc   : > { %799 = vst [vmem:[%s1325_s9 + $0x28] sm:$0xff] %v558_v54  ;;  %831 = vst [vmem:[%s1325_s9 + $0x128] sm:$0xff] %v686_v55 }
  0xfd   : > { %v1066_v56 = vpop.f32.mrf.mxu0  ;;  %v1098_v57 = vpop.f32.mrf.mxu1 }
  0xfe   : > { %804 = vst [vmem:[%s1325_s9 + $0x50] sm:$0xff] %v1066_v56  ;;  %836 = vst [vmem:[%s1325_s9 + $0x150] sm:$0xff] %v1098_v57 }
  0xff   : > { %v571_v58 = vpop.f32.mrf.mxu0  ;;  %v699_v59 = vpop.f32.mrf.mxu1 }
 0x100   : > { %802 = vst [vmem:[%s1325_s9 + $0x40] sm:$0xff] %v571_v58  ;;  %834 = vst [vmem:[%s1325_s9 + $0x140] sm:$0xff] %v699_v59 }
 0x101   : > { %v1067_v60 = vpop.f32.mrf.mxu0  ;;  %v1099_v61 = vpop.f32.mrf.mxu1 }
 0x102   : > { %805 = vst [vmem:[%s1325_s9 + $0x58] sm:$0xff] %v1067_v60  ;;  %837 = vst [vmem:[%s1325_s9 + $0x158] sm:$0xff] %v1099_v61 }
 0x103   : > { %v574_v62 = vpop.f32.mrf.mxu0  ;;  %v702_v63 = vpop.f32.mrf.mxu1 }
 0x104   : > { %803 = vst [vmem:[%s1325_s9 + $0x48] sm:$0xff] %v574_v62  ;;  %835 = vst [vmem:[%s1325_s9 + $0x148] sm:$0xff] %v702_v63 }
 0x105   : > { %v1070_v0 = vpop.f32.mrf.mxu0  ;;  %v1102_v1 = vpop.f32.mrf.mxu1 }
 0x106   : > { %808 = vst [vmem:[%s1325_s9 + $0x70] sm:$0xff] %v1070_v0  ;;  %840 = vst [vmem:[%s1325_s9 + $0x170] sm:$0xff] %v1102_v1 }
 0x107   : > { %v587_v2 = vpop.f32.mrf.mxu0  ;;  %v715_v3 = vpop.f32.mrf.mxu1 }
 0x108   : > { %806 = vst [vmem:[%s1325_s9 + $0x60] sm:$0xff] %v587_v2  ;;  %838 = vst [vmem:[%s1325_s9 + $0x160] sm:$0xff] %v715_v3 }
 0x109   : > { %v1071_v4 = vpop.f32.mrf.mxu0  ;;  %v1103_v5 = vpop.f32.mrf.mxu1 }
 0x10a   : > { %809 = vst [vmem:[%s1325_s9 + $0x78] sm:$0xff] %v1071_v4  ;;  %841 = vst [vmem:[%s1325_s9 + $0x178] sm:$0xff] %v1103_v5 }
 0x10b   : > { %v590_v6 = vpop.f32.mrf.mxu0  ;;  %v718_v7 = vpop.f32.mrf.mxu1 }
 0x10c   : > { %807 = vst [vmem:[%s1325_s9 + $0x68] sm:$0xff] %v590_v6  ;;  %839 = vst [vmem:[%s1325_s9 + $0x168] sm:$0xff] %v718_v7 }
 0x10d   : > { %v1074_v8 = vpop.f32.mrf.mxu0  ;;  %v1106_v9 = vpop.f32.mrf.mxu1 }
 0x10e   : > { %812 = vst [vmem:[%s1325_s9 + $0x90] sm:$0xff] %v1074_v8  ;;  %844 = vst [vmem:[%s1325_s9 + $0x190] sm:$0xff] %v1106_v9 }
 0x10f   : > { %v603_v10 = vpop.f32.mrf.mxu0  ;;  %v731_v11 = vpop.f32.mrf.mxu1 }
 0x110   : > { %810 = vst [vmem:[%s1325_s9 + $0x80] sm:$0xff] %v603_v10  ;;  %842 = vst [vmem:[%s1325_s9 + $0x180] sm:$0xff] %v731_v11 }
 0x111   : > { %v1075_v12 = vpop.f32.mrf.mxu0  ;;  %v1107_v13 = vpop.f32.mrf.mxu1 }
 0x112   : > { %813 = vst [vmem:[%s1325_s9 + $0x98] sm:$0xff] %v1075_v12  ;;  %845 = vst [vmem:[%s1325_s9 + $0x198] sm:$0xff] %v1107_v13 }
 0x113   : > { %v606_v14 = vpop.f32.mrf.mxu0  ;;  %v734_v15 = vpop.f32.mrf.mxu1 }
 0x114   : > { %811 = vst [vmem:[%s1325_s9 + $0x88] sm:$0xff] %v606_v14  ;;  %843 = vst [vmem:[%s1325_s9 + $0x188] sm:$0xff] %v734_v15 }
 0x115   : > { %v1078_v16 = vpop.f32.mrf.mxu0  ;;  %v1110_v17 = vpop.f32.mrf.mxu1 }
 0x116   : > { %816 = vst [vmem:[%s1325_s9 + $0xb0] sm:$0xff] %v1078_v16  ;;  %848 = vst [vmem:[%s1325_s9 + $0x1b0] sm:$0xff] %v1110_v17 }
 0x117   : > { %v619_v18 = vpop.f32.mrf.mxu0  ;;  %v747_v19 = vpop.f32.mrf.mxu1 }
 0x118   : > { %814 = vst [vmem:[%s1325_s9 + $0xa0] sm:$0xff] %v619_v18  ;;  %846 = vst [vmem:[%s1325_s9 + $0x1a0] sm:$0xff] %v747_v19 }
 0x119   : > { %v1079_v20 = vpop.f32.mrf.mxu0  ;;  %v1111_v21 = vpop.f32.mrf.mxu1 }
 0x11a   : > { %817 = vst [vmem:[%s1325_s9 + $0xb8] sm:$0xff] %v1079_v20  ;;  %849 = vst [vmem:[%s1325_s9 + $0x1b8] sm:$0xff] %v1111_v21 }
 0x11b   : > { %v622_v22 = vpop.f32.mrf.mxu0  ;;  %v750_v23 = vpop.f32.mrf.mxu1 }
 0x11c   : > { %815 = vst [vmem:[%s1325_s9 + $0xa8] sm:$0xff] %v622_v22  ;;  %847 = vst [vmem:[%s1325_s9 + $0x1a8] sm:$0xff] %v750_v23 }
 0x11d   : > { %v1082_v24 = vpop.f32.mrf.mxu0  ;;  %v1114_v25 = vpop.f32.mrf.mxu1 }
 0x11e   : > { %820 = vst [vmem:[%s1325_s9 + $0xd0] sm:$0xff] %v1082_v24  ;;  %852 = vst [vmem:[%s1325_s9 + $0x1d0] sm:$0xff] %v1114_v25 }
 0x11f   : > { %v635_v26 = vpop.f32.mrf.mxu0  ;;  %v763_v27 = vpop.f32.mrf.mxu1 }
 0x120   : > { %818 = vst [vmem:[%s1325_s9 + $0xc0] sm:$0xff] %v635_v26  ;;  %850 = vst [vmem:[%s1325_s9 + $0x1c0] sm:$0xff] %v763_v27 }
 0x121   : > { %v1083_v28 = vpop.f32.mrf.mxu0  ;;  %v1115_v29 = vpop.f32.mrf.mxu1 }
 0x122   : > { %821 = vst [vmem:[%s1325_s9 + $0xd8] sm:$0xff] %v1083_v28  ;;  %853 = vst [vmem:[%s1325_s9 + $0x1d8] sm:$0xff] %v1115_v29 }
 0x123   : > { %v638_v30 = vpop.f32.mrf.mxu0  ;;  %v766_v31 = vpop.f32.mrf.mxu1 }
 0x124   : > { %819 = vst [vmem:[%s1325_s9 + $0xc8] sm:$0xff] %v638_v30  ;;  %851 = vst [vmem:[%s1325_s9 + $0x1c8] sm:$0xff] %v766_v31 }
 0x125   : > { %v1086_v32 = vpop.f32.mrf.mxu0  ;;  %v1118_v33 = vpop.f32.mrf.mxu1 }
 0x126   : > { %824 = vst [vmem:[%s1325_s9 + $0xf0] sm:$0xff] %v1086_v32  ;;  %856 = vst [vmem:[%s1325_s9 + $0x1f0] sm:$0xff] %v1118_v33 }
 0x127   : > { %v651_v34 = vpop.f32.mrf.mxu0  ;;  %v779_v35 = vpop.f32.mrf.mxu1 }
 0x128   : > { %822 = vst [vmem:[%s1325_s9 + $0xe0] sm:$0xff] %v651_v34  ;;  %854 = vst [vmem:[%s1325_s9 + $0x1e0] sm:$0xff] %v779_v35 }
 0x129   : > { %v1087_v36 = vpop.f32.mrf.mxu0  ;;  %v1119_v37 = vpop.f32.mrf.mxu1 }
 0x12a   : > { %825 = vst [vmem:[%s1325_s9 + $0xf8] sm:$0xff] %v1087_v36  ;;  %857 = vst [vmem:[%s1325_s9 + $0x1f8] sm:$0xff] %v1119_v37 }
 0x12b   : > { %v654_v38 = vpop.f32.mrf.mxu0  ;;  %v782_v39 = vpop.f32.mrf.mxu1 }
 0x12c   : > { %823 = vst [vmem:[%s1325_s9 + $0xe8] sm:$0xff] %v654_v38  ;;  %855 = vst [vmem:[%s1325_s9 + $0x1e8] sm:$0xff] %v782_v39 }
 0x12d PF: > { %s12_s11 = sadd.s32 1, %s1222_s11   ;;  %s1403_s9 = smov %s1218_s10 }
 0x12e   : > { %p9_p5 = scmp.ge.s32.totalorder %s12_s11, 6   ;;  %s1404_s10 = smov %s1406_s12 }
 0x130   :  { %11 = sbr.rel (!%p9_p5) target bundleno = 2 (0x2), region = 61 }

// kernel: a_call__.19
= control target key start
LH: loop header
LB: loop body
LE: loop exit
PB: predicated region body
PF: predicated region fallthrough
CT: control target
= control target key end

     0   :  { %s47_s0 = inlined_call_operand.vmem [shape: f32[8,128], index: 0, kind: input, shape index: {}]   ;;  %s48_s1 = inlined_call_operand.vmem [shape: f32[1,2,128], index: 1, kind: output, shape index: {}]  }
   0x1   :  { %v8_v0 = vld [vmem:[%s47_s0] sm:$0xff] }
   0x2   :  { %v9_v1 = vrot.slane %v8_v0, 4  ;;  %v16_v2 = vmul.f32 %v8_v0, %v8_v0 }
   0x4   :  { %v10_v3 = vadd.f32 %v9_v1, %v8_v0  ;;  %v17_v4 = vrot.slane %v16_v2, 4 }
   0x6   :  { %v11_v5 = vrot.slane %v10_v3, 2  ;;  %v18_v6 = vadd.f32 %v17_v4, %v16_v2 }
   0x8   :  { %v12_v7 = vadd.f32 %v11_v5, %v10_v3  ;;  %v19_v8 = vrot.slane %v18_v6, 2 }
   0xa   :  { %v13_v9 = vrot.slane %v12_v7, 1  ;;  %v20_v10 = vadd.f32 %v19_v8, %v18_v6 }
   0xc   :  { %v14_v11 = vadd.f32 %v13_v9, %v12_v7  ;;  %v21_v12 = vrot.slane %v20_v10, 1 }
   0xe   :  { %15 = vst [vmem:[%s48_s1] sm:$0x1] %v14_v11  ;;  %v22_v13 = vadd.f32 %v21_v12, %v20_v10 }
  0x10   :  { %23 = vst [vmem:[%s48_s1 + $0x1] sm:$0x1] %v22_v13 }

// kernel: a_call__.20
= control target key start
LH: loop header
LB: loop body
LE: loop exit
PB: predicated region body
PF: predicated region fallthrough
CT: control target
= control target key end

     0   :  { %s71_s0 = inlined_call_operand.vmem [shape: f32[8,128], index: 0, kind: input, shape index: {}]   ;;  %s72_s1 = inlined_call_operand.vmem [shape: f32[1,128], index: 1, kind: input, shape index: {}]   ;;  %s73_s2 = inlined_call_operand.vmem [shape: f32[1,128], index: 2, kind: input, shape index: {}]   ;;  %s74_s3 = inlined_call_operand.vmem [shape: f32[8,128], index: 3, kind: output, shape index: {}]  }
   0x1   :  { %v14_v0 = vld [vmem:[%s71_s0] sm:$0xff] }
   0x2   :  { %v37_v1 = vld [vmem:[%s72_s1] ss:$0 sm:$0xff] }
   0x3   :  { %v38_v2 = vld [vmem:[%s73_s2] ss:$0 sm:$0xff]  ;;  %v22_v3 = vmul.f32 %v37_v1, %v14_v0 }
   0x5   :  { %v30_v4 = vadd.f32 %v38_v2, %v22_v3 }
   0x7   :  { %v31_v5 = vmax.f32 %v30_v4, 0.0 }
   0x9   :  { %32 = vst [vmem:[%s74_s3] sm:$0xff] %v31_v5 }

// kernel: a_call__.24
= control target key start
LH: loop header
LB: loop body
LE: loop exit
PB: predicated region body
PF: predicated region fallthrough
CT: control target
= control target key end

     0   :  { %s282_s6 = smov 0   ;;  %s322_s0 = inlined_call_operand.vmem [shape: f32[256,128], index: 0, kind: input, shape index: {}]   ;;  %s323_s1 = inlined_call_operand.vmem [shape: f32[2,2,128], index: 1, kind: output, shape index: {}]  }
   0x1 LB: > { %s288_s7 = sadd.s32 4294967295, %s270_s6   ;;  %p250_p0 = scmp.ge.s32.totalorder %s270_s6, 1  ;;  %s270_s6 = sphi %s282_s6, %s11_s6  }
   0x2   : > { %p88_p1 = scmp.lt.s32.totalorder %s270_s6, 3 }
   0x4   : > { %p89_p2 = pnand %p250_p0, %p88_p1 }
   0x5   : > { %s251_s8 = sshll.u32 (!%p89_p2), %s288_s7, 4  ;;  %p113_p4 = scmp.lt.s32.totalorder (!%p89_p2), %s288_s7, 1 }
   0x6   : > { %92 = sbr.rel (%p89_p2) target bundleno = 60 (0x3c), region = 24  ;;  %p108_p3 = scmp.lt.s32.totalorder (!%p89_p2), %s251_s8, 31 }
   0xb   : > { %s325_s8 = smov (!%p108_p3, %s251_s8), 31  ;;  %s327_s7 = smov (!%p113_p4, %s288_s7), 1 }
   0xc   : > { %s252_s9 = sshll.u32 %s325_s8, 3  ;;  %s253_s13 = sshll.u32 %s327_s7, 1 }
   0xd   : > { %s296_s12 = scalar_lea.vmem %s322_s0, %s252_s9  ;;  %s116_s16 = scalar_lea.vmem %s323_s1, %s253_s13 }
   0xe   : > { %v117_v0 = vld [vmem:[%s296_s12] sm:$0xff]  ;;  %v118_v1 = vld [vmem:[%s296_s12 + $0x8] sm:$0xff]  ;;  %v119_v2 = vld [vmem:[%s296_s12 + $0x10] sm:$0xff] }
   0xf   : > { %v120_v3 = vld [vmem:[%s296_s12 + $0x18] sm:$0xff]  ;;  %v133_v4 = vadd.f32 %v118_v1, %v117_v0  ;;  %v155_v5 = vmul.f32 %v117_v0, %v117_v0  ;;  %v156_v6 = vmul.f32 %v118_v1, %v118_v1  ;;  %v157_v7 = vmul.f32 %v119_v2, %v119_v2  ;;  %v121_v8 = vld [vmem:[%s296_s12 + $0x20] sm:$0xff]  ;;  %v122_v12 = vld [vmem:[%s296_s12 + $0x28] sm:$0xff] }
  0x10   : > { %v158_v10 = vmul.f32 %v120_v3, %v120_v3  ;;  %v159_v14 = vmul.f32 %v121_v8, %v121_v8  ;;  %v123_v16 = vld [vmem:[%s296_s12 + $0x30] sm:$0xff]  ;;  %v160_v18 = vmul.f32 %v122_v12, %v122_v12  ;;  %v124_v20 = vld [vmem:[%s296_s12 + $0x38] sm:$0xff]  ;;  %v125_v24 = vld [vmem:[%s296_s12 + $0x40] sm:$0xff] }
  0x11   : > { %v134_v9 = vadd.f32 %v133_v4, %v119_v2  ;;  %v171_v11 = vadd.f32 %v156_v6, %v155_v5  ;;  %v161_v22 = vmul.f32 %v123_v16, %v123_v16  ;;  %v162_v26 = vmul.f32 %v124_v20, %v124_v20  ;;  %v126_v28 = vld [vmem:[%s296_s12 + $0x48] sm:$0xff]  ;;  %v127_v32 = vld [vmem:[%s296_s12 + $0x50] sm:$0xff]  ;;  %v128_v36 = vld [vmem:[%s296_s12 + $0x58] sm:$0xff] }
  0x12   : > { %v163_v30 = vmul.f32 %v125_v24, %v125_v24  ;;  %v164_v34 = vmul.f32 %v126_v28, %v126_v28  ;;  %v165_v38 = vmul.f32 %v127_v32, %v127_v32  ;;  %v129_v40 = vld [vmem:[%s296_s12 + $0x60] sm:$0xff]  ;;  %v166_v42 = vmul.f32 %v128_v36, %v128_v36  ;;  %v130_v44 = vld [vmem:[%s296_s12 + $0x68] sm:$0xff]  ;;  %v131_v48 = vld [vmem:[%s296_s12 + $0x70] sm:$0xff] }
  0x13   : > { %v135_v13 = vadd.f32 %v134_v9, %v120_v3  ;;  %v172_v15 = vadd.f32 %v171_v11, %v157_v7  ;;  %v167_v46 = vmul.f32 %v129_v40, %v129_v40  ;;  %v168_v50 = vmul.f32 %v130_v44, %v130_v44  ;;  %v132_v52 = vld [vmem:[%s296_s12 + $0x78] sm:$0xff] }
  0x14   : > { %v169_v54 = vmul.f32 %v131_v48, %v131_v48  ;;  %v170_v57 = vmul.f32 %v132_v52, %v132_v52 }
  0x15   : > { %v136_v17 = vadd.f32 %v135_v13, %v121_v8  ;;  %v173_v19 = vadd.f32 %v172_v15, %v158_v10 }
  0x17   : > { %v137_v21 = vadd.f32 %v136_v17, %v122_v12  ;;  %v174_v23 = vadd.f32 %v173_v19, %v159_v14 }
  0x19   : > { %v138_v25 = vadd.f32 %v137_v21, %v123_v16  ;;  %v175_v27 = vadd.f32 %v174_v23, %v160_v18 }
  0x1b   : > { %v139_v29 = vadd.f32 %v138_v25, %v124_v20  ;;  %v176_v31 = vadd.f32 %v175_v27, %v161_v22 }
  0x1d   : > { %v140_v33 = vadd.f32 %v139_v29, %v125_v24  ;;  %v177_v35 = vadd.f32 %v176_v31, %v162_v26 }
  0x1f   : > { %v141_v37 = vadd.f32 %v140_v33, %v126_v28  ;;  %v178_v39 = vadd.f32 %v177_v35, %v163_v30 }
  0x21   : > { %v142_v41 = vadd.f32 %v141_v37, %v127_v32  ;;  %v179_v43 = vadd.f32 %v178_v39, %v164_v34 }
  0x23   : > { %v143_v45 = vadd.f32 %v142_v41, %v128_v36  ;;  %v180_v47 = vadd.f32 %v179_v43, %v165_v38 }
  0x25   : > { %v144_v49 = vadd.f32 %v143_v45, %v129_v40  ;;  %v181_v51 = vadd.f32 %v180_v47, %v166_v42 }
  0x27   : > { %v145_v53 = vadd.f32 %v144_v49, %v130_v44  ;;  %v182_v55 = vadd.f32 %v181_v51, %v167_v46 }
  0x29   : > { %v146_v56 = vadd.f32 %v145_v53, %v131_v48  ;;  %v183_v58 = vadd.f32 %v182_v55, %v168_v50 }
  0x2b   : > { %v147_v59 = vadd.f32 %v146_v56, %v132_v52  ;;  %v184_v60 = vadd.f32 %v183_v58, %v169_v54 }
  0x2d   : > { %v148_v61 = vrot.slane %v147_v59, 4  ;;  %v185_v62 = vadd.f32 %v184_v60, %v170_v57 }
  0x2f   : > { %v149_v63 = vadd.f32 %v148_v61, %v147_v59  ;;  %v186_v0 = vrot.slane %v185_v62, 4 }
  0x31   : > { %v150_v1 = vrot.slane %v149_v63, 2  ;;  %v187_v2 = vadd.f32 %v186_v0, %v185_v62 }
  0x33   : > { %v151_v3 = vadd.f32 %v150_v1, %v149_v63  ;;  %v188_v4 = vrot.slane %v187_v2, 2 }
  0x35   : > { %v152_v5 = vrot.slane %v151_v3, 1  ;;  %v189_v6 = vadd.f32 %v188_v4, %v187_v2 }
  0x37   : > { %v153_v7 = vadd.f32 %v152_v5, %v151_v3  ;;  %v190_v8 = vrot.slane %v189_v6, 1 }
  0x39   : > { %154 = vst [vmem:[%s116_s16] sm:$0x1] %v153_v7  ;;  %v191_v9 = vadd.f32 %v190_v8, %v189_v6 }
  0x3b   : > { %192 = vst [vmem:[%s116_s16 + $0x1] sm:$0x1] %v191_v9 }
  0x3c PF: > { %s11_s6 = sadd.s32 1, %s270_s6  }
  0x3d   : > { %p8_p5 = scmp.ge.s32.totalorder %s11_s6, 4  }
  0x3f   :  { %10 = sbr.rel (!%p8_p5) target bundleno = 1 (0x1), region = 54 }

// kernel: tile.63
= control target key start
LH: loop header
LB: loop body
LE: loop exit
PB: predicated region body
PF: predicated region fallthrough
CT: control target
= control target key end

     0   :  { %s22_s0 = inlined_call_operand.vmem [shape: f32[16], index: 0, kind: input, shape index: {}]   ;;  %s23_s1 = inlined_call_operand.vmem [shape: f32[8,16], index: 1, kind: output, shape index: {}]  }
   0x1   :  { %v4_v0 = vld [vmem:[%s22_s0] ss:$0 sm:$0xff] }
   0x2   :  { %5 = vst [vmem:[%s23_s1] sm:$0xff] %v4_v0 }

// kernel: tile.68
= control target key start
LH: loop header
LB: loop body
LE: loop exit
PB: predicated region body
PF: predicated region fallthrough
CT: control target
= control target key end

     0   :  { %s69_s10 = smov 112   ;;  %s70_s11 = smov 80   ;;  %vm3_vm0 = vcmask 130048   ;;  %vm9_vm1 = vcmask 1048448   ;;  %vm15_vm2 = vcmask 917248   ;;  %vm21_vm3 = vcmask 786048   ;;  %s113_s0 = inlined_call_operand.vmem [shape: f32[8,16], index: 0, kind: input, shape index: {}]   ;;  %s114_s1 = inlined_call_operand.vmem [shape: f32[1,128], index: 1, kind: output, shape index: {}]  }
   0x1   :  { %v55_v0 = vld [vmem:[%s113_s0 + $0x7] sm:$0x1]   ;;  %v57_v1 = vld [vmem:[%s113_s0 + $0x5] sm:$0x1]   ;;  %v56_v2 = vld [vmem:[%s113_s0 + $0x6] sm:$0x1]  }
   0x2   :  { %7 = vrot.lane.b32.xlu0 %v55_v0, %s69_s10  ;;  %19 = vrot.lane.b32.xlu1 %v57_v1, %s70_s11  ;;  %v58_v3 = vld [vmem:[%s113_s0 + $0x4] sm:$0x1]   ;;  %v2_v4 = vld [vmem:[%s113_s0] sm:$0x1]   ;;  %s71_s18 = smov 96   ;;  %s72_s19 = smov 64  }
   0x3   :  { %4 = vst.msk [vmem:[#allocation0] sm:$0x1] %vm3_vm0, %v2_v4   ;;  %v59_v5 = vld [vmem:[%s113_s0 + $0x3] sm:$0x1]   ;;  %v60_v6 = vld [vmem:[%s113_s0 + $0x2] sm:$0x1]  }
   0x4   :  { %s73_s24 = smov 48   ;;  %s74_s25 = smov 32   ;;  %v61_v7 = vld [vmem:[%s113_s0 + $0x1] sm:$0x1]   ;;  %vm27_vm4 = vcmask 654848   ;;  %vm33_vm5 = vcmask 523648  }
   0x5   :  { %s75_s0 = smov 16   ;;  %vm39_vm6 = vcmask 392448   ;;  %vm45_vm7 = vcmask 261248  }
   0x6   :  { %13 = vrot.lane.b32.xlu0 %v56_v2, %s71_s18  ;;  %25 = vrot.lane.b32.xlu1 %v58_v3, %s72_s19 }
   0xa   :  { %31 = vrot.lane.b32.xlu0 %v59_v5, %s73_s24  ;;  %37 = vrot.lane.b32.xlu1 %v60_v6, %s74_s25 }
   0xe   :  { %43 = vrot.lane.b32.xlu0 %v61_v7, %s75_s0 }
  0x74   :  { %v8_v8 = vpop.permute.xlu0 %7   ;;  %v20_v9 = vpop.permute.xlu1 %19  }
  0x75   :  { %10 = vst.msk [vmem:[#allocation0] sm:$0x1] %vm9_vm1, %v8_v8  }
  0x78   :  { %v14_v10 = vpop.permute.xlu0 %13   ;;  %v26_v11 = vpop.permute.xlu1 %25  }
  0x79   :  { %16 = vst.msk [vmem:[#allocation0] sm:$0x1] %vm15_vm2, %v14_v10  }
  0x7a   :  { %22 = vst.msk [vmem:[#allocation0] sm:$0x1] %vm21_vm3, %v20_v9  }
  0x7b   :  { %28 = vst.msk [vmem:[#allocation0] sm:$0x1] %vm27_vm4, %v26_v11  }
  0x7c   :  { %v32_v12 = vpop.permute.xlu0 %31   ;;  %v38_v13 = vpop.permute.xlu1 %37  }
  0x7d   :  { %34 = vst.msk [vmem:[#allocation0] sm:$0x1] %vm33_vm5, %v32_v12  }
  0x7e   :  { %40 = vst.msk [vmem:[#allocation0] sm:$0x1] %vm39_vm6, %v38_v13  }
  0x80   :  { %v44_v14 = vpop.permute.xlu0 %43  }
  0x81   :  { %46 = vst.msk [vmem:[#allocation0] sm:$0x1] %vm45_vm7, %v44_v14  }
  0x88   :  { %v51_v15 = vld [vmem:[#allocation0] sm:$0x1] }
  0x89   :  { %54 = vst [vmem:[%s114_s1] sm:$0x1] %v51_v15 }

// kernel: a_call__.25
= control target key start
LH: loop header
LB: loop body
LE: loop exit
PB: predicated region body
PF: predicated region fallthrough
CT: control target
= control target key end

     0   :  { %s373_s12 = smov 0   ;;  %s468_s0 = inlined_call_operand.vmem [shape: f32[256,128], index: 0, kind: input, shape index: {}]   ;;  %s469_s1 = inlined_call_operand.vmem [shape: f32[1,128], index: 1, kind: input, shape index: {}]   ;;  %s470_s2 = inlined_call_operand.vmem [shape: f32[1,128], index: 2, kind: input, shape index: {}]   ;;  %s471_s3 = inlined_call_operand.vmem [shape: f32[256,128], index: 3, kind: output, shape index: {}]  }
   0x1 LB: > { %s324_s13 = sadd.s32 4294967295, %s351_s12   ;;  %p328_p0 = scmp.ge.s32.totalorder %s351_s12, 1  ;;  %s351_s12 = sphi %s373_s12, %s13_s12  }
   0x2   : > { %p138_p1 = scmp.lt.s32.totalorder %s351_s12, 3 }
   0x4   : > { %p139_p2 = pnand %p328_p0, %p138_p1 }
   0x5   : > { %s329_s14 = sshll.u32 (!%p139_p2), %s324_s13, 4 }
   0x6   : > { %142 = sbr.rel (%p139_p2) target bundleno = 32 (0x20), region = 32  ;;  %p163_p3 = scmp.lt.s32.totalorder (!%p139_p2), %s329_s14, 31 }
   0xb   : > { %s473_s14 = smov (!%p163_p3, %s329_s14), 31  ;;  %v384_v0 = vld [vmem:[%s469_s1] ss:$0 sm:$0xff] }
   0xc   : > { %s330_s15 = sshll.u32 %s473_s14, 3  ;;  %v394_v1 = vld [vmem:[%s470_s2] ss:$0 sm:$0xff] }
   0xd   : > { %s389_s20 = scalar_lea.vmem %s468_s0, %s330_s15  ;;  %s417_s25 = scalar_lea.vmem %s471_s3, %s330_s15 }
   0xe   : > { %v174_v2 = vld [vmem:[%s389_s20] sm:$0xff]  ;;  %v175_v3 = vld [vmem:[%s389_s20 + $0x8] sm:$0xff]  ;;  %v176_v4 = vld [vmem:[%s389_s20 + $0x10] sm:$0xff] }
   0xf   : > { %v197_v5 = vmul.f32 %v384_v0, %v174_v2  ;;  %v198_v6 = vmul.f32 %v384_v0, %v175_v3  ;;  %v199_v7 = vmul.f32 %v384_v0, %v176_v4  ;;  %v177_v8 = vld [vmem:[%s389_s20 + $0x18] sm:$0xff]  ;;  %v178_v9 = vld [vmem:[%s389_s20 + $0x20] sm:$0xff]  ;;  %v179_v10 = vld [vmem:[%s389_s20 + $0x28] sm:$0xff] }
  0x10   : > { %v200_v11 = vmul.f32 %v384_v0, %v177_v8  ;;  %v201_v12 = vmul.f32 %v384_v0, %v178_v9  ;;  %v202_v13 = vmul.f32 %v384_v0, %v179_v10  ;;  %v180_v14 = vld [vmem:[%s389_s20 + $0x30] sm:$0xff]  ;;  %v181_v15 = vld [vmem:[%s389_s20 + $0x38] sm:$0xff]  ;;  %v182_v24 = vld [vmem:[%s389_s20 + $0x40] sm:$0xff] }
  0x11   : > { %v220_v16 = vadd.f32 %v394_v1, %v197_v5  ;;  %v221_v17 = vadd.f32 %v394_v1, %v198_v6  ;;  %v222_v18 = vadd.f32 %v394_v1, %v199_v7  ;;  %v203_v19 = vmul.f32 %v384_v0, %v180_v14  ;;  %v183_v25 = vld [vmem:[%s389_s20 + $0x48] sm:$0xff]  ;;  %v184_v26 = vld [vmem:[%s389_s20 + $0x50] sm:$0xff]  ;;  %v185_v31 = vld [vmem:[%s389_s20 + $0x58] sm:$0xff] }
  0x12   : > { %v223_v20 = vadd.f32 %v394_v1, %v200_v11  ;;  %v224_v21 = vadd.f32 %v394_v1, %v201_v12  ;;  %v225_v22 = vadd.f32 %v394_v1, %v202_v13  ;;  %v204_v23 = vmul.f32 %v384_v0, %v181_v15  ;;  %v186_v32 = vld [vmem:[%s389_s20 + $0x60] sm:$0xff]  ;;  %v187_v33 = vld [vmem:[%s389_s20 + $0x68] sm:$0xff]  ;;  %v188_v38 = vld [vmem:[%s389_s20 + $0x70] sm:$0xff] }
  0x13   : > { %v236_v27 = vmax.f32 %v220_v16, 0.0  ;;  %v237_v28 = vmax.f32 %v221_v17, 0.0  ;;  %v238_v29 = vmax.f32 %v222_v18, 0.0  ;;  %v226_v30 = vadd.f32 %v394_v1, %v203_v19  ;;  %v189_v43 = vld [vmem:[%s389_s20 + $0x78] sm:$0xff] }
  0x14   : > { %v239_v34 = vmax.f32 %v223_v20, 0.0  ;;  %v240_v35 = vmax.f32 %v224_v21, 0.0  ;;  %v241_v36 = vmax.f32 %v225_v22, 0.0  ;;  %v227_v37 = vadd.f32 %v394_v1, %v204_v23 }
  0x15   : > { %252 = vst [vmem:[%s417_s25] sm:$0xff] %v236_v27  ;;  %253 = vst [vmem:[%s417_s25 + $0x8] sm:$0xff] %v237_v28  ;;  %v242_v39 = vmax.f32 %v226_v30, 0.0  ;;  %v205_v40 = vmul.f32 %v384_v0, %v182_v24  ;;  %v206_v41 = vmul.f32 %v384_v0, %v183_v25  ;;  %v207_v42 = vmul.f32 %v384_v0, %v184_v26 }
  0x16   : > { %254 = vst [vmem:[%s417_s25 + $0x10] sm:$0xff] %v238_v29  ;;  %255 = vst [vmem:[%s417_s25 + $0x18] sm:$0xff] %v239_v34  ;;  %v243_v44 = vmax.f32 %v227_v37, 0.0  ;;  %v208_v45 = vmul.f32 %v384_v0, %v185_v31  ;;  %v209_v46 = vmul.f32 %v384_v0, %v186_v32  ;;  %v210_v47 = vmul.f32 %v384_v0, %v187_v33 }
  0x17   : > { %256 = vst [vmem:[%s417_s25 + $0x20] sm:$0xff] %v240_v35  ;;  %257 = vst [vmem:[%s417_s25 + $0x28] sm:$0xff] %v241_v36  ;;  %v228_v48 = vadd.f32 %v394_v1, %v205_v40  ;;  %v229_v49 = vadd.f32 %v394_v1, %v206_v41  ;;  %v230_v50 = vadd.f32 %v394_v1, %v207_v42 }
  0x18   : > { %258 = vst [vmem:[%s417_s25 + $0x30] sm:$0xff] %v242_v39  ;;  %v211_v51 = vmul.f32 %v384_v0, %v188_v38  ;;  %259 = vst [vmem:[%s417_s25 + $0x38] sm:$0xff] %v243_v44  ;;  %v231_v52 = vadd.f32 %v394_v1, %v208_v45  ;;  %v232_v53 = vadd.f32 %v394_v1, %v209_v46 }
  0x19   : > { %v233_v54 = vadd.f32 %v394_v1, %v210_v47  ;;  %v212_v55 = vmul.f32 %v384_v0, %v189_v43  ;;  %v244_v56 = vmax.f32 %v228_v48, 0.0  ;;  %v245_v57 = vmax.f32 %v229_v49, 0.0 }
  0x1a   : > { %v246_v58 = vmax.f32 %v230_v50, 0.0  ;;  %v234_v59 = vadd.f32 %v394_v1, %v211_v51  ;;  %v247_v60 = vmax.f32 %v231_v52, 0.0  ;;  %v248_v61 = vmax.f32 %v232_v53, 0.0 }
  0x1b   : > { %v249_v62 = vmax.f32 %v233_v54, 0.0  ;;  %v235_v63 = vadd.f32 %v394_v1, %v212_v55  ;;  %260 = vst [vmem:[%s417_s25 + $0x40] sm:$0xff] %v244_v56  ;;  %261 = vst [vmem:[%s417_s25 + $0x48] sm:$0xff] %v245_v57 }
  0x1c   : > { %262 = vst [vmem:[%s417_s25 + $0x50] sm:$0xff] %v246_v58  ;;  %v250_v2 = vmax.f32 %v234_v59, 0.0  ;;  %263 = vst [vmem:[%s417_s25 + $0x58] sm:$0xff] %v247_v60 }
  0x1d   : > { %264 = vst [vmem:[%s417_s25 + $0x60] sm:$0xff] %v248_v61  ;;  %265 = vst [vmem:[%s417_s25 + $0x68] sm:$0xff] %v249_v62  ;;  %v251_v0 = vmax.f32 %v235_v63, 0.0 }
  0x1e   : > { %266 = vst [vmem:[%s417_s25 + $0x70] sm:$0xff] %v250_v2 }
  0x1f   : > { %267 = vst [vmem:[%s417_s25 + $0x78] sm:$0xff] %v251_v0 }
  0x20 PF: > { %s13_s12 = sadd.s32 1, %s351_s12  }
  0x21   : > { %p10_p4 = scmp.ge.s32.totalorder %s13_s12, 4  }
  0x23   :  { %12 = sbr.rel (!%p10_p4) target bundleno = 1 (0x1), region = 62 }

// kernel: a_call__.26
= control target key start
LH: loop header
LB: loop body
LE: loop exit
PB: predicated region body
PF: predicated region fallthrough
CT: control target
= control target key end

     0   :  { %s234_s6 = smov 0   ;;  %s251_s0 = inlined_call_operand.vmem [shape: f32[64,128], index: 0, kind: input, shape index: {}]   ;;  %s252_s1 = inlined_call_operand.vmem [shape: f32[2,2,128], index: 1, kind: output, shape index: {}]  }
   0x1 LB: > { %s198_s7 = sadd.s32 4294967295, %s222_s6   ;;  %p202_p0 = scmp.ge.s32.totalorder %s222_s6, 1  ;;  %s222_s6 = sphi %s234_s6, %s11_s6  }
   0x2   : > { %p88_p1 = scmp.lt.s32.totalorder %s222_s6, 3 }
   0x4   : > { %p89_p2 = pnand %p202_p0, %p88_p1 }
   0x5   : > { %s203_s8 = sshll.u32 (!%p89_p2), %s198_s7, 2  ;;  %p113_p4 = scmp.lt.s32.totalorder (!%p89_p2), %s198_s7, 1 }
   0x6   : > { %92 = sbr.rel (%p89_p2) target bundleno = 36 (0x24), region = 24  ;;  %p108_p3 = scmp.lt.s32.totalorder (!%p89_p2), %s203_s8, 7 }
   0xb   : > { %s254_s8 = smov (!%p108_p3, %s203_s8), 7  ;;  %s256_s7 = smov (!%p113_p4, %s198_s7), 1 }
   0xc   : > { %s204_s9 = sshll.u32 %s254_s8, 3  ;;  %s205_s13 = sshll.u32 %s256_s7, 1 }
   0xd   : > { %s111_s12 = scalar_lea.vmem %s251_s0, %s204_s9  ;;  %s116_s16 = scalar_lea.vmem %s252_s1, %s205_s13 }
   0xe   : > { %v117_v0 = vld [vmem:[%s111_s12] sm:$0xff]  ;;  %v118_v1 = vld [vmem:[%s111_s12 + $0x8] sm:$0xff]  ;;  %v119_v2 = vld [vmem:[%s111_s12 + $0x10] sm:$0xff] }
   0xf   : > { %v120_v3 = vld [vmem:[%s111_s12 + $0x18] sm:$0xff]  ;;  %v121_v4 = vadd.f32 %v118_v1, %v117_v0  ;;  %v131_v5 = vmul.f32 %v117_v0, %v117_v0  ;;  %v132_v6 = vmul.f32 %v118_v1, %v118_v1  ;;  %v133_v7 = vmul.f32 %v119_v2, %v119_v2 }
  0x10   : > { %v134_v9 = vmul.f32 %v120_v3, %v120_v3 }
  0x11   : > { %v122_v8 = vadd.f32 %v121_v4, %v119_v2  ;;  %v135_v10 = vadd.f32 %v132_v6, %v131_v5 }
  0x13   : > { %v123_v11 = vadd.f32 %v122_v8, %v120_v3  ;;  %v136_v12 = vadd.f32 %v135_v10, %v133_v7 }
  0x15   : > { %v124_v13 = vrot.slane %v123_v11, 4  ;;  %v137_v14 = vadd.f32 %v136_v12, %v134_v9 }
  0x17   : > { %v125_v15 = vadd.f32 %v124_v13, %v123_v11  ;;  %v138_v16 = vrot.slane %v137_v14, 4 }
  0x19   : > { %v126_v17 = vrot.slane %v125_v15, 2  ;;  %v139_v18 = vadd.f32 %v138_v16, %v137_v14 }
  0x1b   : > { %v127_v19 = vadd.f32 %v126_v17, %v125_v15  ;;  %v140_v20 = vrot.slane %v139_v18, 2 }
  0x1d   : > { %v128_v21 = vrot.slane %v127_v19, 1  ;;  %v141_v22 = vadd.f32 %v140_v20, %v139_v18 }
  0x1f   : > { %v129_v23 = vadd.f32 %v128_v21, %v127_v19  ;;  %v142_v24 = vrot.slane %v141_v22, 1 }
  0x21   : > { %130 = vst [vmem:[%s116_s16] sm:$0x1] %v129_v23  ;;  %v143_v25 = vadd.f32 %v142_v24, %v141_v22 }
  0x23   : > { %144 = vst [vmem:[%s116_s16 + $0x1] sm:$0x1] %v143_v25 }
  0x24 PF: > { %s11_s6 = sadd.s32 1, %s222_s6  }
  0x25   : > { %p8_p5 = scmp.ge.s32.totalorder %s11_s6, 4  }
  0x27   :  { %10 = sbr.rel (!%p8_p5) target bundleno = 1 (0x1), region = 54 }

// kernel: a_call__.27
= control target key start
LH: loop header
LB: loop body
LE: loop exit
PB: predicated region body
PF: predicated region fallthrough
CT: control target
= control target key end

     0   :  { %s313_s12 = smov 0   ;;  %s336_s0 = inlined_call_operand.vmem [shape: f32[64,128], index: 0, kind: input, shape index: {}]   ;;  %s337_s1 = inlined_call_operand.vmem [shape: f32[1,128], index: 1, kind: input, shape index: {}]   ;;  %s338_s2 = inlined_call_operand.vmem [shape: f32[1,128], index: 2, kind: input, shape index: {}]   ;;  %s339_s3 = inlined_call_operand.vmem [shape: f32[64,128], index: 3, kind: output, shape index: {}]  }
   0x1 LB: > { %s264_s13 = sadd.s32 4294967295, %s291_s12   ;;  %p268_p0 = scmp.ge.s32.totalorder %s291_s12, 1  ;;  %s291_s12 = sphi %s313_s12, %s13_s12  }
   0x2   : > { %p138_p1 = scmp.lt.s32.totalorder %s291_s12, 3 }
   0x4   : > { %p139_p2 = pnand %p268_p0, %p138_p1 }
   0x5   : > { %s269_s14 = sshll.u32 (!%p139_p2), %s264_s13, 2 }
   0x6   : > { %142 = sbr.rel (%p139_p2) target bundleno = 23 (0x17), region = 32  ;;  %p163_p3 = scmp.lt.s32.totalorder (!%p139_p2), %s269_s14, 7 }
   0xb   : > { %s341_s14 = smov (!%p163_p3, %s269_s14), 7  ;;  %v273_v0 = vld [vmem:[%s337_s1] ss:$0 sm:$0xff] }
   0xc   : > { %s270_s15 = sshll.u32 %s341_s14, 3  ;;  %v274_v1 = vld [vmem:[%s338_s2] ss:$0 sm:$0xff] }
   0xd   : > { %s166_s20 = scalar_lea.vmem %s336_s0, %s270_s15  ;;  %s172_s25 = scalar_lea.vmem %s339_s3, %s270_s15 }
   0xe   : > { %v174_v2 = vld [vmem:[%s166_s20] sm:$0xff]  ;;  %v175_v3 = vld [vmem:[%s166_s20 + $0x8] sm:$0xff]  ;;  %v176_v4 = vld [vmem:[%s166_s20 + $0x10] sm:$0xff] }
   0xf   : > { %v185_v5 = vmul.f32 %v273_v0, %v174_v2  ;;  %v186_v6 = vmul.f32 %v273_v0, %v175_v3  ;;  %v187_v7 = vmul.f32 %v273_v0, %v176_v4  ;;  %v177_v8 = vld [vmem:[%s166_s20 + $0x18] sm:$0xff] }
  0x10   : > { %v188_v9 = vmul.f32 %v273_v0, %v177_v8 }
  0x11   : > { %v196_v10 = vadd.f32 %v274_v1, %v185_v5  ;;  %v197_v11 = vadd.f32 %v274_v1, %v186_v6  ;;  %v198_v12 = vadd.f32 %v274_v1, %v187_v7 }
  0x12   : > { %v199_v13 = vadd.f32 %v274_v1, %v188_v9 }
  0x13   : > { %v200_v14 = vmax.f32 %v196_v10, 0.0  ;;  %v201_v15 = vmax.f32 %v197_v11, 0.0  ;;  %v202_v16 = vmax.f32 %v198_v12, 0.0 }
  0x14   : > { %v203_v17 = vmax.f32 %v199_v13, 0.0 }
  0x15   : > { %204 = vst [vmem:[%s172_s25] sm:$0xff] %v200_v14  ;;  %205 = vst [vmem:[%s172_s25 + $0x8] sm:$0xff] %v201_v15 }
  0x16   : > { %206 = vst [vmem:[%s172_s25 + $0x10] sm:$0xff] %v202_v16  ;;  %207 = vst [vmem:[%s172_s25 + $0x18] sm:$0xff] %v203_v17 }
  0x17 PF: > { %s13_s12 = sadd.s32 1, %s291_s12  }
  0x18   : > { %p10_p4 = scmp.ge.s32.totalorder %s13_s12, 4  }
  0x1a   :  { %12 = sbr.rel (!%p10_p4) target bundleno = 1 (0x1), region = 62 }

</bundles_post_ra>
